<compile_context>
chip_gen: v7x
topology: tpu7x:2x2x1
jax: 0.10.0
libtpu: 0.0.40
codegen_flags: <defaults>
</compile_context>

<pallas_src>
import math
import functools

import jax
import jax.numpy as jnp
from jax.experimental import pallas as pl
from jax.experimental.pallas import tpu as pltpu

# ----------------- small, module-consistent config -----------------
EMB = 32            # emb_size
HEADS = 4
DEPTH = 2
N_CLASSES = 6
N_CHANNELS = 4
N_FFT = 16
HOP = 8
N_FREQ = N_FFT // 2 + 1       # onesided rfft bins = 9
DH = EMB // HEADS             # head dim
FF = 4 * EMB                  # feed-forward hidden (mult=4, lucidrains default)
MAX_LEN = 1000

_VMEM = pl.BlockSpec(memory_space=pltpu.MemorySpace.VMEM)


# ----------------------------- kernel ------------------------------
def _layernorm(x, g, b):
    mu = jnp.mean(x, axis=-1, keepdims=True)
    var = jnp.mean(jnp.square(x - mu), axis=-1, keepdims=True)
    return (x - mu) * jax.lax.rsqrt(var + 1e-5) * g + b


def biot_fused_kernel(frames_ref, cos_ref, sin_ref, w_proj_ref, add_ref,
                      seg_ref, segT_ref, head_mask_ref,
                      attn_g_ref, attn_b_ref, wqkv_ref, wo_ref, bo_ref,
                      ffn_g_ref, ffn_b_ref, w1_ref, b1_ref, w2_ref, b2_ref,
                      w_cls_ref, b_cls_ref, out_ref, *, batch, seq):
    """Entire BIOTClassifier forward, VMEM-resident, single HBM write (logits)."""
    D = EMB
    scale = DH ** -0.5
    inv_seq = 1.0 / seq
    head_mask = head_mask_ref[...]                                   # (D, D) block-diag per head
    seg = seg_ref[...]                                               # (B, B*N) 0/1 segment indicator
    segT = segT_ref[...]                                             # (B*N, B)

    # ---------- patch embedding: |STFT| -> Linear -> + (proj bias + channel tok + PE)
    f = frames_ref[...]                                              # (B*N, n_fft)
    re = jnp.dot(f, cos_ref[...], preferred_element_type=jnp.float32)   # (B*N, n_freq)
    im = jnp.dot(f, sin_ref[...], preferred_element_type=jnp.float32)   # (B*N, n_freq)
    mag = jnp.sqrt(re * re + im * im)                                # torch.abs(torch.stft(...))
    tok = jnp.dot(mag, w_proj_ref[...], preferred_element_type=jnp.float32) + add_ref[...]

    # ---------- transformer: DEPTH x (pre-LN linear-attention + pre-LN FFN), residuals
    for d in range(DEPTH):                                           # unrolled (DEPTH=2)
        # ---- linear-attention block
        h = _layernorm(tok, attn_g_ref[d], attn_b_ref[d])
        qkv = jnp.dot(h, wqkv_ref[d], preferred_element_type=jnp.float32)   # fused QKV (B*N, 3D)
        q = qkv[:, :D]
        k = qkv[:, D:2 * D]
        v = qkv[:, 2 * D:]

        # softmax(q) within each head chunk (no head loop): row-max subtraction is a
        # per-row constant, so per-chunk softmax is unchanged; per-chunk sums are
        # broadcast back with one block-diagonal-mask matmul.
        qe = jnp.exp(q - jnp.max(q, axis=-1, keepdims=True))
        qden = jnp.dot(qe, head_mask, preferred_element_type=jnp.float32)
        q_sm = qe / qden * scale

        # softmax(k) over the sequence axis within each batch segment (no per-batch
        # reductions): the global per-column max is a valid stabiliser for every
        # segment; segment sums are broadcast back with two indicator matmuls.
        ke = jnp.exp(k - jnp.max(k, axis=0, keepdims=True))
        kden = jnp.dot(segT, jnp.dot(seg, ke, preferred_element_type=jnp.float32),
                       preferred_element_type=jnp.float32)
        k_sm = ke / kden

        outs = []
        for b in range(batch):                                       # unrolled (batch=2)
            rs = slice(b * seq, (b + 1) * seq)
            # full (D,D) context, masked to the per-head block-diagonal
            ctx = jnp.dot(k_sm[rs, :].T, v[rs, :],
                          preferred_element_type=jnp.float32) * head_mask
            outs.append(jnp.dot(q_sm[rs, :], ctx, preferred_element_type=jnp.float32))
        o = jnp.concatenate(outs, axis=0)                            # (B*N, D)
        tok = tok + jnp.dot(o, wo_ref[d], preferred_element_type=jnp.float32) + bo_ref[d]

        # ---- feed-forward block
        h = _layernorm(tok, ffn_g_ref[d], ffn_b_ref[d])
        h1 = jnp.dot(h, w1_ref[d], preferred_element_type=jnp.float32) + b1_ref[d]
        # TODO(synk): nn.GELU (exact erf) approximated with tanh-GELU for robust TPU lowering.
        h1 = jax.nn.gelu(h1, approximate=True)
        tok = tok + jnp.dot(h1, w2_ref[d], preferred_element_type=jnp.float32) + b2_ref[d]

    # ---------- head: mean over sequence (indicator matmul) -> ELU -> Linear classifier
    m = jnp.dot(seg, tok, preferred_element_type=jnp.float32) * inv_seq      # (B, D)
    e = jnp.where(m > 0, m, jnp.exp(jnp.minimum(m, 0.0)) - 1.0)              # ELU(alpha=1)
    out_ref[...] = jnp.dot(e, w_cls_ref[...], preferred_element_type=jnp.float32) + b_cls_ref[...]


# --------------------------- glue / params --------------------------
def dft_basis():
    n = jnp.arange(N_FFT, dtype=jnp.float32)[:, None]
    f = jnp.arange(N_FREQ, dtype=jnp.float32)[None, :]
    ang = 2.0 * math.pi * n * f / N_FFT
    return jnp.cos(ang), jnp.sin(ang)                                # (n_fft, n_freq) each


def positional_encoding(d_model, max_len=MAX_LEN):
    pos = jnp.arange(max_len, dtype=jnp.float32)[:, None]
    div = jnp.exp(jnp.arange(0, d_model, 2, dtype=jnp.float32) * (-math.log(10000.0) / d_model))
    pe = jnp.zeros((max_len, d_model), jnp.float32)
    pe = pe.at[:, 0::2].set(jnp.sin(pos * div))
    pe = pe.at[:, 1::2].set(jnp.cos(pos * div))
    return pe


def init_params(key):
    ks = list(jax.random.split(key, 4 + 6 * DEPTH))
    it = iter(ks)
    p = {}
    # PatchFrequencyEmbedding: Linear(n_freq, emb); weight ~ N(0, sqrt(encoder_var/n_freq)), bias 0
    p['w_proj'] = jax.random.normal(next(it), (N_FREQ, EMB), jnp.float32) * (1.0 / N_FREQ) ** 0.5
    p['b_proj'] = jnp.zeros((1, EMB), jnp.float32)
    # channel tokens: nn.Embedding(n_channels, emb) ~ N(0, 1)
    p['chan_tok'] = jax.random.normal(next(it), (N_CHANNELS, EMB), jnp.float32)
    layers = []
    for _ in range(DEPTH):
        layers.append({
            'attn_g': jnp.ones((1, EMB), jnp.float32),
            'attn_b': jnp.zeros((1, EMB), jnp.float32),
            'wq': jax.random.normal(next(it), (EMB, EMB), jnp.float32) * EMB ** -0.5,
            'wk': jax.random.normal(next(it), (EMB, EMB), jnp.float32) * EMB ** -0.5,
            'wv': jax.random.normal(next(it), (EMB, EMB), jnp.float32) * EMB ** -0.5,
            'wo': jax.random.normal(next(it), (EMB, EMB), jnp.float32) * EMB ** -0.5,
            'bo': jnp.zeros((1, EMB), jnp.float32),     # lucidrains to_out has bias=True
            'ffn_g': jnp.ones((1, EMB), jnp.float32),
            'ffn_b': jnp.zeros((1, EMB), jnp.float32),
            'w1': jax.random.normal(next(it), (EMB, FF), jnp.float32) * EMB ** -0.5,
            'b1': jnp.zeros((1, FF), jnp.float32),
            'w2': jax.random.normal(next(it), (FF, EMB), jnp.float32) * FF ** -0.5,
            'b2': jnp.zeros((1, EMB), jnp.float32),
        })
    p['layers'] = layers
    p['w_cls'] = jax.random.normal(next(it), (EMB, N_CLASSES), jnp.float32) * EMB ** -0.5
    p['b_cls'] = jnp.zeros((1, N_CLASSES), jnp.float32)
    return p


def biot_classifier_forward(params, x):
    """x: (batch, n_channels, ts) float32  ->  logits (batch, n_classes)."""
    B, C, ts = x.shape
    T = 1 + (ts - N_FFT) // HOP                                      # torch.stft, center=False
    N = C * T                                                        # tokens per batch element

    # STFT frames for ALL channels in one stack, row order = (b, c, t)  (rectangular window).
    frame_idx = jnp.arange(T)[:, None] * HOP + jnp.arange(N_FFT)[None, :]     # (T, n_fft)
    frames = x[:, :, frame_idx].reshape(B * N, N_FFT)                # (B*C*T, n_fft)

    cosb, sinb = dft_basis()                                         # (n_fft, n_freq) each

    # Per-token additive term: proj bias + channel token + positional enc, tiled over batch.
    pe = positional_encoding(EMB)[:T]                                # (T, EMB)
    add = (params['chan_tok'][:, None, :] + pe[None, :, :] + params['b_proj']).reshape(N, EMB)
    add = jnp.tile(add, (B, 1))                                      # (B*N, EMB)

    # Constant masks: per-head block-diagonal mask and batch-segment indicator matrices.
    hid = jnp.arange(EMB) // DH
    head_mask = (hid[:, None] == hid[None, :]).astype(jnp.float32)   # (EMB, EMB)
    seg = (jnp.arange(B)[:, None] == (jnp.arange(B * N)[None, :] // N)).astype(jnp.float32)
    segT = seg.T                                                     # (B*N, B)

    # Stack per-layer weights along a leading DEPTH axis; fuse QKV.
    L = params['layers']
    stk = lambda name: jnp.stack([l[name] for l in L], axis=0)
    wqkv = jnp.stack([jnp.concatenate([l['wq'], l['wk'], l['wv']], axis=1) for l in L], axis=0)

    # TODO(synk): LinearAttentionTransformer is an external (lucidrains) library; its standard
    # pre-LN linear-attention + GELU feed-forward blocks are reproduced here (no local-attn heads,
    # no mup scaling), dropouts are identity in eval.
    kernel = functools.partial(biot_fused_kernel, batch=B, seq=N)
    return pl.pallas_call(
        kernel,
        out_shape=jax.ShapeDtypeStruct((B, N_CLASSES), jnp.float32),
        in_specs=[_VMEM] * 21,
        out_specs=_VMEM,
    )(frames, cosb, sinb, params['w_proj'], add, seg, segT, head_mask,
      stk('attn_g'), stk('attn_b'), wqkv, stk('wo'), stk('bo'),
      stk('ffn_g'), stk('ffn_b'), stk('w1'), stk('b1'), stk('w2'), stk('b2'),
      params['w_cls'], params['b_cls'])


if __name__ == "__main__":
    key = jax.random.PRNGKey(0)
    kp, kx = jax.random.split(key)
    params = init_params(kp)
    # small input: batch=2, channels=4, time-series length=72 -> 8 STFT frames/channel, seq=32
    x = jax.random.normal(kx, (2, N_CHANNELS, 72), jnp.float32)
    out = biot_classifier_forward(params, x)
    out = jax.block_until_ready(out)
    assert out.shape == (2, N_CLASSES)
    assert bool(jnp.all(jnp.isfinite(out)))
    print("KERNEL_OK")
</pallas_src>

<mosaic_0001>
module attributes {stable_mosaic.version = 11 : i64} {
  func.func @biot_fused_kernel(%arg0: memref<64x16xf32, #tpu.memory_space<vmem>>, %arg1: memref<16x9xf32, #tpu.memory_space<vmem>>, %arg2: memref<16x9xf32, #tpu.memory_space<vmem>>, %arg3: memref<9x32xf32, #tpu.memory_space<vmem>>, %arg4: memref<64x32xf32, #tpu.memory_space<vmem>>, %arg5: memref<2x64xf32, #tpu.memory_space<vmem>>, %arg6: memref<64x2xf32, #tpu.memory_space<vmem>>, %arg7: memref<32x32xf32, #tpu.memory_space<vmem>>, %arg8: memref<2x1x32xf32, #tpu.memory_space<vmem>>, %arg9: memref<2x1x32xf32, #tpu.memory_space<vmem>>, %arg10: memref<2x32x96xf32, #tpu.memory_space<vmem>>, %arg11: memref<2x32x32xf32, #tpu.memory_space<vmem>>, %arg12: memref<2x1x32xf32, #tpu.memory_space<vmem>>, %arg13: memref<2x1x32xf32, #tpu.memory_space<vmem>>, %arg14: memref<2x1x32xf32, #tpu.memory_space<vmem>>, %arg15: memref<2x32x128xf32, #tpu.memory_space<vmem>>, %arg16: memref<2x1x128xf32, #tpu.memory_space<vmem>>, %arg17: memref<2x128x32xf32, #tpu.memory_space<vmem>>, %arg18: memref<2x1x32xf32, #tpu.memory_space<vmem>>, %arg19: memref<32x6xf32, #tpu.memory_space<vmem>>, %arg20: memref<1x6xf32, #tpu.memory_space<vmem>>, %arg21: memref<2x6xf32, #tpu.memory_space<vmem>>) attributes {dimension_semantics = [], scalar_prefetch = 0 : i64, scratch_operands = 0 : i64, tpu.core_type = #tpu.core_type<tc>} {
    %c0 = arith.constant 0 : index
    %c0_0 = arith.constant 0 : index
    %0 = vector.load %arg7[%c0, %c0_0] : memref<32x32xf32, #tpu.memory_space<vmem>>, vector<32x32xf32>
    %c0_1 = arith.constant 0 : index
    %c0_2 = arith.constant 0 : index
    %1 = vector.load %arg5[%c0_1, %c0_2] : memref<2x64xf32, #tpu.memory_space<vmem>>, vector<2x64xf32>
    %c0_3 = arith.constant 0 : index
    %c0_4 = arith.constant 0 : index
    %2 = vector.load %arg6[%c0_3, %c0_4] : memref<64x2xf32, #tpu.memory_space<vmem>>, vector<64x2xf32>
    %c0_5 = arith.constant 0 : index
    %c0_6 = arith.constant 0 : index
    %3 = vector.load %arg0[%c0_5, %c0_6] : memref<64x16xf32, #tpu.memory_space<vmem>>, vector<64x16xf32>
    %c0_7 = arith.constant 0 : index
    %c0_8 = arith.constant 0 : index
    %4 = vector.load %arg1[%c0_7, %c0_8] : memref<16x9xf32, #tpu.memory_space<vmem>>, vector<16x9xf32>
    %cst = arith.constant dense<0.000000e+00> : vector<64x9xf32>
    %5 = tpu.matmul %3, %4, %cst {dimension_numbers = #tpu.dot_dimension_numbers<[1], [0], [0], [1], [0, 0, 1, 1], [], []>} : vector<64x16xf32>, vector<16x9xf32>, vector<64x9xf32> -> vector<64x9xf32>
    %c0_9 = arith.constant 0 : index
    %c0_10 = arith.constant 0 : index
    %6 = vector.load %arg2[%c0_9, %c0_10] : memref<16x9xf32, #tpu.memory_space<vmem>>, vector<16x9xf32>
    %cst_11 = arith.constant dense<0.000000e+00> : vector<64x9xf32>
    %7 = tpu.matmul %3, %6, %cst_11 {dimension_numbers = #tpu.dot_dimension_numbers<[1], [0], [0], [1], [0, 0, 1, 1], [], []>} : vector<64x16xf32>, vector<16x9xf32>, vector<64x9xf32> -> vector<64x9xf32>
    %8 = arith.mulf %5, %5 : vector<64x9xf32>
    %9 = arith.mulf %7, %7 : vector<64x9xf32>
    %10 = arith.addf %8, %9 : vector<64x9xf32>
    %11 = math.sqrt %10 : vector<64x9xf32>
    %c0_12 = arith.constant 0 : index
    %c0_13 = arith.constant 0 : index
    %12 = vector.load %arg3[%c0_12, %c0_13] : memref<9x32xf32, #tpu.memory_space<vmem>>, vector<9x32xf32>
    %cst_14 = arith.constant dense<0.000000e+00> : vector<64x32xf32>
    %13 = tpu.matmul %11, %12, %cst_14 {dimension_numbers = #tpu.dot_dimension_numbers<[1], [0], [0], [1], [0, 0, 1, 1], [], []>} : vector<64x9xf32>, vector<9x32xf32>, vector<64x32xf32> -> vector<64x32xf32>
    %c0_15 = arith.constant 0 : index
    %c0_16 = arith.constant 0 : index
    %14 = vector.load %arg4[%c0_15, %c0_16] : memref<64x32xf32, #tpu.memory_space<vmem>>, vector<64x32xf32>
    %15 = arith.addf %13, %14 : vector<64x32xf32>
    %c0_17 = arith.constant 0 : index
    %c0_18 = arith.constant 0 : index
    %c0_19 = arith.constant 0 : index
    %16 = vector.load %arg8[%c0_17, %c0_18, %c0_19] : memref<2x1x32xf32, #tpu.memory_space<vmem>>, vector<1x1x32xf32>
    %17 = vector.shape_cast %16 : vector<1x1x32xf32> to vector<1x32xf32>
    %c0_20 = arith.constant 0 : index
    %c0_21 = arith.constant 0 : index
    %c0_22 = arith.constant 0 : index
    %18 = vector.load %arg9[%c0_20, %c0_21, %c0_22] : memref<2x1x32xf32, #tpu.memory_space<vmem>>, vector<1x1x32xf32>
    %19 = vector.shape_cast %18 : vector<1x1x32xf32> to vector<1x32xf32>
    %cst_23 = arith.constant dense<0.000000e+00> : vector<64xf32>
    %20 = vector.multi_reduction <add>, %15, %cst_23 [1] : vector<64x32xf32> to vector<64xf32>
    %21 = vector.shape_cast %20 : vector<64xf32> to vector<64x1xf32>
    %cst_24 = arith.constant 3.200000e+01 : f32
    %22 = vector.broadcast %cst_24 : f32 to vector<64x1xf32>
    %23 = arith.divf %21, %22 : vector<64x1xf32>
    %24 = vector.broadcast %23 : vector<64x1xf32> to vector<64x32xf32>
    %25 = arith.subf %15, %24 : vector<64x32xf32>
    %26 = arith.mulf %25, %25 : vector<64x32xf32>
    %cst_25 = arith.constant dense<0.000000e+00> : vector<64xf32>
    %27 = vector.multi_reduction <add>, %26, %cst_25 [1] : vector<64x32xf32> to vector<64xf32>
    %28 = vector.shape_cast %27 : vector<64xf32> to vector<64x1xf32>
    %cst_26 = arith.constant 3.200000e+01 : f32
    %29 = vector.broadcast %cst_26 : f32 to vector<64x1xf32>
    %30 = arith.divf %28, %29 : vector<64x1xf32>
    %31 = vector.broadcast %23 : vector<64x1xf32> to vector<64x32xf32>
    %32 = arith.subf %15, %31 : vector<64x32xf32>
    %cst_27 = arith.constant 9.99999974E-6 : f32
    %33 = vector.broadcast %cst_27 : f32 to vector<64x1xf32>
    %34 = arith.addf %30, %33 : vector<64x1xf32>
    %35 = math.rsqrt %34 : vector<64x1xf32>
    %36 = vector.broadcast %35 : vector<64x1xf32> to vector<64x32xf32>
    %37 = arith.mulf %32, %36 : vector<64x32xf32>
    %38 = vector.broadcast %17 : vector<1x32xf32> to vector<64x32xf32>
    %39 = arith.mulf %37, %38 : vector<64x32xf32>
    %40 = vector.broadcast %19 : vector<1x32xf32> to vector<64x32xf32>
    %41 = arith.addf %39, %40 : vector<64x32xf32>
    %c0_28 = arith.constant 0 : index
    %c0_29 = arith.constant 0 : index
    %c0_30 = arith.constant 0 : index
    %42 = vector.load %arg10[%c0_28, %c0_29, %c0_30] : memref<2x32x96xf32, #tpu.memory_space<vmem>>, vector<1x32x96xf32>
    %43 = vector.shape_cast %42 : vector<1x32x96xf32> to vector<32x96xf32>
    %cst_31 = arith.constant dense<0.000000e+00> : vector<64x96xf32>
    %44 = tpu.matmul %41, %43, %cst_31 {dimension_numbers = #tpu.dot_dimension_numbers<[1], [0], [0], [1], [0, 0, 1, 1], [], []>} : vector<64x32xf32>, vector<32x96xf32>, vector<64x96xf32> -> vector<64x96xf32>
    %45 = vector.extract_strided_slice %44 {offsets = [0, 0], sizes = [64, 32], strides = [1, 1]} : vector<64x96xf32> to vector<64x32xf32>
    %46 = vector.extract_strided_slice %44 {offsets = [0, 32], sizes = [64, 32], strides = [1, 1]} : vector<64x96xf32> to vector<64x32xf32>
    %47 = vector.extract_strided_slice %44 {offsets = [0, 64], sizes = [64, 32], strides = [1, 1]} : vector<64x96xf32> to vector<64x32xf32>
    %cst_32 = arith.constant dense<0xFF800000> : vector<64xf32>
    %48 = vector.multi_reduction <maximumf>, %45, %cst_32 [1] : vector<64x32xf32> to vector<64xf32>
    %49 = vector.shape_cast %48 : vector<64xf32> to vector<64x1xf32>
    %50 = vector.broadcast %49 : vector<64x1xf32> to vector<64x32xf32>
    %51 = arith.subf %45, %50 : vector<64x32xf32>
    %52 = math.exp %51 : vector<64x32xf32>
    %cst_33 = arith.constant dense<0.000000e+00> : vector<64x32xf32>
    %53 = tpu.matmul %52, %0, %cst_33 {dimension_numbers = #tpu.dot_dimension_numbers<[1], [0], [0], [1], [0, 0, 1, 1], [], []>} : vector<64x32xf32>, vector<32x32xf32>, vector<64x32xf32> -> vector<64x32xf32>
    %54 = arith.divf %52, %53 : vector<64x32xf32>
    %cst_34 = arith.constant 0.353553385 : f32
    %55 = vector.broadcast %cst_34 : f32 to vector<64x32xf32>
    %56 = arith.mulf %54, %55 : vector<64x32xf32>
    %cst_35 = arith.constant dense<0xFF800000> : vector<32xf32>
    %57 = vector.multi_reduction <maximumf>, %46, %cst_35 [0] : vector<64x32xf32> to vector<32xf32>
    %58 = vector.shape_cast %57 : vector<32xf32> to vector<1x32xf32>
    %59 = vector.broadcast %58 : vector<1x32xf32> to vector<64x32xf32>
    %60 = arith.subf %46, %59 : vector<64x32xf32>
    %61 = math.exp %60 : vector<64x32xf32>
    %cst_36 = arith.constant dense<0.000000e+00> : vector<2x32xf32>
    %62 = tpu.matmul %1, %61, %cst_36 {dimension_numbers = #tpu.dot_dimension_numbers<[1], [0], [0], [1], [0, 0, 1, 1], [], []>} : vector<2x64xf32>, vector<64x32xf32>, vector<2x32xf32> -> vector<2x32xf32>
    %cst_37 = arith.constant dense<0.000000e+00> : vector<64x32xf32>
    %63 = tpu.matmul %2, %62, %cst_37 {dimension_numbers = #tpu.dot_dimension_numbers<[1], [0], [0], [1], [0, 0, 1, 1], [], []>} : vector<64x2xf32>, vector<2x32xf32>, vector<64x32xf32> -> vector<64x32xf32>
    %64 = arith.divf %61, %63 : vector<64x32xf32>
    %65 = vector.extract_strided_slice %64 {offsets = [0, 0], sizes = [32, 32], strides = [1, 1]} : vector<64x32xf32> to vector<32x32xf32>
    %66 = tpu.transpose %65, [1, 0] : vector<32x32xf32> -> vector<32x32xf32>
    %67 = vector.extract_strided_slice %47 {offsets = [0, 0], sizes = [32, 32], strides = [1, 1]} : vector<64x32xf32> to vector<32x32xf32>
    %cst_38 = arith.constant dense<0.000000e+00> : vector<32x32xf32>
    %68 = tpu.matmul %66, %67, %cst_38 {dimension_numbers = #tpu.dot_dimension_numbers<[1], [0], [0], [1], [0, 0, 1, 1], [], []>} : vector<32x32xf32>, vector<32x32xf32>, vector<32x32xf32> -> vector<32x32xf32>
    %69 = arith.mulf %68, %0 : vector<32x32xf32>
    %70 = vector.extract_strided_slice %56 {offsets = [0, 0], sizes = [32, 32], strides = [1, 1]} : vector<64x32xf32> to vector<32x32xf32>
    %cst_39 = arith.constant dense<0.000000e+00> : vector<32x32xf32>
    %71 = tpu.matmul %70, %69, %cst_39 {dimension_numbers = #tpu.dot_dimension_numbers<[1], [0], [0], [1], [0, 0, 1, 1], [], []>} : vector<32x32xf32>, vector<32x32xf32>, vector<32x32xf32> -> vector<32x32xf32>
    %72 = vector.extract_strided_slice %64 {offsets = [32, 0], sizes = [32, 32], strides = [1, 1]} : vector<64x32xf32> to vector<32x32xf32>
    %73 = tpu.transpose %72, [1, 0] : vector<32x32xf32> -> vector<32x32xf32>
    %74 = vector.extract_strided_slice %47 {offsets = [32, 0], sizes = [32, 32], strides = [1, 1]} : vector<64x32xf32> to vector<32x32xf32>
    %cst_40 = arith.constant dense<0.000000e+00> : vector<32x32xf32>
    %75 = tpu.matmul %73, %74, %cst_40 {dimension_numbers = #tpu.dot_dimension_numbers<[1], [0], [0], [1], [0, 0, 1, 1], [], []>} : vector<32x32xf32>, vector<32x32xf32>, vector<32x32xf32> -> vector<32x32xf32>
    %76 = arith.mulf %75, %0 : vector<32x32xf32>
    %77 = vector.extract_strided_slice %56 {offsets = [32, 0], sizes = [32, 32], strides = [1, 1]} : vector<64x32xf32> to vector<32x32xf32>
    %cst_41 = arith.constant dense<0.000000e+00> : vector<32x32xf32>
    %78 = tpu.matmul %77, %76, %cst_41 {dimension_numbers = #tpu.dot_dimension_numbers<[1], [0], [0], [1], [0, 0, 1, 1], [], []>} : vector<32x32xf32>, vector<32x32xf32>, vector<32x32xf32> -> vector<32x32xf32>
    %79 = tpu.concatenate %71, %78 in 0 : vector<32x32xf32>, vector<32x32xf32> -> vector<64x32xf32>
    %c0_42 = arith.constant 0 : index
    %c0_43 = arith.constant 0 : index
    %c0_44 = arith.constant 0 : index
    %80 = vector.load %arg11[%c0_42, %c0_43, %c0_44] : memref<2x32x32xf32, #tpu.memory_space<vmem>>, vector<1x32x32xf32>
    %81 = vector.shape_cast %80 : vector<1x32x32xf32> to vector<32x32xf32>
    %cst_45 = arith.constant dense<0.000000e+00> : vector<64x32xf32>
    %82 = tpu.matmul %79, %81, %cst_45 {dimension_numbers = #tpu.dot_dimension_numbers<[1], [0], [0], [1], [0, 0, 1, 1], [], []>} : vector<64x32xf32>, vector<32x32xf32>, vector<64x32xf32> -> vector<64x32xf32>
    %83 = arith.addf %15, %82 : vector<64x32xf32>
    %c0_46 = arith.constant 0 : index
    %c0_47 = arith.constant 0 : index
    %c0_48 = arith.constant 0 : index
    %84 = vector.load %arg12[%c0_46, %c0_47, %c0_48] : memref<2x1x32xf32, #tpu.memory_space<vmem>>, vector<1x1x32xf32>
    %85 = vector.shape_cast %84 : vector<1x1x32xf32> to vector<1x32xf32>
    %86 = vector.broadcast %85 : vector<1x32xf32> to vector<64x32xf32>
    %87 = arith.addf %83, %86 : vector<64x32xf32>
    %c0_49 = arith.constant 0 : index
    %c0_50 = arith.constant 0 : index
    %c0_51 = arith.constant 0 : index
    %88 = vector.load %arg13[%c0_49, %c0_50, %c0_51] : memref<2x1x32xf32, #tpu.memory_space<vmem>>, vector<1x1x32xf32>
    %89 = vector.shape_cast %88 : vector<1x1x32xf32> to vector<1x32xf32>
    %c0_52 = arith.constant 0 : index
    %c0_53 = arith.constant 0 : index
    %c0_54 = arith.constant 0 : index
    %90 = vector.load %arg14[%c0_52, %c0_53, %c0_54] : memref<2x1x32xf32, #tpu.memory_space<vmem>>, vector<1x1x32xf32>
    %91 = vector.shape_cast %90 : vector<1x1x32xf32> to vector<1x32xf32>
    %cst_55 = arith.constant dense<0.000000e+00> : vector<64xf32>
    %92 = vector.multi_reduction <add>, %87, %cst_55 [1] : vector<64x32xf32> to vector<64xf32>
    %93 = vector.shape_cast %92 : vector<64xf32> to vector<64x1xf32>
    %cst_56 = arith.constant 3.200000e+01 : f32
    %94 = vector.broadcast %cst_56 : f32 to vector<64x1xf32>
    %95 = arith.divf %93, %94 : vector<64x1xf32>
    %96 = vector.broadcast %95 : vector<64x1xf32> to vector<64x32xf32>
    %97 = arith.subf %87, %96 : vector<64x32xf32>
    %98 = arith.mulf %97, %97 : vector<64x32xf32>
    %cst_57 = arith.constant dense<0.000000e+00> : vector<64xf32>
    %99 = vector.multi_reduction <add>, %98, %cst_57 [1] : vector<64x32xf32> to vector<64xf32>
    %100 = vector.shape_cast %99 : vector<64xf32> to vector<64x1xf32>
    %cst_58 = arith.constant 3.200000e+01 : f32
    %101 = vector.broadcast %cst_58 : f32 to vector<64x1xf32>
    %102 = arith.divf %100, %101 : vector<64x1xf32>
    %103 = vector.broadcast %95 : vector<64x1xf32> to vector<64x32xf32>
    %104 = arith.subf %87, %103 : vector<64x32xf32>
    %cst_59 = arith.constant 9.99999974E-6 : f32
    %105 = vector.broadcast %cst_59 : f32 to vector<64x1xf32>
    %106 = arith.addf %102, %105 : vector<64x1xf32>
    %107 = math.rsqrt %106 : vector<64x1xf32>
    %108 = vector.broadcast %107 : vector<64x1xf32> to vector<64x32xf32>
    %109 = arith.mulf %104, %108 : vector<64x32xf32>
    %110 = vector.broadcast %89 : vector<1x32xf32> to vector<64x32xf32>
    %111 = arith.mulf %109, %110 : vector<64x32xf32>
    %112 = vector.broadcast %91 : vector<1x32xf32> to vector<64x32xf32>
    %113 = arith.addf %111, %112 : vector<64x32xf32>
    %c0_60 = arith.constant 0 : index
    %c0_61 = arith.constant 0 : index
    %c0_62 = arith.constant 0 : index
    %114 = vector.load %arg15[%c0_60, %c0_61, %c0_62] : memref<2x32x128xf32, #tpu.memory_space<vmem>>, vector<1x32x128xf32>
    %115 = vector.shape_cast %114 : vector<1x32x128xf32> to vector<32x128xf32>
    %cst_63 = arith.constant dense<0.000000e+00> : vector<64x128xf32>
    %116 = tpu.matmul %113, %115, %cst_63 {dimension_numbers = #tpu.dot_dimension_numbers<[1], [0], [0], [1], [0, 0, 1, 1], [], []>} : vector<64x32xf32>, vector<32x128xf32>, vector<64x128xf32> -> vector<64x128xf32>
    %c0_64 = arith.constant 0 : index
    %c0_65 = arith.constant 0 : index
    %c0_66 = arith.constant 0 : index
    %117 = vector.load %arg16[%c0_64, %c0_65, %c0_66] : memref<2x1x128xf32, #tpu.memory_space<vmem>>, vector<1x1x128xf32>
    %118 = vector.shape_cast %117 : vector<1x1x128xf32> to vector<1x128xf32>
    %119 = vector.broadcast %118 : vector<1x128xf32> to vector<64x128xf32>
    %120 = arith.addf %116, %119 : vector<64x128xf32>
    %121 = arith.mulf %120, %120 : vector<64x128xf32>
    %122 = arith.mulf %120, %121 : vector<64x128xf32>
    %cst_67 = arith.constant 4.471500e-02 : f32
    %123 = vector.broadcast %cst_67 : f32 to vector<64x128xf32>
    %124 = arith.mulf %123, %122 : vector<64x128xf32>
    %125 = arith.addf %120, %124 : vector<64x128xf32>
    %cst_68 = arith.constant 0.797884583 : f32
    %126 = vector.broadcast %cst_68 : f32 to vector<64x128xf32>
    %127 = arith.mulf %126, %125 : vector<64x128xf32>
    %128 = math.tanh %127 : vector<64x128xf32>
    %cst_69 = arith.constant 1.000000e+00 : f32
    %129 = vector.broadcast %cst_69 : f32 to vector<64x128xf32>
    %130 = arith.addf %129, %128 : vector<64x128xf32>
    %cst_70 = arith.constant 5.000000e-01 : f32
    %131 = vector.broadcast %cst_70 : f32 to vector<64x128xf32>
    %132 = arith.mulf %131, %130 : vector<64x128xf32>
    %133 = arith.mulf %120, %132 : vector<64x128xf32>
    %c0_71 = arith.constant 0 : index
    %c0_72 = arith.constant 0 : index
    %c0_73 = arith.constant 0 : index
    %134 = vector.load %arg17[%c0_71, %c0_72, %c0_73] : memref<2x128x32xf32, #tpu.memory_space<vmem>>, vector<1x128x32xf32>
    %135 = vector.shape_cast %134 : vector<1x128x32xf32> to vector<128x32xf32>
    %cst_74 = arith.constant dense<0.000000e+00> : vector<64x32xf32>
    %136 = tpu.matmul %133, %135, %cst_74 {dimension_numbers = #tpu.dot_dimension_numbers<[1], [0], [0], [1], [0, 0, 1, 1], [], []>} : vector<64x128xf32>, vector<128x32xf32>, vector<64x32xf32> -> vector<64x32xf32>
    %137 = arith.addf %87, %136 : vector<64x32xf32>
    %c0_75 = arith.constant 0 : index
    %c0_76 = arith.constant 0 : index
    %c0_77 = arith.constant 0 : index
    %138 = vector.load %arg18[%c0_75, %c0_76, %c0_77] : memref<2x1x32xf32, #tpu.memory_space<vmem>>, vector<1x1x32xf32>
    %139 = vector.shape_cast %138 : vector<1x1x32xf32> to vector<1x32xf32>
    %140 = vector.broadcast %139 : vector<1x32xf32> to vector<64x32xf32>
    %141 = arith.addf %137, %140 : vector<64x32xf32>
    %c1 = arith.constant 1 : index
    %c0_78 = arith.constant 0 : index
    %c0_79 = arith.constant 0 : index
    %142 = vector.load %arg8[%c1, %c0_78, %c0_79] : memref<2x1x32xf32, #tpu.memory_space<vmem>>, vector<1x1x32xf32>
    %143 = vector.shape_cast %142 : vector<1x1x32xf32> to vector<1x32xf32>
    %c1_80 = arith.constant 1 : index
    %c0_81 = arith.constant 0 : index
    %c0_82 = arith.constant 0 : index
    %144 = vector.load %arg9[%c1_80, %c0_81, %c0_82] : memref<2x1x32xf32, #tpu.memory_space<vmem>>, vector<1x1x32xf32>
    %145 = vector.shape_cast %144 : vector<1x1x32xf32> to vector<1x32xf32>
    %cst_83 = arith.constant dense<0.000000e+00> : vector<64xf32>
    %146 = vector.multi_reduction <add>, %141, %cst_83 [1] : vector<64x32xf32> to vector<64xf32>
    %147 = vector.shape_cast %146 : vector<64xf32> to vector<64x1xf32>
    %cst_84 = arith.constant 3.200000e+01 : f32
    %148 = vector.broadcast %cst_84 : f32 to vector<64x1xf32>
    %149 = arith.divf %147, %148 : vector<64x1xf32>
    %150 = vector.broadcast %149 : vector<64x1xf32> to vector<64x32xf32>
    %151 = arith.subf %141, %150 : vector<64x32xf32>
    %152 = arith.mulf %151, %151 : vector<64x32xf32>
    %cst_85 = arith.constant dense<0.000000e+00> : vector<64xf32>
    %153 = vector.multi_reduction <add>, %152, %cst_85 [1] : vector<64x32xf32> to vector<64xf32>
    %154 = vector.shape_cast %153 : vector<64xf32> to vector<64x1xf32>
    %cst_86 = arith.constant 3.200000e+01 : f32
    %155 = vector.broadcast %cst_86 : f32 to vector<64x1xf32>
    %156 = arith.divf %154, %155 : vector<64x1xf32>
    %157 = vector.broadcast %149 : vector<64x1xf32> to vector<64x32xf32>
    %158 = arith.subf %141, %157 : vector<64x32xf32>
    %cst_87 = arith.constant 9.99999974E-6 : f32
    %159 = vector.broadcast %cst_87 : f32 to vector<64x1xf32>
    %160 = arith.addf %156, %159 : vector<64x1xf32>
    %161 = math.rsqrt %160 : vector<64x1xf32>
    %162 = vector.broadcast %161 : vector<64x1xf32> to vector<64x32xf32>
    %163 = arith.mulf %158, %162 : vector<64x32xf32>
    %164 = vector.broadcast %143 : vector<1x32xf32> to vector<64x32xf32>
    %165 = arith.mulf %163, %164 : vector<64x32xf32>
    %166 = vector.broadcast %145 : vector<1x32xf32> to vector<64x32xf32>
    %167 = arith.addf %165, %166 : vector<64x32xf32>
    %c1_88 = arith.constant 1 : index
    %c0_89 = arith.constant 0 : index
    %c0_90 = arith.constant 0 : index
    %168 = vector.load %arg10[%c1_88, %c0_89, %c0_90] : memref<2x32x96xf32, #tpu.memory_space<vmem>>, vector<1x32x96xf32>
    %169 = vector.shape_cast %168 : vector<1x32x96xf32> to vector<32x96xf32>
    %cst_91 = arith.constant dense<0.000000e+00> : vector<64x96xf32>
    %170 = tpu.matmul %167, %169, %cst_91 {dimension_numbers = #tpu.dot_dimension_numbers<[1], [0], [0], [1], [0, 0, 1, 1], [], []>} : vector<64x32xf32>, vector<32x96xf32>, vector<64x96xf32> -> vector<64x96xf32>
    %171 = vector.extract_strided_slice %170 {offsets = [0, 0], sizes = [64, 32], strides = [1, 1]} : vector<64x96xf32> to vector<64x32xf32>
    %172 = vector.extract_strided_slice %170 {offsets = [0, 32], sizes = [64, 32], strides = [1, 1]} : vector<64x96xf32> to vector<64x32xf32>
    %173 = vector.extract_strided_slice %170 {offsets = [0, 64], sizes = [64, 32], strides = [1, 1]} : vector<64x96xf32> to vector<64x32xf32>
    %cst_92 = arith.constant dense<0xFF800000> : vector<64xf32>
    %174 = vector.multi_reduction <maximumf>, %171, %cst_92 [1] : vector<64x32xf32> to vector<64xf32>
    %175 = vector.shape_cast %174 : vector<64xf32> to vector<64x1xf32>
    %176 = vector.broadcast %175 : vector<64x1xf32> to vector<64x32xf32>
    %177 = arith.subf %171, %176 : vector<64x32xf32>
    %178 = math.exp %177 : vector<64x32xf32>
    %cst_93 = arith.constant dense<0.000000e+00> : vector<64x32xf32>
    %179 = tpu.matmul %178, %0, %cst_93 {dimension_numbers = #tpu.dot_dimension_numbers<[1], [0], [0], [1], [0, 0, 1, 1], [], []>} : vector<64x32xf32>, vector<32x32xf32>, vector<64x32xf32> -> vector<64x32xf32>
    %180 = arith.divf %178, %179 : vector<64x32xf32>
    %cst_94 = arith.constant 0.353553385 : f32
    %181 = vector.broadcast %cst_94 : f32 to vector<64x32xf32>
    %182 = arith.mulf %180, %181 : vector<64x32xf32>
    %cst_95 = arith.constant dense<0xFF800000> : vector<32xf32>
    %183 = vector.multi_reduction <maximumf>, %172, %cst_95 [0] : vector<64x32xf32> to vector<32xf32>
    %184 = vector.shape_cast %183 : vector<32xf32> to vector<1x32xf32>
    %185 = vector.broadcast %184 : vector<1x32xf32> to vector<64x32xf32>
    %186 = arith.subf %172, %185 : vector<64x32xf32>
    %187 = math.exp %186 : vector<64x32xf32>
    %cst_96 = arith.constant dense<0.000000e+00> : vector<2x32xf32>
    %188 = tpu.matmul %1, %187, %cst_96 {dimension_numbers = #tpu.dot_dimension_numbers<[1], [0], [0], [1], [0, 0, 1, 1], [], []>} : vector<2x64xf32>, vector<64x32xf32>, vector<2x32xf32> -> vector<2x32xf32>
    %cst_97 = arith.constant dense<0.000000e+00> : vector<64x32xf32>
    %189 = tpu.matmul %2, %188, %cst_97 {dimension_numbers = #tpu.dot_dimension_numbers<[1], [0], [0], [1], [0, 0, 1, 1], [], []>} : vector<64x2xf32>, vector<2x32xf32>, vector<64x32xf32> -> vector<64x32xf32>
    %190 = arith.divf %187, %189 : vector<64x32xf32>
    %191 = vector.extract_strided_slice %190 {offsets = [0, 0], sizes = [32, 32], strides = [1, 1]} : vector<64x32xf32> to vector<32x32xf32>
    %192 = tpu.transpose %191, [1, 0] : vector<32x32xf32> -> vector<32x32xf32>
    %193 = vector.extract_strided_slice %173 {offsets = [0, 0], sizes = [32, 32], strides = [1, 1]} : vector<64x32xf32> to vector<32x32xf32>
    %cst_98 = arith.constant dense<0.000000e+00> : vector<32x32xf32>
    %194 = tpu.matmul %192, %193, %cst_98 {dimension_numbers = #tpu.dot_dimension_numbers<[1], [0], [0], [1], [0, 0, 1, 1], [], []>} : vector<32x32xf32>, vector<32x32xf32>, vector<32x32xf32> -> vector<32x32xf32>
    %195 = arith.mulf %194, %0 : vector<32x32xf32>
    %196 = vector.extract_strided_slice %182 {offsets = [0, 0], sizes = [32, 32], strides = [1, 1]} : vector<64x32xf32> to vector<32x32xf32>
    %cst_99 = arith.constant dense<0.000000e+00> : vector<32x32xf32>
    %197 = tpu.matmul %196, %195, %cst_99 {dimension_numbers = #tpu.dot_dimension_numbers<[1], [0], [0], [1], [0, 0, 1, 1], [], []>} : vector<32x32xf32>, vector<32x32xf32>, vector<32x32xf32> -> vector<32x32xf32>
    %198 = vector.extract_strided_slice %190 {offsets = [32, 0], sizes = [32, 32], strides = [1, 1]} : vector<64x32xf32> to vector<32x32xf32>
    %199 = tpu.transpose %198, [1, 0] : vector<32x32xf32> -> vector<32x32xf32>
    %200 = vector.extract_strided_slice %173 {offsets = [32, 0], sizes = [32, 32], strides = [1, 1]} : vector<64x32xf32> to vector<32x32xf32>
    %cst_100 = arith.constant dense<0.000000e+00> : vector<32x32xf32>
    %201 = tpu.matmul %199, %200, %cst_100 {dimension_numbers = #tpu.dot_dimension_numbers<[1], [0], [0], [1], [0, 0, 1, 1], [], []>} : vector<32x32xf32>, vector<32x32xf32>, vector<32x32xf32> -> vector<32x32xf32>
    %202 = arith.mulf %201, %0 : vector<32x32xf32>
    %203 = vector.extract_strided_slice %182 {offsets = [32, 0], sizes = [32, 32], strides = [1, 1]} : vector<64x32xf32> to vector<32x32xf32>
    %cst_101 = arith.constant dense<0.000000e+00> : vector<32x32xf32>
    %204 = tpu.matmul %203, %202, %cst_101 {dimension_numbers = #tpu.dot_dimension_numbers<[1], [0], [0], [1], [0, 0, 1, 1], [], []>} : vector<32x32xf32>, vector<32x32xf32>, vector<32x32xf32> -> vector<32x32xf32>
    %205 = tpu.concatenate %197, %204 in 0 : vector<32x32xf32>, vector<32x32xf32> -> vector<64x32xf32>
    %c1_102 = arith.constant 1 : index
    %c0_103 = arith.constant 0 : index
    %c0_104 = arith.constant 0 : index
    %206 = vector.load %arg11[%c1_102, %c0_103, %c0_104] : memref<2x32x32xf32, #tpu.memory_space<vmem>>, vector<1x32x32xf32>
    %207 = vector.shape_cast %206 : vector<1x32x32xf32> to vector<32x32xf32>
    %cst_105 = arith.constant dense<0.000000e+00> : vector<64x32xf32>
    %208 = tpu.matmul %205, %207, %cst_105 {dimension_numbers = #tpu.dot_dimension_numbers<[1], [0], [0], [1], [0, 0, 1, 1], [], []>} : vector<64x32xf32>, vector<32x32xf32>, vector<64x32xf32> -> vector<64x32xf32>
    %209 = arith.addf %141, %208 : vector<64x32xf32>
    %c1_106 = arith.constant 1 : index
    %c0_107 = arith.constant 0 : index
    %c0_108 = arith.constant 0 : index
    %210 = vector.load %arg12[%c1_106, %c0_107, %c0_108] : memref<2x1x32xf32, #tpu.memory_space<vmem>>, vector<1x1x32xf32>
    %211 = vector.shape_cast %210 : vector<1x1x32xf32> to vector<1x32xf32>
    %212 = vector.broadcast %211 : vector<1x32xf32> to vector<64x32xf32>
    %213 = arith.addf %209, %212 : vector<64x32xf32>
    %c1_109 = arith.constant 1 : index
    %c0_110 = arith.constant 0 : index
    %c0_111 = arith.constant 0 : index
    %214 = vector.load %arg13[%c1_109, %c0_110, %c0_111] : memref<2x1x32xf32, #tpu.memory_space<vmem>>, vector<1x1x32xf32>
    %215 = vector.shape_cast %214 : vector<1x1x32xf32> to vector<1x32xf32>
    %c1_112 = arith.constant 1 : index
    %c0_113 = arith.constant 0 : index
    %c0_114 = arith.constant 0 : index
    %216 = vector.load %arg14[%c1_112, %c0_113, %c0_114] : memref<2x1x32xf32, #tpu.memory_space<vmem>>, vector<1x1x32xf32>
    %217 = vector.shape_cast %216 : vector<1x1x32xf32> to vector<1x32xf32>
    %cst_115 = arith.constant dense<0.000000e+00> : vector<64xf32>
    %218 = vector.multi_reduction <add>, %213, %cst_115 [1] : vector<64x32xf32> to vector<64xf32>
    %219 = vector.shape_cast %218 : vector<64xf32> to vector<64x1xf32>
    %cst_116 = arith.constant 3.200000e+01 : f32
    %220 = vector.broadcast %cst_116 : f32 to vector<64x1xf32>
    %221 = arith.divf %219, %220 : vector<64x1xf32>
    %222 = vector.broadcast %221 : vector<64x1xf32> to vector<64x32xf32>
    %223 = arith.subf %213, %222 : vector<64x32xf32>
    %224 = arith.mulf %223, %223 : vector<64x32xf32>
    %cst_117 = arith.constant dense<0.000000e+00> : vector<64xf32>
    %225 = vector.multi_reduction <add>, %224, %cst_117 [1] : vector<64x32xf32> to vector<64xf32>
    %226 = vector.shape_cast %225 : vector<64xf32> to vector<64x1xf32>
    %cst_118 = arith.constant 3.200000e+01 : f32
    %227 = vector.broadcast %cst_118 : f32 to vector<64x1xf32>
    %228 = arith.divf %226, %227 : vector<64x1xf32>
    %229 = vector.broadcast %221 : vector<64x1xf32> to vector<64x32xf32>
    %230 = arith.subf %213, %229 : vector<64x32xf32>
    %cst_119 = arith.constant 9.99999974E-6 : f32
    %231 = vector.broadcast %cst_119 : f32 to vector<64x1xf32>
    %232 = arith.addf %228, %231 : vector<64x1xf32>
    %233 = math.rsqrt %232 : vector<64x1xf32>
    %234 = vector.broadcast %233 : vector<64x1xf32> to vector<64x32xf32>
    %235 = arith.mulf %230, %234 : vector<64x32xf32>
    %236 = vector.broadcast %215 : vector<1x32xf32> to vector<64x32xf32>
    %237 = arith.mulf %235, %236 : vector<64x32xf32>
    %238 = vector.broadcast %217 : vector<1x32xf32> to vector<64x32xf32>
    %239 = arith.addf %237, %238 : vector<64x32xf32>
    %c1_120 = arith.constant 1 : index
    %c0_121 = arith.constant 0 : index
    %c0_122 = arith.constant 0 : index
    %240 = vector.load %arg15[%c1_120, %c0_121, %c0_122] : memref<2x32x128xf32, #tpu.memory_space<vmem>>, vector<1x32x128xf32>
    %241 = vector.shape_cast %240 : vector<1x32x128xf32> to vector<32x128xf32>
    %cst_123 = arith.constant dense<0.000000e+00> : vector<64x128xf32>
    %242 = tpu.matmul %239, %241, %cst_123 {dimension_numbers = #tpu.dot_dimension_numbers<[1], [0], [0], [1], [0, 0, 1, 1], [], []>} : vector<64x32xf32>, vector<32x128xf32>, vector<64x128xf32> -> vector<64x128xf32>
    %c1_124 = arith.constant 1 : index
    %c0_125 = arith.constant 0 : index
    %c0_126 = arith.constant 0 : index
    %243 = vector.load %arg16[%c1_124, %c0_125, %c0_126] : memref<2x1x128xf32, #tpu.memory_space<vmem>>, vector<1x1x128xf32>
    %244 = vector.shape_cast %243 : vector<1x1x128xf32> to vector<1x128xf32>
    %245 = vector.broadcast %244 : vector<1x128xf32> to vector<64x128xf32>
    %246 = arith.addf %242, %245 : vector<64x128xf32>
    %247 = arith.mulf %246, %246 : vector<64x128xf32>
    %248 = arith.mulf %246, %247 : vector<64x128xf32>
    %cst_127 = arith.constant 4.471500e-02 : f32
    %249 = vector.broadcast %cst_127 : f32 to vector<64x128xf32>
    %250 = arith.mulf %249, %248 : vector<64x128xf32>
    %251 = arith.addf %246, %250 : vector<64x128xf32>
    %cst_128 = arith.constant 0.797884583 : f32
    %252 = vector.broadcast %cst_128 : f32 to vector<64x128xf32>
    %253 = arith.mulf %252, %251 : vector<64x128xf32>
    %254 = math.tanh %253 : vector<64x128xf32>
    %cst_129 = arith.constant 1.000000e+00 : f32
    %255 = vector.broadcast %cst_129 : f32 to vector<64x128xf32>
    %256 = arith.addf %255, %254 : vector<64x128xf32>
    %cst_130 = arith.constant 5.000000e-01 : f32
    %257 = vector.broadcast %cst_130 : f32 to vector<64x128xf32>
    %258 = arith.mulf %257, %256 : vector<64x128xf32>
    %259 = arith.mulf %246, %258 : vector<64x128xf32>
    %c1_131 = arith.constant 1 : index
    %c0_132 = arith.constant 0 : index
    %c0_133 = arith.constant 0 : index
    %260 = vector.load %arg17[%c1_131, %c0_132, %c0_133] : memref<2x128x32xf32, #tpu.memory_space<vmem>>, vector<1x128x32xf32>
    %261 = vector.shape_cast %260 : vector<1x128x32xf32> to vector<128x32xf32>
    %cst_134 = arith.constant dense<0.000000e+00> : vector<64x32xf32>
    %262 = tpu.matmul %259, %261, %cst_134 {dimension_numbers = #tpu.dot_dimension_numbers<[1], [0], [0], [1], [0, 0, 1, 1], [], []>} : vector<64x128xf32>, vector<128x32xf32>, vector<64x32xf32> -> vector<64x32xf32>
    %263 = arith.addf %213, %262 : vector<64x32xf32>
    %c1_135 = arith.constant 1 : index
    %c0_136 = arith.constant 0 : index
    %c0_137 = arith.constant 0 : index
    %264 = vector.load %arg18[%c1_135, %c0_136, %c0_137] : memref<2x1x32xf32, #tpu.memory_space<vmem>>, vector<1x1x32xf32>
    %265 = vector.shape_cast %264 : vector<1x1x32xf32> to vector<1x32xf32>
    %266 = vector.broadcast %265 : vector<1x32xf32> to vector<64x32xf32>
    %267 = arith.addf %263, %266 : vector<64x32xf32>
    %cst_138 = arith.constant dense<0.000000e+00> : vector<2x32xf32>
    %268 = tpu.matmul %1, %267, %cst_138 {dimension_numbers = #tpu.dot_dimension_numbers<[1], [0], [0], [1], [0, 0, 1, 1], [], []>} : vector<2x64xf32>, vector<64x32xf32>, vector<2x32xf32> -> vector<2x32xf32>
    %cst_139 = arith.constant 3.125000e-02 : f32
    %269 = vector.broadcast %cst_139 : f32 to vector<2x32xf32>
    %270 = arith.mulf %268, %269 : vector<2x32xf32>
    %cst_140 = arith.constant 0.000000e+00 : f32
    %271 = vector.broadcast %cst_140 : f32 to vector<2x32xf32>
    %272 = arith.cmpf ogt, %270, %271 : vector<2x32xf32>
    %cst_141 = arith.constant 0.000000e+00 : f32
    %273 = vector.broadcast %cst_141 : f32 to vector<2x32xf32>
    %274 = arith.minimumf %270, %273 : vector<2x32xf32>
    %275 = math.exp %274 : vector<2x32xf32>
    %cst_142 = arith.constant 1.000000e+00 : f32
    %276 = vector.broadcast %cst_142 : f32 to vector<2x32xf32>
    %277 = arith.subf %275, %276 : vector<2x32xf32>
    %278 = arith.select %272, %270, %277 : vector<2x32xi1>, vector<2x32xf32>
    %c0_143 = arith.constant 0 : index
    %c0_144 = arith.constant 0 : index
    %279 = vector.load %arg19[%c0_143, %c0_144] : memref<32x6xf32, #tpu.memory_space<vmem>>, vector<32x6xf32>
    %cst_145 = arith.constant dense<0.000000e+00> : vector<2x6xf32>
    %280 = tpu.matmul %278, %279, %cst_145 {dimension_numbers = #tpu.dot_dimension_numbers<[1], [0], [0], [1], [0, 0, 1, 1], [], []>} : vector<2x32xf32>, vector<32x6xf32>, vector<2x6xf32> -> vector<2x6xf32>
    %c0_146 = arith.constant 0 : index
    %c0_147 = arith.constant 0 : index
    %281 = vector.load %arg20[%c0_146, %c0_147] : memref<1x6xf32, #tpu.memory_space<vmem>>, vector<1x6xf32>
    %282 = vector.broadcast %281 : vector<1x6xf32> to vector<2x6xf32>
    %283 = arith.addf %280, %282 : vector<2x6xf32>
    %c0_148 = arith.constant 0 : index
    %c0_149 = arith.constant 0 : index
    %284 = vector.load %arg21[%c0_148, %c0_149] : memref<2x6xf32, #tpu.memory_space<vmem>>, vector<2x6xf32>
    tpu.vector_store %arg21[%c0_148, %c0_149], %283 {strides = array<i32>} : memref<2x6xf32, #tpu.memory_space<vmem>>, vector<2x6xf32>,
    return
  }
}

</mosaic_0001>

<bundles_post_ra>
// kernel: tpu_custom_call.1
= control target key start
LH: loop header
LB: loop body
LE: loop exit
PB: predicated region body
PF: predicated region fallthrough
CT: control target
= control target key end

     0   :  { %s7749_s0 = inlined_call_operand.vmem [shape: f32[64,16], index: 0, kind: input, shape index: {}]   ;;  %s7750_s1 = inlined_call_operand.vmem [shape: f32[16,9], index: 1, kind: input, shape index: {}]   ;;  %s7751_s2 = inlined_call_operand.vmem [shape: f32[16,9], index: 2, kind: input, shape index: {}]   ;;  %s7752_s3 = inlined_call_operand.vmem [shape: f32[9,32], index: 3, kind: input, shape index: {}]   ;;  %s7753_s4 = inlined_call_operand.vmem [shape: f32[64,32], index: 4, kind: input, shape index: {}]   ;;  %s7754_s5 = inlined_call_operand.vmem [shape: f32[2,64], index: 5, kind: input, shape index: {}]   ;;  %s7755_s6 = inlined_call_operand.vmem [shape: f32[64,2], index: 6, kind: input, shape index: {}]   ;;  %s7756_s7 = inlined_call_operand.vmem [shape: f32[32,32], index: 7, kind: input, shape index: {}]   ;;  %s7757_s8 = inlined_call_operand.vmem [shape: f32[2,1,32], index: 8, kind: input, shape index: {}]   ;;  %s7758_s9 = inlined_call_operand.vmem [shape: f32[2,1,32], index: 9, kind: input, shape index: {}]   ;;  %s7759_s10 = inlined_call_operand.vmem [shape: f32[2,32,96], index: 10, kind: input, shape index: {}]   ;;  %s7760_s11 = inlined_call_operand.vmem [shape: f32[2,32,32], index: 11, kind: input, shape index: {}]   ;;  %s7761_s12 = inlined_call_operand.vmem [shape: f32[2,1,32], index: 12, kind: input, shape index: {}]   ;;  %s7762_s13 = inlined_call_operand.vmem [shape: f32[2,1,32], index: 13, kind: input, shape index: {}]   ;;  %s7763_s14 = inlined_call_operand.vmem [shape: f32[2,1,32], index: 14, kind: input, shape index: {}]   ;;  %s7764_s15 = inlined_call_operand.vmem [shape: f32[2,32,128], index: 15, kind: input, shape index: {}]   ;;  %s7765_s16 = inlined_call_operand.vmem [shape: f32[2,1,128], index: 16, kind: input, shape index: {}]   ;;  %s7766_s17 = inlined_call_operand.vmem [shape: f32[2,128,32], index: 17, kind: input, shape index: {}]   ;;  %s7767_s18 = inlined_call_operand.vmem [shape: f32[2,1,32], index: 18, kind: input, shape index: {}]   ;;  %s7768_s19 = inlined_call_operand.vmem [shape: f32[32,6], index: 19, kind: input, shape index: {}]   ;;  %s7769_s20 = inlined_call_operand.vmem [shape: f32[1,6], index: 20, kind: input, shape index: {}]   ;;  %s7770_s21 = inlined_call_operand.hbm [shape: f32[2,6], index: 21, kind: output, shape index: {}]  }
   0x1   :  { %7777 = sst [smem:[#allocation5_spill]] %s7749_s0 }
   0x2   :  { %7778 = sst [smem:[#allocation6_spill]] %s7750_s1 }
   0x3   :  { %7779 = sst [smem:[#allocation7_spill]] %s7751_s2 }
   0x4   :  { %7780 = sst [smem:[#allocation8_spill]] %s7752_s3 }
   0x5   :  { %7781 = sst [smem:[#allocation9_spill]] %s7753_s4 }
   0x6   :  { %7782 = sst [smem:[#allocation10_spill]] %s7754_s5 }
   0x7   :  { %s7783_s26 = sld [smem:[#allocation6_spill]]  ;;  %s7784_s0 = sld [smem:[#allocation5_spill]]  ;;  %vm92_vm0 = vcmask 130048  }
   0x8   :  { %s7785_s5 = sld [smem:[#allocation7_spill]] }
   0xd   :  { %v90_v0 = vld [vmem:[%s7783_s26] sm:$0xff]  ;;  %v91_v1 = vld [vmem:[%s7783_s26 + $0x8] sm:$0xff]  ;;  %v84_v2 = vld [vmem:[%s7784_s0 + $0x10] sm:$0xff] }
   0xe   :  { %v5642_v3 = vpack.c.bf16 %v91_v1, %v90_v0  ;;  %5145 = vmatprep.mubr.msk.f32.mxu1 %vm92_vm0, %v84_v2  ;;  %v222_v4 = vld [vmem:[%s7785_s5] sm:$0xff]  ;;  %v223_v5 = vld [vmem:[%s7785_s5 + $0x8] sm:$0xff]  ;;  %v85_v8 = vld [vmem:[%s7784_s0 + $0x18] sm:$0xff] }
   0xf   :  { %v5646_v6 = vpack.c.bf16 %v223_v5, %v222_v4  ;;  %v82_v7 = vld [vmem:[%s7784_s0] sm:$0xff]  ;;  %v83_v9 = vld [vmem:[%s7784_s0 + $0x8] sm:$0xff] }
  0x10   :  { %5890 = vmatprep.subr.bf16.mxu1 %v5642_v3  ;;  %5643 = vmatprep.subr.bf16.mxu0 %v5642_v3 }
  0x11   :  { %5891 = vmatpush3.bf16.msra.mxu1 %v5642_v3  ;;  %5645 = vmatpush3.bf16.msra.mxu0 %v5642_v3 }
  0x12   :  { %26 = vsyncpa [#allocation3], 0  ;;  %5647 = vmatprep.subr.bf16.mxu1 %v5646_v6  ;;  %v86_v10 = vld [vmem:[%s7784_s0 + $0x20] sm:$0xff]  ;;  %5142 = vmatprep.mubr.msk.f32.mxu0 %vm92_vm0, %v82_v7  ;;  %v87_v11 = vld [vmem:[%s7784_s0 + $0x28] sm:$0xff]  ;;  %s7786_s24 = sld [smem:[#allocation8_spill]]  ;;  %vm444_vm1 = vcmask 1040384  }
  0x13   :  { %v88_v12 = vld [vmem:[%s7784_s0 + $0x30] sm:$0xff]  ;;  %v89_v13 = vld [vmem:[%s7784_s0 + $0x38] sm:$0xff]  ;;  %vm6260_vm2 = vmmov 1   ;;  %vm419_vm4 = vcmask 72704   ;;  %s7787_s3 = sld [smem:[#allocation9_spill]]  ;;  %s6262_s25 = smov 96  }
  0x14   :  { %5146 = vmatmul.mubr.msk.f32.vlgmr.msra.gmra.mrb[0].mxu1 %vm92_vm0, %v85_v8  ;;  %5143 = vmatmul.mubr.msk.f32.vlgmr.msra.gmra.mrb[0].mxu0 %vm92_vm0, %v83_v9  ;;  %vm5651_vm3 = vmpackc.low %vm444_vm1, %vm6260_vm2  ;;  %s7788_s1 = sld [smem:[#allocation10_spill]]  ;;  %s6265_s26 = smov 32  }
  0x15   :  { %5148 = vmatprep.mubr.msk.f32.mxu1 %vm92_vm0, %v86_v10  ;;  %5649 = vmatpush3.bf16.msra.mxu1 %v5646_v6  ;;  %s6266_s27 = smov 64  }
  0x18   :  { %5149 = vmatmul.mubr.msk.f32.gmra.mrb[2].mxu1 %vm92_vm0, %v87_v11  ;;  %v409_v14 = vld [vmem:[%s7786_s24] sm:$0xff]  ;;  %v410_v15 = vld [vmem:[%s7786_s24 + $0x8] sm:$0x1] }
  0x19   :  { %5151 = vmatprep.mubr.msk.f32.mxu1 %vm92_vm0, %v88_v12  ;;  %v5650_v16 = vpack.c.bf16 %v410_v15, %v409_v14 }
  0x1b   :  { %5652 = vmatprep.subr.msk.bf16.mxu0 %vm5651_vm3, %v5650_v16 }
  0x1c   :  { %5152 = vmatmul.mubr.msk.f32.gmra.mrb[4].mxu1 %vm92_vm0, %v89_v13  ;;  %5655 = vmatpush3.bf16.msk.msra.mxu0 %vm5651_vm3, %v5650_v16 }
  0x1d   :  { %5158 = vmatprep.mubr.msk.f32.mxu1 %vm92_vm0, %v82_v7 }
  0x20   :  { %5159 = vmatmul.mubr.msk.f32.vlgmr.msra.gmra.mrb[6].mxu1 %vm92_vm0, %v83_v9 }
  0x21   :  { %5161 = vmatprep.mubr.msk.f32.mxu1 %vm92_vm0, %v84_v2 }
  0x24   :  { %5162 = vmatmul.mubr.msk.f32.gmra.mrb[8].mxu1 %vm92_vm0, %v85_v8 }
  0x25   :  { %5164 = vmatprep.mubr.msk.f32.mxu1 %vm92_vm0, %v86_v10 }
  0x28   :  { %5165 = vmatmul.mubr.msk.f32.gmra.mrb[10].mxu1 %vm92_vm0, %v87_v11 }
  0x29   :  { %5167 = vmatprep.mubr.msk.f32.mxu1 %vm92_vm0, %v88_v12 }
  0x2c   :  { %5168 = vmatmul.mubr.msk.f32.gmra.mrb[12].mxu1 %vm92_vm0, %v89_v13 }
  0xe7   :  { %v5147_v17 = vpop.f32.mrb[0].mxu1  ;;  %v5144_v18 = vpop.f32.mrb[0].mxu0 }
  0xe8   :  { %v193_v19 = vpop.f32.mrb[1].mxu1  ;;  %v183_v20 = vpop.f32.mrb[1].mxu0  ;;  %v330_v25 = vmul.f32 %v5144_v18, %v5144_v18  ;;  %v332_v34 = vmul.f32 %v5147_v17, %v5147_v17 }
  0xe9   :  { %v329_v26 = vmul.f32 %v183_v20, %v183_v20  ;;  %v331_v37 = vmul.f32 %v193_v19, %v193_v19 }
  0xeb   :  { %v5150_v21 = vpop.f32.mrb[2].mxu1 }
  0xec   :  { %v203_v22 = vpop.f32.mrb[3].mxu1  ;;  %v334_v42 = vmul.f32 %v5150_v21, %v5150_v21 }
  0xed   :  { %v333_v45 = vmul.f32 %v203_v22, %v203_v22 }
  0xef   :  { %v5153_v23 = vpop.f32.mrb[4].mxu1 }
  0xf0   :  { %v213_v24 = vpop.f32.mrb[5].mxu1  ;;  %v336_v50 = vmul.f32 %v5153_v23, %v5153_v23 }
  0xf1   :  { %v335_v53 = vmul.f32 %v213_v24, %v213_v24 }
  0xf3   :  { %v5160_v27 = vpop.f32.mrb[6].mxu1 }
  0xf4   :  { %v338_v28 = vmul.f32 %v5160_v27, %v5160_v27  ;;  %v290_v29 = vpop.f32.mrb[7].mxu1 }
  0xf5   :  { %v337_v30 = vmul.f32 %v290_v29, %v290_v29 }
  0xf6   :  { %v346_v31 = vadd.f32 %v338_v28, %v330_v25 }
  0xf7   :  { %v345_v32 = vadd.f32 %v337_v30, %v329_v26  ;;  %v5163_v33 = vpop.f32.mrb[8].mxu1 }
  0xf8   :  { %5980 = vrsqrt.f32 %v346_v31  ;;  %v340_v35 = vmul.f32 %v5163_v33, %v5163_v33  ;;  %v300_v36 = vpop.f32.mrb[9].mxu1  ;;  %vm362_vm5 = vcmp.eq.f32.partialorder %v346_v31, inf  ;;  %v365_v1 = vand.u32 2147483648, %v346_v31  ;;  %v411_v33 = vld [vmem:[%s7787_s3] sm:$0xff] }
  0xf9   :  { %5982 = vrsqrt.f32 %v345_v32  ;;  %v339_v38 = vmul.f32 %v300_v36, %v300_v36  ;;  %vm355_vm6 = vcmp.eq.f32.partialorder %v345_v32, inf  ;;  %v358_v61 = vand.u32 2147483648, %v345_v32 }
  0xfa   :  { %v348_v39 = vadd.f32 %v340_v35, %v332_v34  ;;  %vm357_vm7 = vcmp.eq.f32.partialorder %v345_v32, 0.0  ;;  %vm364_vm8 = vcmp.eq.f32.partialorder %v346_v31, 0.0  ;;  %v412_v35 = vld [vmem:[%s7787_s3 + $0x8] sm:$0xff] }
  0xfb   :  { %v347_v40 = vadd.f32 %v339_v38, %v331_v37  ;;  %v5166_v41 = vpop.f32.mrb[10].mxu1  ;;  %v413_v38 = vld [vmem:[%s7787_s3 + $0x10] sm:$0xff] }
  0xfc   :  { %5984 = vrsqrt.f32 %v348_v39  ;;  %v342_v43 = vmul.f32 %v5166_v41, %v5166_v41  ;;  %v310_v44 = vpop.f32.mrb[11].mxu1  ;;  %vm376_vm9 = vcmp.eq.f32.partialorder %v348_v39, inf  ;;  %v379_v11 = vand.u32 2147483648, %v348_v39 }
  0xfd   :  { %5986 = vrsqrt.f32 %v347_v40  ;;  %v341_v46 = vmul.f32 %v310_v44, %v310_v44  ;;  %vm369_vm10 = vcmp.eq.f32.partialorder %v347_v40, inf  ;;  %v372_v7 = vand.u32 2147483648, %v347_v40 }
  0xfe   :  { %v6436_v47 = vadd.f32 %v342_v43, %v334_v42  ;;  %vm371_vm11 = vcmp.eq.f32.partialorder %v347_v40, 0.0  ;;  %vm378_vm12 = vcmp.eq.f32.partialorder %v348_v39, 0.0  ;;  %v414_v42 = vld [vmem:[%s7787_s3 + $0x18] sm:$0xff] }
  0xff   :  { %v349_v48 = vadd.f32 %v341_v46, %v333_v45  ;;  %v5169_v49 = vpop.f32.mrb[12].mxu1  ;;  %v415_v45 = vld [vmem:[%s7787_s3 + $0x20] sm:$0xff] }
 0x100   :  { %5988 = vrsqrt.f32 %v6436_v47  ;;  %v344_v51 = vmul.f32 %v5169_v49, %v5169_v49  ;;  %v320_v52 = vpop.f32.mrb[13].mxu1  ;;  %vm390_vm13 = vcmp.eq.f32.partialorder %v6436_v47, inf  ;;  %v393_v21 = vand.u32 2147483648, %v6436_v47 }
 0x101   :  { %5990 = vrsqrt.f32 %v349_v48  ;;  %v343_v54 = vmul.f32 %v320_v52, %v320_v52  ;;  %vm383_vm14 = vcmp.eq.f32.partialorder %v349_v48, inf  ;;  %v386_v17 = vand.u32 2147483648, %v349_v48 }
 0x102   :  { %v5981_v55 = vpop.eup %5980  ;;  %v6439_v56 = vadd.f32 %v344_v51, %v336_v50  ;;  %vm385_vm15 = vcmp.eq.f32.partialorder %v349_v48, 0.0  ;;  %vm392_vm0 = vcmp.eq.f32.partialorder %v6436_v47, 0.0  ;;  %v416_v50 = vld [vmem:[%s7787_s3 + $0x28] sm:$0xff] }
 0x103   :  { %v5983_v57 = vpop.eup %5982  ;;  %v6441_v58 = vadd.f32 %v343_v54, %v335_v53  ;;  %v361_v59 = vmul.f32 %v5981_v55, %v346_v31  ;;  %v417_v53 = vld [vmem:[%s7787_s3 + $0x30] sm:$0xff] }
 0x104   :  { %5992 = vrsqrt.f32 %v6439_v56  ;;  %v354_v60 = vmul.f32 %v5983_v57, %v345_v32  ;;  %vm404_vm1 = vcmp.eq.f32.partialorder %v6439_v56, inf  ;;  %v407_v30 = vand.u32 2147483648, %v6439_v56 }
 0x105   :  { %5994 = vrsqrt.f32 %v6441_v58  ;;  %v363_v62 = vsel %vm362_vm5, %v346_v31, %v361_v59  ;;  %vm397_vm2 = vcmp.eq.f32.partialorder %v6441_v58, inf  ;;  %v400_v27 = vand.u32 2147483648, %v6441_v58 }
 0x106   :  { %v5985_v63 = vpop.eup %5984  ;;  %v356_v0 = vsel %vm355_vm6, %v345_v32, %v354_v60  ;;  %v366_v5 = vsel %vm364_vm8, %v365_v1, %v363_v62  ;;  %vm399_vm3 = vcmp.eq.f32.partialorder %v6441_v58, 0.0  ;;  %vm406_vm5 = vcmp.eq.f32.partialorder %v6439_v56, 0.0 }
 0x107   :  { %v5987_v2 = vpop.eup %5986  ;;  %v359_v3 = vsel %vm357_vm7, %v358_v61, %v356_v0  ;;  %v375_v4 = vmul.f32 %v5985_v63, %v348_v39  ;;  %vm555_vm6 = vcmask 261120   ;;  %vm6263_vm7 = vmmov 0  }
 0x108   :  { %5174 = vmatprep.mubr.msk.f32.mxu0 %vm419_vm4, %v359_v3  ;;  %v368_v6 = vmul.f32 %v5987_v2, %v347_v40  ;;  %vm1101_vm8 = vcmask 523264  }
 0x109   :  { %5175 = vmatmul.mubr.msk.f32.vlgmr.msra.gmra.mrb[2].mxu0 %vm419_vm4, %v366_v5  ;;  %v377_v8 = vsel %vm376_vm9, %v348_v39, %v375_v4  ;;  %vm1175_vm9 = vcmask 15360  }
 0x10a   :  { %v5989_v9 = vpop.eup %5988  ;;  %v370_v10 = vsel %vm369_vm10, %v347_v40, %v368_v6  ;;  %v380_v15 = vsel %vm378_vm12, %v379_v11, %v377_v8  ;;  %vm1200_vm10 = vcmask 1041408   ;;  %vm4640_vm12 = vcmask 41984  }
 0x10b   :  { %v5991_v12 = vpop.eup %5990  ;;  %v373_v13 = vsel %vm371_vm11, %v372_v7, %v370_v10  ;;  %v389_v14 = vmul.f32 %v5989_v9, %v6436_v47 }
 0x10c   :  { %5177 = vmatprep.mubr.msk.f32.mxu0 %vm419_vm4, %v373_v13  ;;  %v382_v16 = vmul.f32 %v5991_v12, %v349_v48 }
 0x10d   :  { %5178 = vmatmul.mubr.msk.f32.gmra.mrb[4].mxu0 %vm419_vm4, %v380_v15  ;;  %v391_v18 = vsel %vm390_vm13, %v6436_v47, %v389_v14 }
 0x10e   :  { %v5993_v19 = vpop.eup %5992  ;;  %v384_v20 = vsel %vm383_vm14, %v349_v48, %v382_v16  ;;  %v394_v25 = vsel %vm392_vm0, %v393_v21, %v391_v18 }
 0x10f   :  { %v5995_v22 = vpop.eup %5994  ;;  %v387_v23 = vsel %vm385_vm15, %v386_v17, %v384_v20  ;;  %v403_v24 = vmul.f32 %v5993_v19, %v6439_v56 }
 0x110   :  { %5180 = vmatprep.mubr.msk.f32.mxu0 %vm419_vm4, %v387_v23  ;;  %v396_v26 = vmul.f32 %v5995_v22, %v6441_v58 }
 0x111   :  { %5181 = vmatmul.mubr.msk.f32.gmra.mrb[6].mxu0 %vm419_vm4, %v394_v25  ;;  %v405_v28 = vsel %vm404_vm1, %v6439_v56, %v403_v24 }
 0x112   :  { %v398_v29 = vsel %vm397_vm2, %v6441_v58, %v396_v26  ;;  %v408_v32 = vsel %vm406_vm5, %v407_v30, %v405_v28  ;;  %v418_v58 = vld [vmem:[%s7787_s3 + $0x38] sm:$0xff] }
 0x113   :  { %v401_v31 = vsel %vm399_vm3, %v400_v27, %v398_v29 }
 0x114   :  { %5183 = vmatprep.mubr.msk.f32.mxu0 %vm419_vm4, %v401_v31 }
 0x115   :  { %5184 = vmatmul.mubr.msk.f32.gmra.mrb[8].mxu0 %vm419_vm4, %v408_v32  ;;  %vm1023_vm4 = vcmask 523520  }
 0x1dc   :  { %v5176_v34 = vpop.f32.mrb[2].mxu0 }
 0x1dd   :  { %v514_v36 = vpop.f32.mrb[3].mxu0  ;;  %v6479_v39 = vadd.f32 %v5176_v34, %v412_v35 }
 0x1de   :  { %v6474_v37 = vadd.f32 %v514_v36, %v411_v33 }
 0x1df   :  { %v559_v49 = vsel %vm555_vm6, %v6479_v39, 0.0 }
 0x1e0   :  { %v5179_v40 = vpop.f32.mrb[4].mxu0  ;;  %v556_v41 = vsel %vm555_vm6, %v6474_v37, 0.0 }
 0x1e1   :  { %v524_v43 = vpop.f32.mrb[5].mxu0  ;;  %557 = vadd.xlane.f32.xlu0 %v556_v41  ;;  %v6491_v46 = vadd.f32 %v5179_v40, %v414_v42 }
 0x1e2   :  { %v6486_v44 = vadd.f32 %v524_v43, %v413_v38  ;;  %v689_v43 = vld [vmem:[%s7759_s10] sm:$0xff] }
 0x1e3   :  { %v565_v56 = vsel %vm555_vm6, %v6491_v46, 0.0 }
 0x1e4   :  { %v5182_v47 = vpop.f32.mrb[6].mxu0  ;;  %v562_v48 = vsel %vm555_vm6, %v6486_v44, 0.0 }
 0x1e5   :  { %v534_v51 = vpop.f32.mrb[7].mxu0  ;;  %563 = vadd.xlane.f32.xlu1 %v562_v48  ;;  %560 = vadd.xlane.f32.xlu0 %v559_v49  ;;  %v6505_v54 = vadd.f32 %v5182_v47, %v416_v50  ;;  %v691_v48 = vld [vmem:[%s7759_s10 + $0x10] sm:$0xff]  ;;  %v692_v49 = vld [vmem:[%s7759_s10 + $0x18] sm:$0xff] }
 0x1e6   :  { %v6500_v52 = vadd.f32 %v534_v51, %v415_v45  ;;  %v690_v45 = vld [vmem:[%s7759_s10 + $0x8] sm:$0xff]  ;;  %v5660_v50 = vpack.c.bf16 %v692_v49, %v691_v48 }
 0x1e7   :  { %v571_v62 = vsel %vm555_vm6, %v6505_v54, 0.0  ;;  %v5656_v47 = vpack.c.bf16 %v690_v45, %v689_v43 }
 0x1e8   :  { %v5185_v55 = vpop.f32.mrb[8].mxu0  ;;  %v568_v57 = vsel %vm555_vm6, %v6500_v52, 0.0 }
 0x1e9   :  { %v544_v59 = vpop.f32.mrb[9].mxu0  ;;  %566 = vadd.xlane.f32.xlu1 %v565_v56  ;;  %569 = vadd.xlane.f32.xlu0 %v568_v57  ;;  %v6516_v61 = vadd.f32 %v5185_v55, %v418_v58 }
 0x1ea   :  { %v6514_v60 = vadd.f32 %v544_v59, %v417_v53  ;;  %5657 = vmatprep.subr.bf16.mxu1 %v5656_v47 }
 0x1eb   :  { %v577_v0 = vsel %vm555_vm6, %v6516_v61, 0.0  ;;  %5659 = vmatpush3.bf16.msra.mxu1 %v5656_v47 }
 0x1ec   :  { %v574_v63 = vsel %vm555_vm6, %v6514_v60, 0.0  ;;  %5661 = vmatprep.subr.bf16.mxu1 %v5660_v50 }
 0x1ed   :  { %572 = vadd.xlane.f32.xlu1 %v571_v62  ;;  %575 = vadd.xlane.f32.xlu0 %v574_v63 }
 0x1ef   :  { %5663 = vmatpush3.bf16.msra.mxu1 %v5660_v50 }
 0x1f1   :  { %578 = vadd.xlane.f32.xlu1 %v577_v0 }
 0x26e   :  { %v558_v1 = vpop.xlane.xlu0 %557 }
 0x26f   :  { %v581_v2 = vmul.f32 0.03125, %v558_v1 }
 0x271   :  { %v6525_v3 = vsub.f32 %v6474_v37, %v581_v2 }
 0x272   :  { %v564_v4 = vpop.xlane.xlu1 %563  ;;  %v561_v5 = vpop.xlane.xlu0 %560 }
 0x273   :  { %v583_v6 = vmul.f32 0.03125, %v564_v4  ;;  %v582_v7 = vmul.f32 0.03125, %v561_v5  ;;  %v597_v8 = vmul.f32 %v6525_v3, %v6525_v3 }
 0x275   :  { %v6530_v9 = vsub.f32 %v6486_v44, %v583_v6  ;;  %v6533_v10 = vsub.f32 %v6479_v39, %v582_v7  ;;  %v605_v11 = vsel %vm555_vm6, %v597_v8, 0.0 }
 0x276   :  { %v567_v12 = vpop.xlane.xlu1 %566  ;;  %606 = vadd.xlane.f32.xlu0 %v605_v11  ;;  %v570_v13 = vpop.xlane.xlu0 %569 }
 0x277   :  { %v584_v14 = vmul.f32 0.03125, %v567_v12  ;;  %v585_v15 = vmul.f32 0.03125, %v570_v13  ;;  %v599_v16 = vmul.f32 %v6530_v9, %v6530_v9  ;;  %v598_v17 = vmul.f32 %v6533_v10, %v6533_v10 }
 0x279   :  { %v6541_v18 = vsub.f32 %v6491_v46, %v584_v14  ;;  %v6544_v19 = vsub.f32 %v6500_v52, %v585_v15  ;;  %v611_v20 = vsel %vm555_vm6, %v599_v16, 0.0  ;;  %v608_v21 = vsel %vm555_vm6, %v598_v17, 0.0  ;;  %v4681_v14 = vld [vmem:[%s7757_s8] ss:$0 sm:$0xff] }
 0x27a   :  { %v573_v22 = vpop.xlane.xlu1 %572  ;;  %612 = vadd.xlane.f32.xlu0 %v611_v20  ;;  %609 = vadd.xlane.f32.xlu1 %v608_v21  ;;  %v576_v23 = vpop.xlane.xlu0 %575 }
 0x27b   :  { %v586_v24 = vmul.f32 0.03125, %v573_v22  ;;  %v587_v25 = vmul.f32 0.03125, %v576_v23  ;;  %v600_v26 = vmul.f32 %v6541_v18, %v6541_v18  ;;  %v601_v27 = vmul.f32 %v6544_v19, %v6544_v19  ;;  %v4682_v22 = vld [vmem:[%s7758_s9] ss:$0 sm:$0xff] }
 0x27d   :  { %v6553_v28 = vsub.f32 %v6505_v54, %v586_v24  ;;  %v6556_v29 = vsub.f32 %v6514_v60, %v587_v25  ;;  %v614_v30 = vsel %vm555_vm6, %v600_v26, 0.0  ;;  %v617_v31 = vsel %vm555_vm6, %v601_v27, 0.0 }
 0x27e   :  { %v579_v32 = vpop.xlane.xlu1 %578  ;;  %615 = vadd.xlane.f32.xlu1 %v614_v30  ;;  %618 = vadd.xlane.f32.xlu0 %v617_v31 }
 0x27f   :  { %v588_v33 = vmul.f32 0.03125, %v579_v32  ;;  %v602_v34 = vmul.f32 %v6553_v28, %v6553_v28  ;;  %v603_v35 = vmul.f32 %v6556_v29, %v6556_v29 }
 0x281   :  { %v6565_v36 = vsub.f32 %v6516_v61, %v588_v33  ;;  %v620_v38 = vsel %vm555_vm6, %v602_v34, 0.0  ;;  %v623_v40 = vsel %vm555_vm6, %v603_v35, 0.0 }
 0x282   :  { %621 = vadd.xlane.f32.xlu1 %v620_v38  ;;  %624 = vadd.xlane.f32.xlu0 %v623_v40 }
 0x283   :  { %v604_v41 = vmul.f32 %v6565_v36, %v6565_v36 }
 0x285   :  { %v626_v42 = vsel %vm555_vm6, %v604_v41, 0.0 }
 0x286   :  { %627 = vadd.xlane.f32.xlu1 %v626_v42 }
 0x303   :  { %v607_v51 = vpop.xlane.xlu0 %606 }
 0x304   :  { %v629_v53 = vmul.f32 0.03125, %v607_v51 }
 0x306   :  { %v637_v55 = vadd.f32 1e-05, %v629_v53 }
 0x307   :  { %v610_v56 = vpop.xlane.xlu1 %609  ;;  %v613_v57 = vpop.xlane.xlu0 %612 }
 0x308   :  { %5996 = vrsqrt.f32 %v637_v55  ;;  %v630_v58 = vmul.f32 0.03125, %v610_v56  ;;  %v631_v59 = vmul.f32 0.03125, %v613_v57 }
 0x30a   :  { %v638_v62 = vadd.f32 1e-05, %v630_v58  ;;  %v639_v63 = vadd.f32 1e-05, %v631_v59 }
 0x30b   :  { %v616_v0 = vpop.xlane.xlu1 %615  ;;  %v619_v1 = vpop.xlane.xlu0 %618 }
 0x30c   :  { %5998 = vrsqrt.f32 %v638_v62  ;;  %v632_v2 = vmul.f32 0.03125, %v616_v0  ;;  %v633_v4 = vmul.f32 0.03125, %v619_v1 }
 0x30d   :  { %6000 = vrsqrt.f32 %v639_v63 }
 0x30e   :  { %v640_v5 = vadd.f32 1e-05, %v632_v2  ;;  %v641_v6 = vadd.f32 1e-05, %v633_v4 }
 0x30f   :  { %v622_v7 = vpop.xlane.xlu1 %621  ;;  %v625_v8 = vpop.xlane.xlu0 %624 }
 0x310   :  { %6002 = vrsqrt.f32 %v640_v5  ;;  %v634_v11 = vmul.f32 0.03125, %v622_v7  ;;  %v635_v12 = vmul.f32 0.03125, %v625_v8 }
 0x311   :  { %6004 = vrsqrt.f32 %v641_v6 }
 0x312   :  { %v5997_v13 = vpop.eup %5996  ;;  %v642_v15 = vadd.f32 1e-05, %v634_v11  ;;  %v643_v16 = vadd.f32 1e-05, %v635_v12 }
 0x313   :  { %v628_v17 = vpop.xlane.xlu1 %627  ;;  %v653_v20 = vmul.f32 %v5997_v13, %v6525_v3 }
 0x314   :  { %6006 = vrsqrt.f32 %v642_v15  ;;  %v636_v21 = vmul.f32 0.03125, %v628_v17 }
 0x315   :  { %6008 = vrsqrt.f32 %v643_v16  ;;  %v667_v23 = vmul.f32 %v4681_v14, %v653_v20 }
 0x316   :  { %v5999_v24 = vpop.eup %5998  ;;  %v644_v25 = vadd.f32 1e-05, %v636_v21 }
 0x317   :  { %v6001_v26 = vpop.eup %6000  ;;  %v654_v27 = vmul.f32 %v5999_v24, %v6533_v10  ;;  %v681_v30 = vadd.f32 %v4682_v22, %v667_v23 }
 0x318   :  { %6010 = vrsqrt.f32 %v644_v25  ;;  %v655_v31 = vmul.f32 %v6001_v26, %v6530_v9 }
 0x319   :  { %v668_v32 = vmul.f32 %v4681_v14, %v654_v27  ;;  %5194 = vmatprep.mubr.msk.f32.mxu1 %vm555_vm6, %v681_v30 }
 0x31a   :  { %v6003_v3 = vpop.eup %6002  ;;  %v669_v33 = vmul.f32 %v4681_v14, %v655_v31 }
 0x31b   :  { %v6005_v34 = vpop.eup %6004  ;;  %v682_v35 = vadd.f32 %v4682_v22, %v668_v32  ;;  %v656_v38 = vmul.f32 %v6003_v3, %v6541_v18 }
 0x31c   :  { %v683_v40 = vadd.f32 %v4682_v22, %v669_v33  ;;  %v657_v41 = vmul.f32 %v6005_v34, %v6544_v19 }
 0x31d   :  { %5195 = vmatmul.mubr.msk.f32.vlgmr.msra.gmra.mrb[14].mxu1 %vm555_vm6, %v682_v35  ;;  %v670_v42 = vmul.f32 %v4681_v14, %v656_v38 }
 0x31e   :  { %v6007_v10 = vpop.eup %6006  ;;  %5197 = vmatprep.mubr.msk.f32.mxu1 %vm555_vm6, %v683_v40  ;;  %v671_v43 = vmul.f32 %v4681_v14, %v657_v41 }
 0x31f   :  { %v6009_v9 = vpop.eup %6008  ;;  %v684_v45 = vadd.f32 %v4682_v22, %v670_v42  ;;  %v658_v47 = vmul.f32 %v6007_v10, %v6553_v28 }
 0x320   :  { %v685_v48 = vadd.f32 %v4682_v22, %v671_v43  ;;  %v659_v49 = vmul.f32 %v6009_v9, %v6556_v29 }
 0x321   :  { %5198 = vmatmul.mubr.msk.f32.gmra.mrb[16].mxu1 %vm555_vm6, %v684_v45  ;;  %v672_v18 = vmul.f32 %v4681_v14, %v658_v47 }
 0x322   :  { %v6011_v50 = vpop.eup %6010  ;;  %5200 = vmatprep.mubr.msk.f32.mxu1 %vm555_vm6, %v685_v48  ;;  %v673_v19 = vmul.f32 %v4681_v14, %v659_v49 }
 0x323   :  { %v686_v51 = vadd.f32 %v4682_v22, %v672_v18  ;;  %v660_v53 = vmul.f32 %v6011_v50, %v6565_v36  ;;  %v6261_v50 = vmov 0.0|0.0  }
 0x324   :  { %v687_v55 = vadd.f32 %v4682_v22, %v673_v19  ;;  %5672 = vmatprep.subr.bf16.mxu1 %v6261_v50 }
 0x325   :  { %5201 = vmatmul.mubr.msk.f32.gmra.mrb[18].mxu1 %vm555_vm6, %v686_v51  ;;  %v674_v56 = vmul.f32 %v4681_v14, %v660_v53 }
 0x326   :  { %5203 = vmatprep.mubr.msk.f32.mxu1 %vm555_vm6, %v687_v55 }
 0x327   :  { %v688_v28 = vadd.f32 %v4682_v22, %v674_v56 }
 0x329   :  { %5204 = vmatmul.mubr.msk.f32.gmra.mrb[20].mxu1 %vm555_vm6, %v688_v28 }
 0x3f0   :  { %v6606_v29 = vpop.f32.mrb[14].mxu1 }
 0x3f1   :  { %v6608_v57 = vpop.f32.mrb[15].mxu1  ;;  %v1025_v0 = vsel %vm1023_vm4, %v6606_v29, -inf }
 0x3f2   :  { %v5920_v58 = vpack.i.bf16 %v6606_v29, %v6608_v57  ;;  %v1024_v4 = vsel %vm1023_vm4, %v6608_v57, -inf }
 0x3f4   :  { %v6612_v59 = vpop.f32.mrb[16].mxu1 }
 0x3f5   :  { %v6614_v62 = vpop.f32.mrb[17].mxu1  ;;  %v1027_v12 = vsel %vm1023_vm4, %v6612_v59, -inf }
 0x3f6   :  { %v5925_v36 = vpack.i.bf16 %v6612_v59, %v6614_v62  ;;  %v1026_v16 = vsel %vm1023_vm4, %v6614_v62, -inf }
 0x3f8   :  { %v6618_v63 = vpop.f32.mrb[18].mxu1 }
 0x3f9   :  { %v1030_v1 = vsel %vm1023_vm4, %v6618_v63, -inf  ;;  %v6624_v2 = vpop.f32.mrb[19].mxu1 }
 0x3fa   :  { %v1031_v5 = vmax.f32 %v1025_v0, %v1030_v1  ;;  %v1028_v6 = vsel %vm1023_vm4, %v6624_v2, -inf  ;;  %v5930_v7 = vpack.i.bf16 %v6618_v63, %v6624_v2 }
 0x3fb   :  { %v1029_v8 = vmax.f32 %v1024_v4, %v1028_v6 }
 0x3fc   :  { %v6632_v11 = vpop.f32.mrb[20].mxu1 }
 0x3fd   :  { %v1036_v13 = vmax.f32 %v1029_v8, %v1031_v5  ;;  %v1034_v14 = vsel %vm1023_vm4, %v6632_v11, -inf  ;;  %v6638_v15 = vpop.f32.mrb[21].mxu1 }
 0x3fe   :  { %v1035_v17 = vmax.f32 %v1027_v12, %v1034_v14  ;;  %v1032_v20 = vsel %vm1023_vm4, %v6638_v15, -inf  ;;  %v5935_v21 = vpack.i.bf16 %v6632_v11, %v6638_v15  ;;  %v6264_v12 = vmov 0.0  }
 0x3ff   :  { %v1033_v22 = vmax.f32 %v1026_v16, %v1032_v20  ;;  %5242 = vmatprep.mubr.msk.f32.mxu1 %vm6263_vm7, %v6264_v12  ;;  %v825_v14 = vsel %vm555_vm6, %v6606_v29, -inf  ;;  %v828_v16 = vsel %vm555_vm6, %v6614_v62, -inf  ;;  %v6696_v20 = vld [vmem:[%s7756_s7] sm:$0xff] }
 0x401   :  { %v1037_v23 = vmax.f32 %v1033_v22, %v1035_v17  ;;  %v831_v17 = vsel %vm555_vm6, %v6612_v59, -inf  ;;  %v6701_v22 = vld [vmem:[%s7756_s7 + $0x8] sm:$0xff] }
 0x403   :  { %v1038_v24 = vmax.f32 %v1036_v13, %v1037_v23  ;;  %v822_v13 = vsel %vm555_vm6, %v6608_v57, -inf  ;;  %v6705_v23 = vpack.c.bf16 %v6701_v22, %v6696_v20 }
 0x405   :  { %v1039_v25 = vrot.slane %v1038_v24, 4  ;;  %5665 = vmatprep.subr.bf16.mxu0 %v6705_v23 }
 0x406   :  { %5667 = vmatpush3.bf16.msra.mxu0 %v6705_v23 }
 0x407   :  { %v1040_v26 = vmax.f32 %v1038_v24, %v1039_v25  ;;  %v6711_v24 = vld [vmem:[%s7756_s7 + $0x10] sm:$0xff]  ;;  %v6716_v25 = vld [vmem:[%s7756_s7 + $0x18] sm:$0xff] }
 0x409   :  { %v1041_v27 = vrot.slane %v1040_v26, 2 }
 0x40b   :  { %v1042_v30 = vmax.f32 %v1040_v26, %v1041_v27  ;;  %v6721_v26 = vpack.c.bf16 %v6716_v25, %v6711_v24 }
 0x40d   :  { %v1043_v31 = vrot.slane %v1042_v30, 1  ;;  %5669 = vmatprep.subr.bf16.mxu0 %v6721_v26 }
 0x40e   :  { %5671 = vmatpush3.bf16.msra.mxu0 %v6721_v26 }
 0x40f   :  { %v1044_v32 = vmax.f32 %v1042_v30, %v1043_v31 }
 0x411   :  { %v1051_v3 = vsub.f32 %v6638_v15, %v1044_v32  ;;  %v1047_v33 = vsub.f32 %v6614_v62, %v1044_v32  ;;  %v1048_v34 = vsub.f32 %v6612_v59, %v1044_v32  ;;  %v1045_v35 = vsub.f32 %v6608_v57, %v1044_v32 }
 0x412   :  { %v1046_v38 = vsub.f32 %v6606_v29, %v1044_v32  ;;  %v1049_v40 = vsub.f32 %v6624_v2, %v1044_v32  ;;  %v1050_v41 = vsub.f32 %v6618_v63, %v1044_v32  ;;  %v1052_v42 = vsub.f32 %v6632_v11, %v1044_v32 }
 0x413   :  { %v1057_v10 = vmul.f32 1.442695, %v1047_v33  ;;  %v1059_v43 = vmul.f32 1.442695, %v1048_v34  ;;  %v1053_v9 = vmul.f32 1.442695, %v1045_v35 }
 0x414   :  { %v1055_v45 = vmul.f32 1.442695, %v1046_v38  ;;  %v1061_v47 = vmul.f32 1.442695, %v1049_v40  ;;  %v1063_v48 = vmul.f32 1.442695, %v1050_v41 }
 0x415   :  { %6012 = vpow2.f32 %v1057_v10  ;;  %v1065_v49 = vmul.f32 1.442695, %v1051_v3  ;;  %v1067_v18 = vmul.f32 1.442695, %v1052_v42 }
 0x416   :  { %6014 = vpow2.f32 %v1059_v43 }
 0x417   :  { %6016 = vpow2.f32 %v1053_v9 }
 0x418   :  { %6018 = vpow2.f32 %v1055_v45 }
 0x419   :  { %6020 = vpow2.f32 %v1061_v47  ;;  %v73_v47 = vld [vmem:[%s7788_s1] sm:$0x3] }
 0x41a   :  { %6022 = vpow2.f32 %v1063_v48 }
 0x41b   :  { %6024 = vpow2.f32 %v1065_v49 }
 0x41c   :  { %6026 = vpow2.f32 %v1067_v18 }
 0x41f   :  { %v6655_v19 = vpop.eup %6012 }
 0x420   :  { %v6657_v51 = vpop.eup %6014 }
 0x421   :  { %v6659_v53 = vpop.eup %6016  ;;  %v5905_v55 = vpack.i.bf16 %v6657_v51, %v6655_v19 }
 0x422   :  { %v6663_v56 = vpop.eup %6018 }
 0x423   :  { %v6665_v28 = vpop.eup %6020  ;;  %5906 = vrot.lane.b32.xlu1 %v5905_v55, %s6262_s25  ;;  %v5900_v0 = vpack.i.bf16 %v6663_v56, %v6659_v53 }
 0x424   :  { %v6670_v1 = vpop.eup %6022 }
 0x425   :  { %v6672_v4 = vpop.eup %6024  ;;  %5901 = vrot.lane.b32.xlu0 %v5900_v0, %s6262_s25  ;;  %v5910_v5 = vpack.i.bf16 %v6670_v1, %v6665_v28 }
 0x426   :  { %v6677_v6 = vpop.eup %6026 }
 0x427   :  { %5911 = vrot.lane.b32.xlu1 %v5910_v5, %s6262_s25  ;;  %v5915_v8 = vpack.i.bf16 %v6677_v6, %v6672_v4 }
 0x42b   :  { %5916 = vrot.lane.b32.xlu1 %v5915_v8, %s6262_s25 }
 0x444   :  { %823 = vmax.xlane.f32.xlu0 %v822_v13 }
 0x44f   :  { %826 = vmax.xlane.f32.xlu1 %v825_v14 }
 0x453   :  { %829 = vmax.xlane.f32.xlu1 %v828_v16 }
 0x457   :  { %832 = vmax.xlane.f32.xlu1 %v831_v17 }
 0x495   :  { %v5907_v27 = vpop.permute.xlu1 %5906 }
 0x496   :  { %v5909_v33 = vunpack.i.h.bf16 %v5907_v27  ;;  %v5908_v34 = vunpack.i.l.bf16 %v5907_v27 }
 0x497   :  { %v5902_v30 = vpop.permute.xlu0 %5901 }
 0x498   :  { %v5904_v31 = vunpack.i.h.bf16 %v5902_v30  ;;  %v5903_v32 = vunpack.i.l.bf16 %v5902_v30  ;;  %v5676_v38 = vpack.c.bf16 %v5909_v33, %v5908_v34  ;;  %v74_v33 = vld [vmem:[%s7755_s6] sm:$0xff] }
 0x499   :  { %v5912_v3 = vpop.permute.xlu1 %5911 }
 0x49a   :  { %v5673_v35 = vpack.c.bf16 %v5904_v31, %v5903_v32  ;;  %v5914_v40 = vunpack.i.h.bf16 %v5912_v3  ;;  %v5913_v41 = vunpack.i.l.bf16 %v5912_v3 }
 0x49c   :  { %5674 = vmatpush3.bf16.msra.mxu1 %v5673_v35  ;;  %v5679_v10 = vpack.c.bf16 %v5914_v40, %v5913_v41  ;;  %v75_v35 = vld [vmem:[%s7755_s6 + $0x8] sm:$0xff]  ;;  %v76_v40 = vld [vmem:[%s7755_s6 + $0x10] sm:$0xff]  ;;  %v77_v41 = vld [vmem:[%s7755_s6 + $0x18] sm:$0xff] }
 0x49d   :  { %5675 = vmatprep.subr.bf16.mxu1 %v6261_v50  ;;  %v5917_v42 = vpop.permute.xlu1 %5916 }
 0x49e   :  { %v5919_v43 = vunpack.i.h.bf16 %v5917_v42  ;;  %v5918_v9 = vunpack.i.l.bf16 %v5917_v42  ;;  %v78_v42 = vld [vmem:[%s7755_s6 + $0x20] sm:$0xff] }
 0x4a0   :  { %5677 = vmatpush3.bf16.msra.mxu1 %v5676_v38  ;;  %v5682_v45 = vpack.c.bf16 %v5919_v43, %v5918_v9  ;;  %v80_v43 = vld [vmem:[%s7755_s6 + $0x30] sm:$0xff]  ;;  %v81_v9 = vld [vmem:[%s7755_s6 + $0x38] sm:$0xff] }
 0x4a1   :  { %5678 = vmatprep.subr.bf16.mxu1 %v6261_v50 }
 0x4a4   :  { %5680 = vmatpush3.bf16.msra.mxu1 %v5679_v10  ;;  %v79_v10 = vld [vmem:[%s7755_s6 + $0x28] sm:$0xff] }
 0x4a5   :  { %5681 = vmatprep.subr.bf16.mxu1 %v6261_v50 }
 0x4a8   :  { %5683 = vmatpush3.bf16.msra.mxu1 %v5682_v45 }
 0x4ab   :  { %5243 = vmatmul.mubr.msk.f32.vlgmr.msra.gmra.mrb[22].mxu1 %vm1101_vm8, %v73_v47 }
 0x4ac   :  { %5247 = vmatprep.mubr.msk.f32.mxu1 %vm1175_vm9, %v74_v33  ;;  %v834_v33 = vsel %vm555_vm6, %v6624_v2, -inf }
 0x4d1   :  { %v824_v48 = vpop.xlane.xlu0 %823 }
 0x4d2   :  { %v846_v49 = vsub.f32 %v6608_v57, %v824_v48 }
 0x4d4   :  { %v854_v18 = vmul.f32 1.442695, %v846_v49 }
 0x4d6   :  { %6028 = vpow2.f32 %v854_v18 }
 0x4dc   :  { %v827_v55 = vpop.xlane.xlu1 %826 }
 0x4dd   :  { %v847_v0 = vsub.f32 %v6606_v29, %v827_v55 }
 0x4df   :  { %v856_v5 = vmul.f32 1.442695, %v847_v0 }
 0x4e0   :  { %v6029_v8 = vpop.eup %6028  ;;  %v830_v13 = vpop.xlane.xlu1 %829 }
 0x4e1   :  { %6030 = vpow2.f32 %v856_v5  ;;  %5214 = vmatprep.mubr.msk.f32.mxu0 %vm555_vm6, %v6029_v8  ;;  %v848_v14 = vsub.f32 %v6614_v62, %v830_v13 }
 0x4e3   :  { %v858_v16 = vmul.f32 1.442695, %v848_v14 }
 0x4e4   :  { %v833_v17 = vpop.xlane.xlu1 %832 }
 0x4e5   :  { %6032 = vpow2.f32 %v858_v16  ;;  %v849_v27 = vsub.f32 %v6612_v59, %v833_v17 }
 0x4e7   :  { %v860_v30 = vmul.f32 1.442695, %v849_v27 }
 0x4e9   :  { %6034 = vpow2.f32 %v860_v30 }
 0x4eb   :  { %v6737_v31 = vpop.eup %6030 }
 0x4ec   :  { %5215 = vmatmul.mubr.msk.f32.vlgmr.msra.gmra.mrb[10].mxu0 %vm555_vm6, %v6737_v31 }
 0x4ef   :  { %v6741_v32 = vpop.eup %6032 }
 0x4f0   :  { %5217 = vmatprep.mubr.msk.f32.mxu0 %vm555_vm6, %v6741_v32 }
 0x4f3   :  { %v6745_v3 = vpop.eup %6034 }
 0x4f4   :  { %5218 = vmatmul.mubr.msk.f32.gmra.mrb[12].mxu0 %vm555_vm6, %v6745_v3 }
 0x57e   :  { %v1171_v34 = vpop.f32.mrb[22].mxu1 }
 0x57f   :  { %v5244_v38 = vpop.f32.mrb[23].mxu1  ;;  %5245 = vmatprep.subr.msk.mxu1 %vm1200_vm10, %v1171_v34 }
 0x580   :  { %5246 = vmatpush3.msk.msra.mxu1 %vm1200_vm10, %v1171_v34  ;;  %v837_v34 = vsel %vm555_vm6, %v6618_v63, -inf }
 0x581   :  { %5248 = vmatmul.mubr.msk.f32.vlgmr.msra.gmra.mrb[24].mxu1 %vm1175_vm9, %v75_v35 }
 0x582   :  { %5250 = vmatprep.mubr.msk.f32.mxu1 %vm1175_vm9, %v76_v40 }
 0x585   :  { %5251 = vmatmul.mubr.msk.f32.gmra.mrb[26].mxu1 %vm1175_vm9, %v77_v41 }
 0x586   :  { %5253 = vmatprep.mubr.msk.f32.mxu1 %vm1175_vm9, %v78_v42 }
 0x589   :  { %5254 = vmatmul.mubr.msk.f32.gmra.mrb[28].mxu1 %vm1175_vm9, %v79_v10 }
 0x58a   :  { %5256 = vmatprep.mubr.msk.f32.mxu1 %vm1175_vm9, %v80_v43 }
 0x58d   :  { %5257 = vmatmul.mubr.msk.f32.gmra.mrb[30].mxu1 %vm1175_vm9, %v81_v9 }
 0x5bf   :  { %v6783_v45 = vpop.f32.mrb[10].mxu0 }
 0x5c0   :  { %v960_v47 = vpop.f32.mrb[11].mxu0 }
 0x5c1   :  { %6036 = vrcp.f32 %v960_v47 }
 0x5c7   :  { %v6785_v48 = vpop.f32.mrb[12].mxu0 }
 0x5c8   :  { %v6787_v49 = vpop.f32.mrb[13].mxu0 }
 0x5cb   :  { %v6037_v18 = vpop.eup %6036 }
 0x5cc   :  { %v1000_v55 = vmul.f32 %v6037_v18, %v6029_v8 }
 0x5ce   :  { %v1015_v0 = vmul.f32 0.35355338, %v1000_v55 }
 0x5d0   :  { %5281 = vmatprep.mubr.msk.f32.mxu1 %vm555_vm6, %v1015_v0 }
 0x654   :  { %v5249_v5 = vpop.f32.mrb[24].mxu1 }
 0x655   :  { %1319 = vrot.lane.b32.xlu1 %v5249_v5, %s6265_s26  ;;  %v1270_v13 = vpop.f32.mrb[25].mxu1 }
 0x656   :  { %1317 = vrot.lane.b32.xlu0 %v1270_v13, %s6265_s26  ;;  %v840_v13 = vsel %vm555_vm6, %v6638_v15, -inf }
 0x658   :  { %v5252_v14 = vpop.f32.mrb[26].mxu1 }
 0x659   :  { %1323 = vrot.lane.b32.xlu1 %v5252_v14, %s6265_s26  ;;  %v1280_v16 = vpop.f32.mrb[27].mxu1 }
 0x65a   :  { %1321 = vrot.lane.b32.xlu0 %v1280_v16, %s6265_s26 }
 0x65c   :  { %v5255_v17 = vpop.f32.mrb[28].mxu1 }
 0x65d   :  { %1327 = vrot.lane.b32.xlu1 %v5255_v17, %s6265_s26  ;;  %v1290_v8 = vpop.f32.mrb[29].mxu1 }
 0x65e   :  { %1325 = vrot.lane.b32.xlu0 %v1290_v8, %s6265_s26 }
 0x660   :  { %v5258_v27 = vpop.f32.mrb[30].mxu1 }
 0x661   :  { %1331 = vrot.lane.b32.xlu1 %v5258_v27, %s6265_s26  ;;  %v1300_v30 = vpop.f32.mrb[31].mxu1 }
 0x662   :  { %1329 = vrot.lane.b32.xlu0 %v1300_v30, %s6265_s26 }
 0x681   :  { %835 = vmax.xlane.f32.xlu0 %v834_v33 }
 0x685   :  { %838 = vmax.xlane.f32.xlu1 %v837_v34 }
 0x6c7   :  { %v1320_v35 = vpop.permute.xlu1 %1319 }
 0x6c8   :  { %6038 = vrcp.f32 %v1320_v35  ;;  %v1318_v38 = vpop.permute.xlu0 %1317 }
 0x6c9   :  { %6040 = vrcp.f32 %v1318_v38 }
 0x6cb   :  { %v1324_v40 = vpop.permute.xlu1 %1323 }
 0x6cc   :  { %6042 = vrcp.f32 %v1324_v40  ;;  %v1322_v41 = vpop.permute.xlu0 %1321 }
 0x6cd   :  { %6044 = vrcp.f32 %v1322_v41 }
 0x6cf   :  { %v1328_v14 = vpop.permute.xlu1 %1327 }
 0x6d0   :  { %v1326_v5 = vpop.permute.xlu0 %1325 }
 0x6d1   :  { %6046 = vrcp.f32 %v1326_v5 }
 0x6d2   :  { %v6039_v42 = vpop.eup %6038 }
 0x6d3   :  { %v6041_v10 = vpop.eup %6040  ;;  %v1344_v43 = vmul.f32 %v6039_v42, %v6663_v56  ;;  %v843_v56 = vsel %vm555_vm6, %v6632_v11, -inf  ;;  %v1332_v16 = vpop.permute.xlu1 %1331 }
 0x6d4   :  { %v1342_v9 = vmul.f32 %v6041_v10, %v6659_v53  ;;  %v1330_v53 = vpop.permute.xlu0 %1329 }
 0x6d5   :  { %1363 = vrot.lane.b32.xlu1 %v1344_v43, %s6262_s25  ;;  %6048 = vrcp.f32 %v1330_v53 }
 0x6d6   :  { %v6043_v47 = vpop.eup %6042  ;;  %1361 = vrot.lane.b32.xlu0 %v1342_v9, %s6262_s25  ;;  %6050 = vrcp.f32 %v1328_v14 }
 0x6d7   :  { %v1348_v18 = vmul.f32 %v6043_v47, %v6657_v51  ;;  %v6045_v55 = vpop.eup %6044  ;;  %6052 = vrcp.f32 %v1332_v16 }
 0x6d8   :  { %v1346_v0 = vmul.f32 %v6045_v55, %v6655_v19 }
 0x6da   :  { %1367 = vrot.lane.b32.xlu0 %v1348_v18, %s6262_s25 }
 0x6db   :  { %v6047_v51 = vpop.eup %6046 }
 0x6dc   :  { %v1350_v19 = vmul.f32 %v6047_v51, %v6665_v28 }
 0x6de   :  { %1365 = vrot.lane.b32.xlu0 %v1346_v0, %s6262_s25 }
 0x6df   :  { %v6049_v17 = vpop.eup %6048 }
 0x6e0   :  { %v1354_v8 = vmul.f32 %v6049_v17, %v6672_v4  ;;  %v6051_v27 = vpop.eup %6050 }
 0x6e1   :  { %v1352_v35 = vmul.f32 %v6051_v27, %v6670_v1  ;;  %v6053_v38 = vpop.eup %6052 }
 0x6e2   :  { %v1356_v41 = vmul.f32 %v6053_v38, %v6677_v6 }
 0x6f9   :  { %844 = vmax.xlane.f32.xlu1 %v843_v56 }
 0x6fd   :  { %841 = vmax.xlane.f32.xlu0 %v840_v13 }
 0x70a   :  { %1623 = vrot.lane.b32.xlu1 %v1350_v19, %s6262_s25 }
 0x70e   :  { %1627 = vrot.lane.b32.xlu1 %v1354_v8, %s6262_s25  ;;  %v836_v30 = vpop.xlane.xlu0 %835 }
 0x70f   :  { %v850_v33 = vsub.f32 %v6624_v2, %v836_v30 }
 0x711   :  { %v862_v34 = vmul.f32 1.442695, %v850_v33 }
 0x712   :  { %v839_v40 = vpop.xlane.xlu1 %838  ;;  %5926 = vrot.lane.b32.xlu1 %v5925_v36, %s6266_s27 }
 0x713   :  { %6054 = vpow2.f32 %v862_v34  ;;  %v851_v28 = vsub.f32 %v6618_v63, %v839_v40  ;;  %1625 = vrot.lane.b32.xlu0 %v1352_v35, %s6262_s25 }
 0x715   :  { %v864_v4 = vmul.f32 1.442695, %v851_v28 }
 0x716   :  { %5936 = vrot.lane.b32.xlu1 %v5935_v21, %s6266_s27 }
 0x717   :  { %6056 = vpow2.f32 %v864_v4  ;;  %1629 = vrot.lane.b32.xlu0 %v1356_v41, %s6262_s25 }
 0x71b   :  { %5921 = vrot.lane.b32.xlu0 %v5920_v58, %s6266_s27 }
 0x71d   :  { %v6836_v59 = vpop.eup %6054 }
 0x71e   :  { %5220 = vmatprep.mubr.msk.f32.mxu0 %vm555_vm6, %v6836_v59 }
 0x71f   :  { %5931 = vrot.lane.b32.xlu0 %v5930_v7, %s6266_s27 }
 0x721   :  { %v6844_v62 = vpop.eup %6056 }
 0x722   :  { %5221 = vmatmul.mubr.msk.f32.gmra.mrb[14].mxu0 %vm555_vm6, %v6844_v62 }
 0x747   :  { %v1364_v21 = vpop.permute.xlu1 %1363 }
 0x748   :  { %v1362_v36 = vpop.permute.xlu0 %1361 }
 0x749   :  { %1373 = vxpose.xlu0.b32.start [1/4] (short) (narrow) %v1362_v36, 32 }
 0x74c   :  { %v1368_v29 = vpop.permute.xlu0 %1367 }
 0x74d   :  { %1374 = vxpose.xlu0.b32.cont [2/4] (short) (narrow) %v1364_v21, 32 }
 0x750   :  { %v1366_v57 = vpop.permute.xlu0 %1365 }
 0x751   :  { %1375 = vxpose.xlu0.b32.cont [3/4] (short) (narrow) %v1366_v57, 32 }
 0x755   :  { %1376 = vxpose.xlu0.b32.end [4/4] (short) (narrow) %v1368_v29, 32 }
 0x786   :  { %v845_v58 = vpop.xlane.xlu1 %844 }
 0x787   :  { %v853_v1 = vsub.f32 %v6632_v11, %v845_v58  ;;  %v1881_v58 = vld [vmem:[%s7760_s11] sm:$0xff] }
 0x789   :  { %v868_v2 = vmul.f32 1.442695, %v853_v1  ;;  %v1882_v1 = vld [vmem:[%s7760_s11 + $0x8] sm:$0xff] }
 0x78a   :  { %v1624_v6 = vpop.permute.xlu1 %1623  ;;  %v842_v42 = vpop.xlane.xlu0 %841 }
 0x78b   :  { %v852_v63 = vsub.f32 %v6638_v15, %v842_v42  ;;  %1635 = vxpose.xlu1.b32.start [1/4] (short) (narrow) %v1624_v6, 32  ;;  %v1883_v6 = vld [vmem:[%s7760_s11 + $0x10] sm:$0xff]  ;;  %v5716_v42 = vpack.c.bf16 %v1882_v1, %v1881_v58 }
 0x78d   :  { %v866_v7 = vmul.f32 1.442695, %v852_v63  ;;  %v1884_v63 = vld [vmem:[%s7760_s11 + $0x18] sm:$0xff] }
 0x78e   :  { %v1628_v10 = vpop.permute.xlu1 %1627  ;;  %v1626_v43 = vpop.permute.xlu0 %1625 }
 0x78f   :  { %6058 = vpow2.f32 %v866_v7  ;;  %1636 = vxpose.xlu1.b32.cont [2/4] (short) (narrow) %v1626_v43, 32 }
 0x790   :  { %6060 = vpow2.f32 %v868_v2  ;;  %v5720_v2 = vpack.c.bf16 %v1884_v63, %v1883_v6  ;;  %v4733_v63 = vld [vmem:[%s7761_s12] ss:$0 sm:$0xff] }
 0x791   :  { %6062 = vrcp.f32 %v6783_v45 }
 0x792   :  { %v1630_v9 = vpop.permute.xlu0 %1629  ;;  %v5927_v47 = vpop.permute.xlu1 %5926  ;;  %6064 = vrcp.f32 %v6787_v49 }
 0x793   :  { %1637 = vxpose.xlu1.b32.cont [3/4] (short) (narrow) %v1628_v10, 32  ;;  %v5929_v55 = vunpack.i.h.bf16 %v5927_v47  ;;  %v5928_v0 = vunpack.i.l.bf16 %v5927_v47  ;;  %6066 = vrcp.f32 %v6785_v48 }
 0x795   :  { %v5688_v14 = vpack.c.bf16 %v5929_v55, %v5928_v0 }
 0x796   :  { %v5922_v18 = vpop.permute.xlu0 %5921  ;;  %v5937_v17 = vpop.permute.xlu1 %5936 }
 0x797   :  { %v5924_v5 = vunpack.i.h.bf16 %v5922_v18  ;;  %v5923_v11 = vunpack.i.l.bf16 %v5922_v18  ;;  %1638 = vxpose.xlu1.b32.end [4/4] (short) (narrow) %v1630_v9, 32  ;;  %v5939_v27 = vunpack.i.h.bf16 %v5937_v17  ;;  %v5938_v30 = vunpack.i.l.bf16 %v5937_v17 }
 0x799   :  { %v6850_v56 = vpop.eup %6058  ;;  %v5684_v15 = vpack.c.bf16 %v5924_v5, %v5923_v11  ;;  %v5704_v34 = vpack.c.bf16 %v5939_v27, %v5938_v30 }
 0x79a   :  { %v6852_v53 = vpop.eup %6060  ;;  %v5932_v13 = vpop.permute.xlu0 %5931  ;;  %5223 = vmatprep.mubr.msk.f32.mxu0 %vm555_vm6, %v6850_v56 }
 0x79b   :  { %v5934_v51 = vunpack.i.h.bf16 %v5932_v13  ;;  %v5933_v16 = vunpack.i.l.bf16 %v5932_v13  ;;  %5224 = vmatmul.mubr.msk.f32.gmra.mrb[16].mxu0 %vm555_vm6, %v6852_v53  ;;  %5685 = vmatprep.subr.bf16.mxu0 %v5684_v15  ;;  %v6063_v55 = vpop.eup %6062 }
 0x79c   :  { %5687 = vmatpush3.bf16.msra.mxu0 %v5684_v15  ;;  %v6065_v45 = vpop.eup %6064  ;;  %v1002_v11 = vmul.f32 %v6063_v55, %v6737_v31 }
 0x79d   :  { %5689 = vmatprep.subr.bf16.mxu0 %v5688_v14  ;;  %v5700_v19 = vpack.c.bf16 %v5934_v51, %v5933_v16  ;;  %v6067_v13 = vpop.eup %6066 }
 0x79e   :  { %v1016_v48 = vmul.f32 0.35355338, %v1002_v11  ;;  %v1006_v16 = vmul.f32 %v6067_v13, %v6745_v3 }
 0x7a0   :  { %5691 = vmatpush3.bf16.msra.mxu0 %v5688_v14  ;;  %v1004_v14 = vmul.f32 %v6065_v45, %v6741_v32 }
 0x7a1   :  { %5701 = vmatprep.subr.bf16.mxu0 %v5700_v19 }
 0x7c9   :  { %v1389_v8 = vpop.trf.xlu0 }
 0x7ca   :  { %5267 = vmatprep.mubr.msk.f32.mxu0 %vm555_vm6, %v1389_v8  ;;  %v1018_v8 = vmul.f32 0.35355338, %v1006_v16 }
 0x7cd   :  { %v1390_v33 = vpop.trf.xlu0 }
 0x7ce   :  { %5268 = vmatmul.mubr.msk.f32.vlgmr.msra.gmra.mrb[18].mxu0 %vm555_vm6, %v1390_v33 }
 0x7cf   :  { %5703 = vmatpush3.bf16.msra.mxu0 %v5700_v19  ;;  %v1017_v19 = vmul.f32 0.35355338, %v1004_v14 }
 0x7d0   :  { %5705 = vmatprep.subr.bf16.mxu0 %v5704_v34 }
 0x7d1   :  { %v1391_v35 = vpop.trf.xlu0 }
 0x7d2   :  { %5270 = vmatprep.mubr.msk.f32.mxu0 %vm555_vm6, %v1391_v35 }
 0x7d3   :  { %5707 = vmatpush3.bf16.msra.mxu0 %v5704_v34 }
 0x7d4   :  { %5717 = vmatprep.subr.bf16.mxu0 %v5716_v42 }
 0x7d5   :  { %v1392_v38 = vpop.trf.xlu0 }
 0x7d6   :  { %5271 = vmatmul.mubr.msk.f32.gmra.mrb[20].mxu0 %vm555_vm6, %v1392_v38 }
 0x7f5   :  { %v5222_v40 = vpop.f32.mrb[14].mxu0 }
 0x7f6   :  { %v980_v28 = vpop.f32.mrb[15].mxu0 }
 0x7f7   :  { %6068 = vrcp.f32 %v980_v28 }
 0x7f8   :  { %6070 = vrcp.f32 %v5222_v40 }
 0x801   :  { %v6069_v51 = vpop.eup %6068 }
 0x802   :  { %v1008_v17 = vmul.f32 %v6069_v51, %v6836_v59  ;;  %v6071_v34 = vpop.eup %6070 }
 0x803   :  { %v1010_v40 = vmul.f32 %v6071_v34, %v6844_v62 }
 0x804   :  { %v1019_v27 = vmul.f32 0.35355338, %v1008_v17 }
 0x80b   :  { %v1651_v4 = vpop.trf.xlu1 }
 0x80c   :  { %5295 = vmatprep.mubr.msk.f32.mxu0 %vm555_vm6, %v1651_v4 }
 0x80f   :  { %v1652_v41 = vpop.trf.xlu1 }
 0x810   :  { %5296 = vmatmul.mubr.msk.f32.vlgmr.msra.gmra.mrb[22].mxu0 %vm555_vm6, %v1652_v41 }
 0x811   :  { %5719 = vmatpush3.bf16.msra.mxu0 %v5716_v42 }
 0x812   :  { %5721 = vmatprep.subr.bf16.mxu0 %v5720_v2 }
 0x813   :  { %v1653_v36 = vpop.trf.xlu1 }
 0x814   :  { %5298 = vmatprep.mubr.msk.f32.mxu0 %vm555_vm6, %v1653_v36 }
 0x815   :  { %5723 = vmatpush3.bf16.msra.mxu0 %v5720_v2 }
 0x817   :  { %v1654_v21 = vpop.trf.xlu1 }
 0x818   :  { %5299 = vmatmul.mubr.msk.f32.gmra.mrb[24].mxu0 %vm555_vm6, %v1654_v21 }
 0x86e   :  { %v5225_v29 = vpop.f32.mrb[16].mxu0 }
 0x86f   :  { %v990_v57 = vpop.f32.mrb[17].mxu0 }
 0x870   :  { %6072 = vrcp.f32 %v990_v57 }
 0x871   :  { %6074 = vrcp.f32 %v5225_v29 }
 0x87a   :  { %v6073_v28 = vpop.eup %6072 }
 0x87b   :  { %v6075_v36 = vpop.eup %6074 }
 0x87c   :  { %v1014_v21 = vmul.f32 %v6075_v36, %v6852_v53 }
 0x8a1   :  { %v5269_v7 = vpop.f32.mrb[18].mxu0 }
 0x8a2   :  { %v1519_v10 = vmul.f32 %v5269_v7, %v6701_v22  ;;  %v1499_v43 = vpop.f32.mrb[19].mxu0 }
 0x8a3   :  { %v1518_v9 = vmul.f32 %v1499_v43, %v6696_v20 }
 0x8a5   :  { %v5692_v47 = vpack.c.bf16 %v1519_v10, %v1518_v9 }
 0x8a7   :  { %5693 = vmatprep.subr.bf16.mxu1 %v5692_v47 }
 0x8a8   :  { %5695 = vmatpush3.bf16.msra.mxu1 %v5692_v47 }
 0x8a9   :  { %v5272_v18 = vpop.f32.mrb[20].mxu0 }
 0x8aa   :  { %v1521_v0 = vmul.f32 %v5272_v18, %v6716_v25  ;;  %v1509_v5 = vpop.f32.mrb[21].mxu0 }
 0x8ab   :  { %v1520_v49 = vmul.f32 %v1509_v5, %v6711_v24 }
 0x8ad   :  { %v5696_v15 = vpack.c.bf16 %v1521_v0, %v1520_v49 }
 0x8af   :  { %5697 = vmatprep.subr.bf16.mxu1 %v5696_v15 }
 0x8b0   :  { %5699 = vmatpush3.bf16.msra.mxu1 %v5696_v15 }
 0x8b3   :  { %5282 = vmatmul.mubr.msk.f32.vlgmr.msra.gmra.mrb[32].mxu1 %vm555_vm6, %v1016_v48 }
 0x8b4   :  { %5284 = vmatprep.mubr.msk.f32.mxu1 %vm555_vm6, %v1017_v19 }
 0x8b7   :  { %5285 = vmatmul.mubr.msk.f32.gmra.mrb[34].mxu1 %vm555_vm6, %v1018_v8 }
 0x8b8   :  { %5309 = vmatprep.mubr.msk.f32.mxu1 %vm555_vm6, %v1019_v27 }
 0x8e3   :  { %v5297_v31 = vpop.f32.mrb[22].mxu0 }
 0x8e4   :  { %v1781_v32 = vmul.f32 %v5297_v31, %v6701_v22  ;;  %v1761_v30 = vpop.f32.mrb[23].mxu0  ;;  %v1012_v22 = vmul.f32 %v6073_v28, %v6850_v56 }
 0x8e5   :  { %v1780_v3 = vmul.f32 %v1761_v30, %v6696_v20  ;;  %v1020_v20 = vmul.f32 0.35355338, %v1010_v40 }
 0x8e6   :  { %v1021_v29 = vmul.f32 0.35355338, %v1012_v22 }
 0x8e7   :  { %v5708_v59 = vpack.c.bf16 %v1781_v32, %v1780_v3 }
 0x8e9   :  { %5709 = vmatprep.subr.bf16.mxu1 %v5708_v59 }
 0x8ea   :  { %5711 = vmatpush3.bf16.msra.mxu1 %v5708_v59 }
 0x8eb   :  { %v5300_v33 = vpop.f32.mrb[24].mxu0 }
 0x8ec   :  { %v1783_v35 = vmul.f32 %v5300_v33, %v6716_v25  ;;  %v1771_v38 = vpop.f32.mrb[25].mxu0  ;;  %v1022_v25 = vmul.f32 0.35355338, %v1014_v21 }
 0x8ed   :  { %v1782_v4 = vmul.f32 %v1771_v38, %v6711_v24 }
 0x8ef   :  { %v5712_v41 = vpack.c.bf16 %v1783_v35, %v1782_v4 }
 0x8f1   :  { %5713 = vmatprep.subr.bf16.mxu1 %v5712_v41 }
 0x8f2   :  { %5715 = vmatpush3.bf16.msra.mxu1 %v5712_v41 }
 0x8f5   :  { %5310 = vmatmul.mubr.msk.f32.vlgmr.msra.gmra.mrb[36].mxu1 %vm555_vm6, %v1020_v20 }
 0x8f6   :  { %5312 = vmatprep.mubr.msk.f32.mxu1 %vm555_vm6, %v1021_v29 }
 0x8f9   :  { %5313 = vmatmul.mubr.msk.f32.gmra.mrb[38].mxu1 %vm555_vm6, %v1022_v25 }
 0x986   :  { %v5283_v24 = vpop.f32.mrb[32].mxu1 }
 0x987   :  { %v1600_v57 = vpop.f32.mrb[33].mxu1 }
 0x988   :  { %5323 = vmatprep.mubr.msk.f32.mxu0 %vm555_vm6, %v1600_v57  ;;  %v2171_v57 = vld [vmem:[%s7764_s15] sm:$0xff] }
 0x989   :  { %5324 = vmatmul.mubr.msk.f32.vlgmr.msra.gmra.mrb[26].mxu0 %vm555_vm6, %v5283_v24 }
 0x98a   :  { %v5286_v62 = vpop.f32.mrb[34].mxu1 }
 0x98b   :  { %v1610_v56 = vpop.f32.mrb[35].mxu1 }
 0x98c   :  { %5326 = vmatprep.mubr.msk.f32.mxu0 %vm555_vm6, %v1610_v56 }
 0x98d   :  { %5327 = vmatmul.mubr.msk.f32.gmra.mrb[28].mxu0 %vm555_vm6, %v5286_v62  ;;  %v2172_v62 = vld [vmem:[%s7764_s15 + $0x8] sm:$0xff] }
 0x98e   :  { %v5724_v56 = vpack.c.bf16 %v2172_v62, %v2171_v57 }
 0x990   :  { %5725 = vmatprep.subr.bf16.mxu1 %v5724_v56 }
 0x991   :  { %5727 = vmatpush3.bf16.msra.mxu1 %v5724_v56 }
 0x9c8   :  { %v5311_v53 = vpop.f32.mrb[36].mxu1 }
 0x9c9   :  { %v1862_v58 = vpop.f32.mrb[37].mxu1 }
 0x9ca   :  { %5329 = vmatprep.mubr.msk.f32.mxu0 %vm555_vm6, %v1862_v58  ;;  %v2174_v58 = vld [vmem:[%s7764_s15 + $0x18] sm:$0xff] }
 0x9cb   :  { %5330 = vmatmul.mubr.msk.f32.gmra.mrb[30].mxu0 %vm555_vm6, %v5311_v53  ;;  %v2173_v53 = vld [vmem:[%s7764_s15 + $0x10] sm:$0xff] }
 0x9cc   :  { %v5314_v1 = vpop.f32.mrb[38].mxu1 }
 0x9cd   :  { %v1872_v6 = vpop.f32.mrb[39].mxu1 }
 0x9ce   :  { %5332 = vmatprep.mubr.msk.f32.mxu0 %vm555_vm6, %v1872_v6 }
 0x9cf   :  { %5333 = vmatmul.mubr.msk.f32.gmra.mrb[32].mxu0 %vm555_vm6, %v5314_v1  ;;  %v5728_v1 = vpack.c.bf16 %v2174_v58, %v2173_v53 }
 0x9d1   :  { %5729 = vmatprep.subr.bf16.mxu1 %v5728_v1 }
 0x9d2   :  { %5731 = vmatpush3.bf16.msra.mxu1 %v5728_v1 }
 0xa5c   :  { %v5325_v42 = vpop.f32.mrb[26].mxu0 }
 0xa5d   :  { %v2015_v2 = vadd.f32 %v5325_v42, %v6479_v39  ;;  %v1975_v7 = vpop.f32.mrb[27].mxu0 }
 0xa5e   :  { %v2014_v10 = vadd.f32 %v1975_v7, %v6474_v37 }
 0xa5f   :  { %v6916_v43 = vadd.f32 %v4733_v63, %v2015_v2 }
 0xa60   :  { %v6918_v9 = vadd.f32 %v4733_v63, %v2014_v10  ;;  %v5328_v47 = vpop.f32.mrb[28].mxu0 }
 0xa61   :  { %v2017_v18 = vadd.f32 %v5328_v47, %v6491_v46  ;;  %v1985_v55 = vpop.f32.mrb[29].mxu0  ;;  %v2042_v0 = vsel %vm555_vm6, %v6916_v43, 0.0 }
 0xa62   :  { %v2016_v5 = vadd.f32 %v1985_v55, %v6486_v44  ;;  %2043 = vadd.xlane.f32.xlu1 %v2042_v0  ;;  %v2039_v39 = vsel %vm555_vm6, %v6918_v9, 0.0 }
 0xa63   :  { %v6926_v45 = vadd.f32 %v4733_v63, %v2017_v18  ;;  %2040 = vadd.xlane.f32.xlu0 %v2039_v39 }
 0xa64   :  { %v6930_v49 = vadd.f32 %v4733_v63, %v2016_v5 }
 0xa65   :  { %v2048_v37 = vsel %vm555_vm6, %v6926_v45, 0.0 }
 0xa66   :  { %v2045_v46 = vsel %vm555_vm6, %v6930_v49, 0.0 }
 0xa67   :  { %2049 = vadd.xlane.f32.xlu0 %v2048_v37 }
 0xa6b   :  { %2046 = vadd.xlane.f32.xlu0 %v2045_v46 }
 0xa9e   :  { %v5331_v11 = vpop.f32.mrb[30].mxu0 }
 0xa9f   :  { %v2019_v44 = vadd.f32 %v5331_v11, %v6505_v54  ;;  %v1995_v15 = vpop.f32.mrb[31].mxu0 }
 0xaa0   :  { %v2018_v13 = vadd.f32 %v1995_v15, %v6500_v52 }
 0xaa1   :  { %v6936_v14 = vadd.f32 %v4733_v63, %v2019_v44 }
 0xaa2   :  { %v6938_v51 = vadd.f32 %v4733_v63, %v2018_v13  ;;  %v5334_v48 = vpop.f32.mrb[32].mxu0 }
 0xaa3   :  { %v2021_v16 = vadd.f32 %v5334_v48, %v6516_v61  ;;  %v2005_v19 = vpop.f32.mrb[33].mxu0  ;;  %v2054_v17 = vsel %vm555_vm6, %v6936_v14, 0.0 }
 0xaa4   :  { %v2020_v8 = vadd.f32 %v2005_v19, %v6514_v60  ;;  %2055 = vadd.xlane.f32.xlu1 %v2054_v17  ;;  %v2051_v54 = vsel %vm555_vm6, %v6938_v51, 0.0 }
 0xaa5   :  { %v6946_v27 = vadd.f32 %v4733_v63, %v2021_v16  ;;  %2052 = vadd.xlane.f32.xlu0 %v2051_v54 }
 0xaa6   :  { %v6948_v52 = vadd.f32 %v4733_v63, %v2020_v8 }
 0xaa7   :  { %v2060_v31 = vsel %vm555_vm6, %v6946_v27, 0.0 }
 0xaa8   :  { %2061 = vadd.xlane.f32.xlu1 %v2060_v31  ;;  %v2057_v61 = vsel %vm555_vm6, %v6948_v52, 0.0 }
 0xaa9   :  { %2058 = vadd.xlane.f32.xlu0 %v2057_v61 }
 0xaef   :  { %v2044_v32 = vpop.xlane.xlu1 %2043 }
 0xaf0   :  { %v2064_v30 = vmul.f32 0.03125, %v2044_v32  ;;  %v2041_v60 = vpop.xlane.xlu0 %2040 }
 0xaf1   :  { %v2063_v3 = vmul.f32 0.03125, %v2041_v60 }
 0xaf2   :  { %v6955_v59 = vsub.f32 %v6916_v43, %v2064_v30 }
 0xaf3   :  { %v6958_v33 = vsub.f32 %v6918_v9, %v2063_v3 }
 0xaf4   :  { %v2050_v34 = vpop.xlane.xlu0 %2049  ;;  %v2080_v35 = vmul.f32 %v6955_v59, %v6955_v59 }
 0xaf5   :  { %v2066_v38 = vmul.f32 0.03125, %v2050_v34  ;;  %v2079_v28 = vmul.f32 %v6958_v33, %v6958_v33 }
 0xaf6   :  { %v2090_v4 = vsel %vm555_vm6, %v2080_v35, 0.0 }
 0xaf7   :  { %v6966_v40 = vsub.f32 %v6926_v45, %v2066_v38  ;;  %2091 = vadd.xlane.f32.xlu1 %v2090_v4  ;;  %v2087_v41 = vsel %vm555_vm6, %v2079_v28, 0.0  ;;  %v4734_v28 = vld [vmem:[%s7762_s13] ss:$0 sm:$0xff] }
 0xaf8   :  { %v2047_v36 = vpop.xlane.xlu0 %2046  ;;  %2088 = vadd.xlane.f32.xlu0 %v2087_v41 }
 0xaf9   :  { %v2065_v22 = vmul.f32 0.03125, %v2047_v36  ;;  %v2082_v20 = vmul.f32 %v6966_v40, %v6966_v40 }
 0xafb   :  { %v6972_v21 = vsub.f32 %v6930_v49, %v2065_v22  ;;  %v2096_v29 = vsel %vm555_vm6, %v2082_v20, 0.0  ;;  %v4735_v22 = vld [vmem:[%s7763_s14] ss:$0 sm:$0xff] }
 0xafc   :  { %2097 = vadd.xlane.f32.xlu1 %v2096_v29 }
 0xafd   :  { %v2081_v25 = vmul.f32 %v6972_v21, %v6972_v21 }
 0xaff   :  { %v2093_v24 = vsel %vm555_vm6, %v2081_v25, 0.0 }
 0xb00   :  { %2094 = vadd.xlane.f32.xlu0 %v2093_v24 }
 0xb31   :  { %v2056_v6 = vpop.xlane.xlu1 %2055 }
 0xb32   :  { %v2068_v42 = vmul.f32 0.03125, %v2056_v6  ;;  %v2053_v63 = vpop.xlane.xlu0 %2052 }
 0xb33   :  { %v2067_v2 = vmul.f32 0.03125, %v2053_v63 }
 0xb34   :  { %v6991_v7 = vsub.f32 %v6936_v14, %v2068_v42 }
 0xb35   :  { %v6994_v10 = vsub.f32 %v6938_v51, %v2067_v2  ;;  %v2062_v47 = vpop.xlane.xlu1 %2061 }
 0xb36   :  { %v2070_v18 = vmul.f32 0.03125, %v2062_v47  ;;  %v2059_v55 = vpop.xlane.xlu0 %2058  ;;  %v2084_v0 = vmul.f32 %v6991_v7, %v6991_v7 }
 0xb37   :  { %v2069_v5 = vmul.f32 0.03125, %v2059_v55  ;;  %v2083_v39 = vmul.f32 %v6994_v10, %v6994_v10 }
 0xb38   :  { %v7001_v37 = vsub.f32 %v6946_v27, %v2070_v18  ;;  %v2102_v46 = vsel %vm555_vm6, %v2084_v0, 0.0 }
 0xb39   :  { %v7005_v11 = vsub.f32 %v6948_v52, %v2069_v5  ;;  %2103 = vadd.xlane.f32.xlu1 %v2102_v46  ;;  %v2099_v44 = vsel %vm555_vm6, %v2083_v39, 0.0 }
 0xb3a   :  { %2100 = vadd.xlane.f32.xlu0 %v2099_v44  ;;  %v2086_v15 = vmul.f32 %v7001_v37, %v7001_v37 }
 0xb3b   :  { %v2085_v13 = vmul.f32 %v7005_v11, %v7005_v11 }
 0xb3c   :  { %v2108_v48 = vsel %vm555_vm6, %v2086_v15, 0.0 }
 0xb3d   :  { %2109 = vadd.xlane.f32.xlu1 %v2108_v48  ;;  %v2105_v16 = vsel %vm555_vm6, %v2085_v13, 0.0 }
 0xb3e   :  { %2106 = vadd.xlane.f32.xlu0 %v2105_v16 }
 0xb84   :  { %v2092_v19 = vpop.xlane.xlu1 %2091 }
 0xb85   :  { %v2112_v17 = vmul.f32 0.03125, %v2092_v19  ;;  %v2089_v8 = vpop.xlane.xlu0 %2088 }
 0xb86   :  { %v2111_v54 = vmul.f32 0.03125, %v2089_v8 }
 0xb87   :  { %v2120_v31 = vadd.f32 1e-05, %v2112_v17 }
 0xb88   :  { %v2119_v61 = vadd.f32 1e-05, %v2111_v54 }
 0xb89   :  { %6076 = vrsqrt.f32 %v2120_v31  ;;  %v2098_v32 = vpop.xlane.xlu1 %2097 }
 0xb8a   :  { %6078 = vrsqrt.f32 %v2119_v61  ;;  %v2114_v30 = vmul.f32 0.03125, %v2098_v32 }
 0xb8c   :  { %v2122_v60 = vadd.f32 1e-05, %v2114_v30 }
 0xb8d   :  { %v2095_v3 = vpop.xlane.xlu0 %2094 }
 0xb8e   :  { %6080 = vrsqrt.f32 %v2122_v60  ;;  %v2113_v34 = vmul.f32 0.03125, %v2095_v3  ;;  %v2385_v3 = vld [vmem:[%s7766_s17 + $0x10] sm:$0xff] }
 0xb90   :  { %v2121_v35 = vadd.f32 1e-05, %v2113_v34  ;;  %v2386_v34 = vld [vmem:[%s7766_s17 + $0x18] sm:$0xff] }
 0xb92   :  { %6082 = vrsqrt.f32 %v2121_v35  ;;  %v5736_v35 = vpack.c.bf16 %v2386_v34, %v2385_v3 }
 0xb93   :  { %v6077_v38 = vpop.eup %6076 }
 0xb94   :  { %v6079_v4 = vpop.eup %6078  ;;  %v2136_v41 = vmul.f32 %v6077_v38, %v6955_v59  ;;  %v2387_v38 = vld [vmem:[%s7766_s17 + $0x20] sm:$0xff] }
 0xb95   :  { %v2135_v36 = vmul.f32 %v6079_v4, %v6958_v33 }
 0xb96   :  { %v2150_v20 = vmul.f32 %v4734_v28, %v2136_v41  ;;  %v2389_v41 = vld [vmem:[%s7766_s17 + $0x30] sm:$0xff] }
 0xb97   :  { %v2149_v29 = vmul.f32 %v4734_v28, %v2135_v36  ;;  %v2390_v36 = vld [vmem:[%s7766_s17 + $0x38] sm:$0xff] }
 0xb98   :  { %v6081_v25 = vpop.eup %6080  ;;  %v2164_v57 = vadd.f32 %v4735_v22, %v2150_v20  ;;  %v2391_v20 = vld [vmem:[%s7766_s17 + $0x40] sm:$0xff] }
 0xb99   :  { %v2163_v24 = vadd.f32 %v4735_v22, %v2149_v29  ;;  %v2138_v62 = vmul.f32 %v6081_v25, %v6966_v40  ;;  %v2392_v29 = vld [vmem:[%s7766_s17 + $0x48] sm:$0xff] }
 0xb9a   :  { %v5748_v25 = vpack.c.bf16 %v2392_v29, %v2391_v20 }
 0xb9b   :  { %5343 = vmatprep.mubr.msk.f32.mxu1 %vm555_vm6, %v2163_v24  ;;  %v2152_v53 = vmul.f32 %v4734_v28, %v2138_v62  ;;  %v2393_v24 = vld [vmem:[%s7766_s17 + $0x50] sm:$0xff] }
 0xb9c   :  { %v6083_v56 = vpop.eup %6082  ;;  %5344 = vmatmul.mubr.msk.f32.vlgmr.msra.gmra.mrb[40].mxu1 %vm555_vm6, %v2164_v57  ;;  %v2394_v57 = vld [vmem:[%s7766_s17 + $0x58] sm:$0xff] }
 0xb9d   :  { %v2137_v59 = vmul.f32 %v6083_v56, %v6972_v21  ;;  %v2166_v1 = vadd.f32 %v4735_v22, %v2152_v53  ;;  %v5752_v62 = vpack.c.bf16 %v2394_v57, %v2393_v24  ;;  %v2395_v56 = vld [vmem:[%s7766_s17 + $0x60] sm:$0xff] }
 0xb9f   :  { %v2151_v33 = vmul.f32 %v4734_v28, %v2137_v59  ;;  %v2396_v59 = vld [vmem:[%s7766_s17 + $0x68] sm:$0xff] }
 0xba0   :  { %v5756_v53 = vpack.c.bf16 %v2396_v59, %v2395_v56 }
 0xba1   :  { %v2165_v58 = vadd.f32 %v4735_v22, %v2151_v33  ;;  %v2397_v33 = vld [vmem:[%s7766_s17 + $0x70] sm:$0xff] }
 0xba3   :  { %5346 = vmatprep.mubr.msk.f32.mxu1 %vm555_vm6, %v2165_v58  ;;  %v2398_v58 = vld [vmem:[%s7766_s17 + $0x78] sm:$0xff] }
 0xba4   :  { %5347 = vmatmul.mubr.msk.f32.gmra.mrb[42].mxu1 %vm555_vm6, %v2166_v1  ;;  %v5760_v1 = vpack.c.bf16 %v2398_v58, %v2397_v33 }
 0xbc6   :  { %v2104_v6 = vpop.xlane.xlu1 %2103 }
 0xbc7   :  { %v2116_v42 = vmul.f32 0.03125, %v2104_v6  ;;  %v2101_v63 = vpop.xlane.xlu0 %2100  ;;  %v7088_v6 = vld [vmem:[%s7765_s16] ss:$0 sm:$0xff] }
 0xbc8   :  { %v2115_v2 = vmul.f32 0.03125, %v2101_v63 }
 0xbc9   :  { %v2124_v40 = vadd.f32 1e-05, %v2116_v42 }
 0xbca   :  { %v2123_v47 = vadd.f32 1e-05, %v2115_v2  ;;  %v2110_v18 = vpop.xlane.xlu1 %2109 }
 0xbcb   :  { %6084 = vrsqrt.f32 %v2124_v40  ;;  %v2118_v55 = vmul.f32 0.03125, %v2110_v18  ;;  %v2107_v0 = vpop.xlane.xlu0 %2106 }
 0xbcc   :  { %6086 = vrsqrt.f32 %v2123_v47  ;;  %v2117_v21 = vmul.f32 0.03125, %v2107_v0 }
 0xbcd   :  { %v2126_v5 = vadd.f32 1e-05, %v2118_v55 }
 0xbce   :  { %v2125_v39 = vadd.f32 1e-05, %v2117_v21 }
 0xbcf   :  { %6088 = vrsqrt.f32 %v2126_v5 }
 0xbd0   :  { %6090 = vrsqrt.f32 %v2125_v39 }
 0xbd5   :  { %v6085_v46 = vpop.eup %6084 }
 0xbd6   :  { %v6087_v44 = vpop.eup %6086  ;;  %v2140_v15 = vmul.f32 %v6085_v46, %v6991_v7 }
 0xbd7   :  { %v2139_v13 = vmul.f32 %v6087_v44, %v6994_v10  ;;  %v2383_v10 = vld [vmem:[%s7766_s17] sm:$0xff] }
 0xbd8   :  { %v2154_v48 = vmul.f32 %v4734_v28, %v2140_v15 }
 0xbd9   :  { %v6089_v16 = vpop.eup %6088  ;;  %v2153_v19 = vmul.f32 %v4734_v28, %v2139_v13 }
 0xbda   :  { %v6091_v17 = vpop.eup %6090  ;;  %v2142_v8 = vmul.f32 %v6089_v16, %v7001_v37  ;;  %v2168_v61 = vadd.f32 %v4735_v22, %v2154_v48  ;;  %v2384_v37 = vld [vmem:[%s7766_s17 + $0x8] sm:$0xff] }
 0xbdb   :  { %v2167_v54 = vadd.f32 %v4735_v22, %v2153_v19  ;;  %v2141_v31 = vmul.f32 %v6091_v17, %v7005_v11  ;;  %v5732_v11 = vpack.c.bf16 %v2384_v37, %v2383_v10 }
 0xbdc   :  { %v2156_v32 = vmul.f32 %v4734_v28, %v2142_v8 }
 0xbdd   :  { %5349 = vmatprep.mubr.msk.f32.mxu1 %vm555_vm6, %v2167_v54  ;;  %v2155_v30 = vmul.f32 %v4734_v28, %v2141_v31  ;;  %5733 = vmatprep.subr.bf16.mxu0 %v5732_v11  ;;  %v2388_v28 = vld [vmem:[%s7766_s17 + $0x28] sm:$0xff] }
 0xbde   :  { %5350 = vmatmul.mubr.msk.f32.gmra.mrb[44].mxu1 %vm555_vm6, %v2168_v61  ;;  %v2170_v7 = vadd.f32 %v4735_v22, %v2156_v32  ;;  %5735 = vmatpush3.bf16.msra.mxu0 %v5732_v11  ;;  %v5740_v4 = vpack.c.bf16 %v2388_v28, %v2387_v38 }
 0xbdf   :  { %v2169_v60 = vadd.f32 %v4735_v22, %v2155_v30  ;;  %5737 = vmatprep.subr.bf16.mxu0 %v5736_v35  ;;  %v5744_v22 = vpack.c.bf16 %v2390_v36, %v2389_v41 }
 0xbe1   :  { %5352 = vmatprep.mubr.msk.f32.mxu1 %vm555_vm6, %v2169_v60 }
 0xbe2   :  { %5353 = vmatmul.mubr.msk.f32.gmra.mrb[46].mxu1 %vm555_vm6, %v2170_v7  ;;  %5739 = vmatpush3.bf16.msra.mxu0 %v5736_v35 }
 0xbe3   :  { %5741 = vmatprep.subr.bf16.mxu0 %v5740_v4 }
 0xbe6   :  { %5743 = vmatpush3.bf16.msra.mxu0 %v5740_v4 }
 0xbe7   :  { %5745 = vmatprep.subr.bf16.mxu0 %v5744_v22 }
 0xbea   :  { %5747 = vmatpush3.bf16.msra.mxu0 %v5744_v22 }
 0xbeb   :  { %5749 = vmatprep.subr.bf16.mxu0 %v5748_v25 }
 0xbee   :  { %5751 = vmatpush3.bf16.msra.mxu0 %v5748_v25 }
 0xbef   :  { %5753 = vmatprep.subr.bf16.mxu0 %v5752_v62 }
 0xbf2   :  { %5755 = vmatpush3.bf16.msra.mxu0 %v5752_v62 }
 0xbf3   :  { %5757 = vmatprep.subr.bf16.mxu0 %v5756_v53 }
 0xbf6   :  { %5759 = vmatpush3.bf16.msra.mxu0 %v5756_v53 }
 0xbf7   :  { %5761 = vmatprep.subr.bf16.mxu0 %v5760_v1 }
 0xbfa   :  { %5763 = vmatpush3.bf16.msra.mxu0 %v5760_v1 }
 0xbfb   :  { %5780 = vmatprep.subr.bf16.mxu0 %v6261_v50 }
 0xc6f   :  { %v5345_v42 = vpop.f32.mrb[40].mxu1 }
 0xc70   :  { %v2278_v63 = vadd.f32 %v5345_v42, %v7088_v6  ;;  %v2272_v2 = vpop.f32.mrb[41].mxu1 }
 0xc71   :  { %v2273_v40 = vadd.f32 %v7088_v6, %v2272_v2 }
 0xc72   :  { %v2312_v47 = vmul.f32 %v2278_v63, %v2278_v63 }
 0xc73   :  { %v2311_v18 = vmul.f32 %v2273_v40, %v2273_v40 }
 0xc74   :  { %v2320_v55 = vmul.f32 %v2312_v47, %v2278_v63 }
 0xc75   :  { %v2319_v0 = vmul.f32 %v2311_v18, %v2273_v40 }
 0xc76   :  { %v2328_v21 = vmul.f32 0.044715, %v2320_v55 }
 0xc77   :  { %v2327_v5 = vmul.f32 0.044715, %v2319_v0  ;;  %v5348_v39 = vpop.f32.mrb[42].mxu1 }
 0xc78   :  { %v2336_v46 = vadd.f32 %v2328_v21, %v2278_v63  ;;  %v2288_v44 = vadd.f32 %v5348_v39, %v7088_v6  ;;  %v2282_v15 = vpop.f32.mrb[43].mxu1 }
 0xc79   :  { %v2335_v13 = vadd.f32 %v2327_v5, %v2273_v40  ;;  %v2283_v48 = vadd.f32 %v7088_v6, %v2282_v15 }
 0xc7a   :  { %v2344_v16 = vmul.f32 0.7978846, %v2336_v46  ;;  %v2314_v19 = vmul.f32 %v2288_v44, %v2288_v44 }
 0xc7b   :  { %v2343_v17 = vmul.f32 0.7978846, %v2335_v13  ;;  %v2313_v8 = vmul.f32 %v2283_v48, %v2283_v48 }
 0xc7c   :  { %6092 = vtanh.f32 %v2344_v16  ;;  %v2322_v54 = vmul.f32 %v2314_v19, %v2288_v44 }
 0xc7d   :  { %v2321_v31 = vmul.f32 %v2313_v8, %v2283_v48  ;;  %6094 = vtanh.f32 %v2343_v17 }
 0xc7e   :  { %v2330_v61 = vmul.f32 0.044715, %v2322_v54 }
 0xc7f   :  { %v2329_v32 = vmul.f32 0.044715, %v2321_v31 }
 0xc80   :  { %v2338_v30 = vadd.f32 %v2330_v61, %v2288_v44 }
 0xc81   :  { %v2337_v60 = vadd.f32 %v2329_v32, %v2283_v48 }
 0xc82   :  { %v2346_v7 = vmul.f32 0.7978846, %v2338_v30 }
 0xc83   :  { %v2345_v10 = vmul.f32 0.7978846, %v2337_v60 }
 0xc84   :  { %6096 = vtanh.f32 %v2346_v7 }
 0xc85   :  { %6098 = vtanh.f32 %v2345_v10 }
 0xc86   :  { %v6093_v37 = vpop.eup %6092 }
 0xc87   :  { %v6095_v11 = vpop.eup %6094  ;;  %v2360_v3 = vadd.f32 1.0, %v6093_v37 }
 0xc88   :  { %v2359_v34 = vadd.f32 1.0, %v6095_v11 }
 0xc89   :  { %v2368_v35 = vmul.f32 0.5, %v2360_v3 }
 0xc8a   :  { %v2367_v38 = vmul.f32 0.5, %v2359_v34 }
 0xc8b   :  { %v2376_v4 = vmul.f32 %v2368_v35, %v2278_v63 }
 0xc8c   :  { %v2375_v28 = vmul.f32 %v2367_v38, %v2273_v40 }
 0xc8e   :  { %v6097_v41 = vpop.eup %6096  ;;  %5387 = vmatprep.mubr.f32.mxu0 %v2375_v28 }
 0xc8f   :  { %v6099_v36 = vpop.eup %6098  ;;  %5388 = vmatmul.mubr.f32.vlgmr.msra.gmra.mrb[34].mxu0 %v2376_v4  ;;  %v2362_v22 = vadd.f32 1.0, %v6097_v41 }
 0xc90   :  { %v2361_v20 = vadd.f32 1.0, %v6099_v36  ;;  %v4745_v36 = vld [vmem:[%s7767_s18] ss:$0 sm:$0xff] }
 0xc91   :  { %v2370_v29 = vmul.f32 0.5, %v2362_v22 }
 0xc92   :  { %v2369_v25 = vmul.f32 0.5, %v2361_v20 }
 0xc93   :  { %v2378_v57 = vmul.f32 %v2370_v29, %v2288_v44 }
 0xc94   :  { %v2377_v24 = vmul.f32 %v2369_v25, %v2283_v48 }
 0xc96   :  { %5390 = vmatprep.mubr.f32.mxu0 %v2377_v24 }
 0xc97   :  { %5391 = vmatmul.mubr.f32.gmra.mrb[36].mxu0 %v2378_v57 }
 0xcb1   :  { %v5351_v62 = vpop.f32.mrb[44].mxu1 }
 0xcb2   :  { %v2298_v56 = vadd.f32 %v5351_v62, %v7088_v6  ;;  %v2292_v59 = vpop.f32.mrb[45].mxu1 }
 0xcb3   :  { %v2293_v53 = vadd.f32 %v7088_v6, %v2292_v59 }
 0xcb4   :  { %v2316_v33 = vmul.f32 %v2298_v56, %v2298_v56 }
 0xcb5   :  { %v2315_v58 = vmul.f32 %v2293_v53, %v2293_v53  ;;  %v5354_v1 = vpop.f32.mrb[46].mxu1 }
 0xcb6   :  { %v2324_v42 = vmul.f32 %v2316_v33, %v2298_v56  ;;  %v2308_v63 = vadd.f32 %v5354_v1, %v7088_v6  ;;  %v2302_v2 = vpop.f32.mrb[47].mxu1 }
 0xcb7   :  { %v2323_v40 = vmul.f32 %v2315_v58, %v2293_v53  ;;  %v2303_v47 = vadd.f32 %v7088_v6, %v2302_v2 }
 0xcb8   :  { %v2332_v18 = vmul.f32 0.044715, %v2324_v42  ;;  %v2318_v55 = vmul.f32 %v2308_v63, %v2308_v63 }
 0xcb9   :  { %v2331_v0 = vmul.f32 0.044715, %v2323_v40  ;;  %v2317_v21 = vmul.f32 %v2303_v47, %v2303_v47 }
 0xcba   :  { %v2340_v5 = vadd.f32 %v2332_v18, %v2298_v56  ;;  %v2326_v39 = vmul.f32 %v2318_v55, %v2308_v63 }
 0xcbb   :  { %v2339_v46 = vadd.f32 %v2331_v0, %v2293_v53  ;;  %v2325_v44 = vmul.f32 %v2317_v21, %v2303_v47 }
 0xcbc   :  { %v2348_v15 = vmul.f32 0.7978846, %v2340_v5  ;;  %v2334_v13 = vmul.f32 0.044715, %v2326_v39 }
 0xcbd   :  { %v2347_v48 = vmul.f32 0.7978846, %v2339_v46  ;;  %v2333_v16 = vmul.f32 0.044715, %v2325_v44 }
 0xcbe   :  { %v2342_v19 = vadd.f32 %v2334_v13, %v2308_v63  ;;  %6100 = vtanh.f32 %v2348_v15 }
 0xcbf   :  { %v2341_v17 = vadd.f32 %v2333_v16, %v2303_v47  ;;  %6102 = vtanh.f32 %v2347_v48 }
 0xcc0   :  { %v2350_v8 = vmul.f32 0.7978846, %v2342_v19 }
 0xcc1   :  { %v2349_v54 = vmul.f32 0.7978846, %v2341_v17 }
 0xcc2   :  { %6104 = vtanh.f32 %v2350_v8 }
 0xcc3   :  { %6106 = vtanh.f32 %v2349_v54 }
 0xcc8   :  { %v6101_v6 = vpop.eup %6100 }
 0xcc9   :  { %v6103_v31 = vpop.eup %6102  ;;  %v2364_v61 = vadd.f32 1.0, %v6101_v6 }
 0xcca   :  { %v2363_v32 = vadd.f32 1.0, %v6103_v31 }
 0xccb   :  { %v2372_v30 = vmul.f32 0.5, %v2364_v61 }
 0xccc   :  { %v6105_v60 = vpop.eup %6104  ;;  %v2371_v7 = vmul.f32 0.5, %v2363_v32 }
 0xccd   :  { %v6107_v10 = vpop.eup %6106  ;;  %v2366_v37 = vadd.f32 1.0, %v6105_v60  ;;  %v2380_v34 = vmul.f32 %v2372_v30, %v2298_v56 }
 0xcce   :  { %v2379_v11 = vmul.f32 %v2371_v7, %v2293_v53  ;;  %v2365_v3 = vadd.f32 1.0, %v6107_v10 }
 0xccf   :  { %v2374_v35 = vmul.f32 0.5, %v2366_v37 }
 0xcd0   :  { %5393 = vmatprep.mubr.f32.mxu0 %v2379_v11  ;;  %v2373_v38 = vmul.f32 0.5, %v2365_v3  ;;  %v4750_v11 = vld [vmem:[%s7759_s10 + $0x20] sm:$0xff]  ;;  %v4751_v3 = vld [vmem:[%s7759_s10 + $0x28] sm:$0xff] }
 0xcd1   :  { %5394 = vmatmul.mubr.f32.gmra.mrb[38].mxu0 %v2380_v34  ;;  %v2382_v4 = vmul.f32 %v2374_v35, %v2308_v63  ;;  %v5764_v34 = vpack.c.bf16 %v4751_v3, %v4750_v11  ;;  %v4752_v35 = vld [vmem:[%s7759_s10 + $0x30] sm:$0xff] }
 0xcd2   :  { %v2381_v28 = vmul.f32 %v2373_v38, %v2303_v47  ;;  %v4753_v38 = vld [vmem:[%s7759_s10 + $0x38] sm:$0xff] }
 0xcd3   :  { %5765 = vmatprep.subr.bf16.mxu1 %v5764_v34 }
 0xcd4   :  { %5396 = vmatprep.mubr.f32.mxu0 %v2381_v28  ;;  %5767 = vmatpush3.bf16.msra.mxu1 %v5764_v34  ;;  %v5768_v28 = vpack.c.bf16 %v4753_v38, %v4752_v35 }
 0xcd5   :  { %5397 = vmatmul.mubr.f32.gmra.mrb[40].mxu0 %v2382_v4 }
 0xcd6   :  { %5455 = vmatprep.mubr.msk.f32.mxu0 %vm6263_vm7, %v6264_v12  ;;  %5769 = vmatprep.subr.bf16.mxu1 %v5768_v28 }
 0xcd8   :  { %5771 = vmatpush3.bf16.msra.mxu1 %v5768_v28 }
 0xcd9   :  { %5773 = vmatprep.subr.bf16.mxu1 %v6705_v23 }
 0xd62   :  { %v5389_v41 = vpop.f32.mrb[34].mxu0 }
 0xd63   :  { %v2505_v22 = vadd.f32 %v5389_v41, %v6916_v43  ;;  %v2465_v20 = vpop.f32.mrb[35].mxu0 }
 0xd64   :  { %v2504_v29 = vadd.f32 %v2465_v20, %v6918_v9 }
 0xd65   :  { %v7105_v25 = vadd.f32 %v4745_v36, %v2505_v22 }
 0xd66   :  { %v7107_v24 = vadd.f32 %v4745_v36, %v2504_v29 }
 0xd67   :  { %v2534_v57 = vsel %vm555_vm6, %v7105_v25, 0.0 }
 0xd68   :  { %2535 = vadd.xlane.f32.xlu1 %v2534_v57  ;;  %v2531_v62 = vsel %vm555_vm6, %v7107_v24, 0.0 }
 0xd69   :  { %2532 = vadd.xlane.f32.xlu0 %v2531_v62 }
 0xd6a   :  { %v5392_v56 = vpop.f32.mrb[36].mxu0 }
 0xd6b   :  { %v2507_v59 = vadd.f32 %v5392_v56, %v6926_v45  ;;  %v2475_v53 = vpop.f32.mrb[37].mxu0 }
 0xd6c   :  { %v2506_v43 = vadd.f32 %v2475_v53, %v6930_v49 }
 0xd6d   :  { %v7115_v33 = vadd.f32 %v4745_v36, %v2507_v59 }
 0xd6e   :  { %v7117_v9 = vadd.f32 %v4745_v36, %v2506_v43 }
 0xd6f   :  { %v2540_v58 = vsel %vm555_vm6, %v7115_v33, 0.0 }
 0xd70   :  { %2541 = vadd.xlane.f32.xlu1 %v2540_v58  ;;  %v2537_v1 = vsel %vm555_vm6, %v7117_v9, 0.0 }
 0xd71   :  { %2538 = vadd.xlane.f32.xlu0 %v2537_v1 }
 0xda4   :  { %v5395_v42 = vpop.f32.mrb[38].mxu0 }
 0xda5   :  { %v2509_v63 = vadd.f32 %v5395_v42, %v6936_v14  ;;  %v2485_v2 = vpop.f32.mrb[39].mxu0 }
 0xda6   :  { %v2508_v45 = vadd.f32 %v2485_v2, %v6938_v51 }
 0xda7   :  { %v7125_v40 = vadd.f32 %v4745_v36, %v2509_v63 }
 0xda8   :  { %v7127_v49 = vadd.f32 %v4745_v36, %v2508_v45  ;;  %v5398_v47 = vpop.f32.mrb[40].mxu0 }
 0xda9   :  { %v2511_v18 = vadd.f32 %v5398_v47, %v6946_v27  ;;  %v2495_v55 = vpop.f32.mrb[41].mxu0  ;;  %v2546_v0 = vsel %vm555_vm6, %v7125_v40, 0.0 }
 0xdaa   :  { %v2510_v21 = vadd.f32 %v2495_v55, %v6948_v52  ;;  %2547 = vadd.xlane.f32.xlu1 %v2546_v0  ;;  %v2543_v14 = vsel %vm555_vm6, %v7127_v49, 0.0 }
 0xdab   :  { %v7135_v5 = vadd.f32 %v4745_v36, %v2511_v18  ;;  %2544 = vadd.xlane.f32.xlu0 %v2543_v14 }
 0xdac   :  { %v7137_v51 = vadd.f32 %v4745_v36, %v2510_v21 }
 0xdad   :  { %v2552_v39 = vsel %vm555_vm6, %v7135_v5, 0.0 }
 0xdae   :  { %2553 = vadd.xlane.f32.xlu1 %v2552_v39  ;;  %v2549_v27 = vsel %vm555_vm6, %v7137_v51, 0.0 }
 0xdaf   :  { %2550 = vadd.xlane.f32.xlu0 %v2549_v27 }
 0xdf5   :  { %v2536_v46 = vpop.xlane.xlu1 %2535 }
 0xdf6   :  { %v2556_v44 = vmul.f32 0.03125, %v2536_v46  ;;  %v2533_v52 = vpop.xlane.xlu0 %2532 }
 0xdf7   :  { %v2555_v15 = vmul.f32 0.03125, %v2533_v52 }
 0xdf8   :  { %v7144_v13 = vsub.f32 %v7105_v25, %v2556_v44 }
 0xdf9   :  { %v7147_v48 = vsub.f32 %v7107_v24, %v2555_v15 }
 0xdfa   :  { %v2572_v16 = vmul.f32 %v7144_v13, %v7144_v13 }
 0xdfb   :  { %v2571_v19 = vmul.f32 %v7147_v48, %v7147_v48 }
 0xdfc   :  { %v2582_v17 = vsel %vm555_vm6, %v2572_v16, 0.0 }
 0xdfd   :  { %v2542_v8 = vpop.xlane.xlu1 %2541  ;;  %2583 = vadd.xlane.f32.xlu1 %v2582_v17  ;;  %v2579_v54 = vsel %vm555_vm6, %v2571_v19, 0.0 }
 0xdfe   :  { %v2558_v6 = vmul.f32 0.03125, %v2542_v8  ;;  %2580 = vadd.xlane.f32.xlu0 %v2579_v54  ;;  %v2539_v31 = vpop.xlane.xlu0 %2538  ;;  %v4748_v8 = vld [vmem:[%s7757_s8 + $0x1] ss:$0 sm:$0xff] }
 0xdff   :  { %v2557_v61 = vmul.f32 0.03125, %v2539_v31 }
 0xe00   :  { %v7156_v32 = vsub.f32 %v7115_v33, %v2558_v6 }
 0xe01   :  { %v7159_v30 = vsub.f32 %v7117_v9, %v2557_v61  ;;  %v4749_v61 = vld [vmem:[%s7758_s9 + $0x1] ss:$0 sm:$0xff] }
 0xe02   :  { %v2574_v60 = vmul.f32 %v7156_v32, %v7156_v32 }
 0xe03   :  { %v2573_v7 = vmul.f32 %v7159_v30, %v7159_v30 }
 0xe04   :  { %v2588_v10 = vsel %vm555_vm6, %v2574_v60, 0.0 }
 0xe05   :  { %2589 = vadd.xlane.f32.xlu1 %v2588_v10  ;;  %v2585_v37 = vsel %vm555_vm6, %v2573_v7, 0.0 }
 0xe06   :  { %2586 = vadd.xlane.f32.xlu0 %v2585_v37 }
 0xe37   :  { %v2548_v4 = vpop.xlane.xlu1 %2547 }
 0xe38   :  { %v2560_v41 = vmul.f32 0.03125, %v2548_v4  ;;  %v2545_v36 = vpop.xlane.xlu0 %2544 }
 0xe39   :  { %v2559_v22 = vmul.f32 0.03125, %v2545_v36 }
 0xe3a   :  { %v7181_v20 = vsub.f32 %v7125_v40, %v2560_v41 }
 0xe3b   :  { %v7184_v29 = vsub.f32 %v7127_v49, %v2559_v22  ;;  %v2554_v57 = vpop.xlane.xlu1 %2553 }
 0xe3c   :  { %v2562_v62 = vmul.f32 0.03125, %v2554_v57  ;;  %v2551_v56 = vpop.xlane.xlu0 %2550  ;;  %v2576_v59 = vmul.f32 %v7181_v20, %v7181_v20 }
 0xe3d   :  { %v2561_v53 = vmul.f32 0.03125, %v2551_v56  ;;  %v2575_v43 = vmul.f32 %v7184_v29, %v7184_v29 }
 0xe3e   :  { %v7191_v58 = vsub.f32 %v7135_v5, %v2562_v62  ;;  %v2594_v1 = vsel %vm555_vm6, %v2576_v59, 0.0 }
 0xe3f   :  { %v7195_v42 = vsub.f32 %v7137_v51, %v2561_v53  ;;  %2595 = vadd.xlane.f32.xlu1 %v2594_v1  ;;  %v2591_v63 = vsel %vm555_vm6, %v2575_v43, 0.0 }
 0xe40   :  { %2592 = vadd.xlane.f32.xlu0 %v2591_v63  ;;  %v2578_v2 = vmul.f32 %v7191_v58, %v7191_v58 }
 0xe41   :  { %v2577_v45 = vmul.f32 %v7195_v42, %v7195_v42 }
 0xe42   :  { %v2600_v47 = vsel %vm555_vm6, %v2578_v2, 0.0 }
 0xe43   :  { %2601 = vadd.xlane.f32.xlu1 %v2600_v47  ;;  %v2597_v18 = vsel %vm555_vm6, %v2577_v45, 0.0 }
 0xe44   :  { %2598 = vadd.xlane.f32.xlu0 %v2597_v18 }
 0xe8a   :  { %v2584_v55 = vpop.xlane.xlu1 %2583 }
 0xe8b   :  { %v2604_v0 = vmul.f32 0.03125, %v2584_v55  ;;  %v2581_v21 = vpop.xlane.xlu0 %2580 }
 0xe8c   :  { %v2603_v14 = vmul.f32 0.03125, %v2581_v21 }
 0xe8d   :  { %v2612_v39 = vadd.f32 1e-05, %v2604_v0 }
 0xe8e   :  { %v2611_v27 = vadd.f32 1e-05, %v2603_v14 }
 0xe8f   :  { %6108 = vrsqrt.f32 %v2612_v39 }
 0xe90   :  { %6110 = vrsqrt.f32 %v2611_v27 }
 0xe92   :  { %v2590_v46 = vpop.xlane.xlu1 %2589 }
 0xe93   :  { %v2606_v44 = vmul.f32 0.03125, %v2590_v46  ;;  %v2587_v52 = vpop.xlane.xlu0 %2586 }
 0xe94   :  { %v2605_v15 = vmul.f32 0.03125, %v2587_v52 }
 0xe95   :  { %v2614_v16 = vadd.f32 1e-05, %v2606_v44 }
 0xe96   :  { %v2613_v19 = vadd.f32 1e-05, %v2605_v15 }
 0xe97   :  { %6112 = vrsqrt.f32 %v2614_v16 }
 0xe98   :  { %6114 = vrsqrt.f32 %v2613_v19 }
 0xe99   :  { %v6109_v17 = vpop.eup %6108 }
 0xe9a   :  { %v6111_v54 = vpop.eup %6110  ;;  %v2628_v6 = vmul.f32 %v6109_v17, %v7144_v13 }
 0xe9b   :  { %v2627_v31 = vmul.f32 %v6111_v54, %v7147_v48 }
 0xe9c   :  { %v2642_v60 = vmul.f32 %v4748_v8, %v2628_v6 }
 0xe9d   :  { %v2641_v7 = vmul.f32 %v4748_v8, %v2627_v31 }
 0xe9e   :  { %v2656_v37 = vadd.f32 %v4749_v61, %v2642_v60 }
 0xe9f   :  { %v2655_v10 = vadd.f32 %v4749_v61, %v2641_v7 }
 0xea1   :  { %v6113_v11 = vpop.eup %6112  ;;  %5407 = vmatprep.mubr.msk.f32.mxu1 %vm555_vm6, %v2655_v10 }
 0xea2   :  { %v6115_v3 = vpop.eup %6114  ;;  %5408 = vmatmul.mubr.msk.f32.vlgmr.msra.gmra.mrb[48].mxu1 %vm555_vm6, %v2656_v37  ;;  %v2630_v34 = vmul.f32 %v6113_v11, %v7156_v32 }
 0xea3   :  { %v2629_v13 = vmul.f32 %v6115_v3, %v7159_v30  ;;  %5775 = vmatpush3.bf16.msra.mxu1 %v6705_v23 }
 0xea4   :  { %v2644_v48 = vmul.f32 %v4748_v8, %v2630_v34  ;;  %5777 = vmatprep.subr.bf16.mxu1 %v6721_v26 }
 0xea5   :  { %v2643_v35 = vmul.f32 %v4748_v8, %v2629_v13 }
 0xea6   :  { %v2658_v28 = vadd.f32 %v4749_v61, %v2644_v48 }
 0xea7   :  { %v2657_v38 = vadd.f32 %v4749_v61, %v2643_v35  ;;  %5779 = vmatpush3.bf16.msra.mxu1 %v6721_v26 }
 0xea9   :  { %5410 = vmatprep.mubr.msk.f32.mxu1 %vm555_vm6, %v2657_v38 }
 0xeaa   :  { %5411 = vmatmul.mubr.msk.f32.gmra.mrb[50].mxu1 %vm555_vm6, %v2658_v28 }
 0xecc   :  { %v2596_v4 = vpop.xlane.xlu1 %2595 }
 0xecd   :  { %v2608_v41 = vmul.f32 0.03125, %v2596_v4  ;;  %v2593_v36 = vpop.xlane.xlu0 %2592 }
 0xece   :  { %v2607_v32 = vmul.f32 0.03125, %v2593_v36 }
 0xecf   :  { %v2616_v22 = vadd.f32 1e-05, %v2608_v41 }
 0xed0   :  { %v2615_v30 = vadd.f32 1e-05, %v2607_v32  ;;  %v2602_v57 = vpop.xlane.xlu1 %2601 }
 0xed1   :  { %6116 = vrsqrt.f32 %v2616_v22  ;;  %v2610_v23 = vmul.f32 0.03125, %v2602_v57  ;;  %v2599_v62 = vpop.xlane.xlu0 %2598 }
 0xed2   :  { %6118 = vrsqrt.f32 %v2615_v30  ;;  %v2609_v56 = vmul.f32 0.03125, %v2599_v62 }
 0xed3   :  { %v2618_v59 = vadd.f32 1e-05, %v2610_v23 }
 0xed4   :  { %v2617_v53 = vadd.f32 1e-05, %v2609_v56 }
 0xed5   :  { %6120 = vrsqrt.f32 %v2618_v59 }
 0xed6   :  { %6122 = vrsqrt.f32 %v2617_v53 }
 0xedb   :  { %v6117_v26 = vpop.eup %6116 }
 0xedc   :  { %v6119_v43 = vpop.eup %6118  ;;  %v2632_v1 = vmul.f32 %v6117_v26, %v7181_v20 }
 0xedd   :  { %v2631_v63 = vmul.f32 %v6119_v43, %v7184_v29 }
 0xede   :  { %v2646_v2 = vmul.f32 %v4748_v8, %v2632_v1 }
 0xedf   :  { %v6121_v45 = vpop.eup %6120  ;;  %v2645_v47 = vmul.f32 %v4748_v8, %v2631_v63 }
 0xee0   :  { %v6123_v18 = vpop.eup %6122  ;;  %v2634_v55 = vmul.f32 %v6121_v45, %v7191_v58  ;;  %v2660_v14 = vadd.f32 %v4749_v61, %v2646_v2 }
 0xee1   :  { %v2659_v0 = vadd.f32 %v4749_v61, %v2645_v47  ;;  %v2633_v21 = vmul.f32 %v6123_v18, %v7195_v42 }
 0xee2   :  { %v2648_v39 = vmul.f32 %v4748_v8, %v2634_v55 }
 0xee3   :  { %5413 = vmatprep.mubr.msk.f32.mxu1 %vm555_vm6, %v2659_v0  ;;  %v2647_v27 = vmul.f32 %v4748_v8, %v2633_v21 }
 0xee4   :  { %5414 = vmatmul.mubr.msk.f32.gmra.mrb[52].mxu1 %vm555_vm6, %v2660_v14  ;;  %v2662_v20 = vadd.f32 %v4749_v61, %v2648_v39 }
 0xee5   :  { %v2661_v46 = vadd.f32 %v4749_v61, %v2647_v27 }
 0xee7   :  { %5416 = vmatprep.mubr.msk.f32.mxu1 %vm555_vm6, %v2661_v46 }
 0xee8   :  { %5417 = vmatmul.mubr.msk.f32.gmra.mrb[54].mxu1 %vm555_vm6, %v2662_v20 }
 0xf75   :  { %v7229_v29 = vpop.f32.mrb[48].mxu1 }
 0xf76   :  { %v7231_v44 = vpop.f32.mrb[49].mxu1  ;;  %v2999_v19 = vsel %vm1023_vm4, %v7229_v29, -inf }
 0xf77   :  { %v5960_v58 = vpack.i.bf16 %v7229_v29, %v7231_v44  ;;  %v2998_v54 = vsel %vm1023_vm4, %v7231_v44, -inf }
 0xf7d   :  { %v7235_v42 = vpop.f32.mrb[50].mxu1 }
 0xf7e   :  { %v7237_v52 = vpop.f32.mrb[51].mxu1  ;;  %v3001_v10 = vsel %vm1023_vm4, %v7235_v42, -inf }
 0xf7f   :  { %v5965_v15 = vpack.i.bf16 %v7235_v42, %v7237_v52  ;;  %v3000_v34 = vsel %vm1023_vm4, %v7237_v52, -inf }
 0xfb7   :  { %v7241_v16 = vpop.f32.mrb[52].mxu1 }
 0xfb8   :  { %v3004_v17 = vsel %vm1023_vm4, %v7241_v16, -inf  ;;  %v7247_v8 = vpop.f32.mrb[53].mxu1 }
 0xfb9   :  { %v3005_v6 = vmax.f32 %v2999_v19, %v3004_v17  ;;  %v3002_v31 = vsel %vm1023_vm4, %v7247_v8, -inf  ;;  %v5970_v61 = vpack.i.bf16 %v7241_v16, %v7247_v8 }
 0xfba   :  { %v3003_v60 = vmax.f32 %v2998_v54, %v3002_v31 }
 0xfbb   :  { %v7255_v7 = vpop.f32.mrb[54].mxu1 }
 0xfbc   :  { %v3010_v37 = vmax.f32 %v3003_v60, %v3005_v6  ;;  %v3008_v11 = vsel %vm1023_vm4, %v7255_v7, -inf  ;;  %v7261_v3 = vpop.f32.mrb[55].mxu1 }
 0xfbd   :  { %v3009_v13 = vmax.f32 %v3001_v10, %v3008_v11  ;;  %v3006_v48 = vsel %vm1023_vm4, %v7261_v3, -inf  ;;  %v5975_v35 = vpack.i.bf16 %v7255_v7, %v7261_v3  ;;  %v2800_v11 = vsel %vm555_vm6, %v7229_v29, -inf }
 0xfbe   :  { %v3007_v38 = vmax.f32 %v3000_v34, %v3006_v48  ;;  %v2803_v34 = vsel %vm555_vm6, %v7237_v52, -inf }
 0xfc0   :  { %v3011_v28 = vmax.f32 %v3007_v38, %v3009_v13  ;;  %v2806_v13 = vsel %vm555_vm6, %v7235_v42, -inf }
 0xfc2   :  { %v3012_v4 = vmax.f32 %v3010_v37, %v3011_v28  ;;  %v2797_v37 = vsel %vm555_vm6, %v7231_v44, -inf }
 0xfc4   :  { %v3013_v41 = vrot.slane %v3012_v4, 4 }
 0xfc6   :  { %v3014_v36 = vmax.f32 %v3012_v4, %v3013_v41 }
 0xfc8   :  { %v3015_v32 = vrot.slane %v3014_v36, 2 }
 0xfca   :  { %v3016_v22 = vmax.f32 %v3014_v36, %v3015_v32 }
 0xfcc   :  { %v3017_v30 = vrot.slane %v3016_v22, 1 }
 0xfce   :  { %v3018_v57 = vmax.f32 %v3016_v22, %v3017_v30 }
 0xfd0   :  { %v3025_v23 = vsub.f32 %v7261_v3, %v3018_v57  ;;  %v3021_v62 = vsub.f32 %v7237_v52, %v3018_v57  ;;  %v3022_v56 = vsub.f32 %v7235_v42, %v3018_v57  ;;  %v3019_v59 = vsub.f32 %v7231_v44, %v3018_v57 }
 0xfd1   :  { %v3020_v53 = vsub.f32 %v7229_v29, %v3018_v57  ;;  %v3023_v26 = vsub.f32 %v7247_v8, %v3018_v57  ;;  %v3024_v43 = vsub.f32 %v7241_v16, %v3018_v57  ;;  %v3026_v1 = vsub.f32 %v7255_v7, %v3018_v57 }
 0xfd2   :  { %v3031_v63 = vmul.f32 1.442695, %v3021_v62  ;;  %v3033_v2 = vmul.f32 1.442695, %v3022_v56  ;;  %v3027_v45 = vmul.f32 1.442695, %v3019_v59 }
 0xfd3   :  { %v3029_v47 = vmul.f32 1.442695, %v3020_v53  ;;  %v3035_v18 = vmul.f32 1.442695, %v3023_v26  ;;  %v3037_v55 = vmul.f32 1.442695, %v3024_v43 }
 0xfd4   :  { %6124 = vpow2.f32 %v3031_v63  ;;  %v3039_v0 = vmul.f32 1.442695, %v3025_v23  ;;  %v3041_v21 = vmul.f32 1.442695, %v3026_v1  ;;  %v6222_v43 = vld [vmem:[%s7788_s1] sm:$0x3] }
 0xfd5   :  { %6126 = vpow2.f32 %v3033_v2  ;;  %v6223_v1 = vld [vmem:[%s7755_s6] sm:$0xff] }
 0xfd6   :  { %6128 = vpow2.f32 %v3027_v45 }
 0xfd7   :  { %6130 = vpow2.f32 %v3029_v47 }
 0xfd8   :  { %6132 = vpow2.f32 %v3035_v18 }
 0xfd9   :  { %6134 = vpow2.f32 %v3037_v55 }
 0xfda   :  { %6136 = vpow2.f32 %v3039_v0 }
 0xfdb   :  { %6138 = vpow2.f32 %v3041_v21 }
 0xfde   :  { %v7277_v14 = vpop.eup %6124 }
 0xfdf   :  { %v7279_v39 = vpop.eup %6126 }
 0xfe0   :  { %v7281_v27 = vpop.eup %6128  ;;  %v5945_v46 = vpack.i.bf16 %v7279_v39, %v7277_v14 }
 0xfe1   :  { %v7285_v20 = vpop.eup %6130 }
 0xfe2   :  { %v7287_v19 = vpop.eup %6132  ;;  %5946 = vrot.lane.b32.xlu1 %v5945_v46, %s6262_s25  ;;  %v5940_v17 = vpack.i.bf16 %v7285_v20, %v7281_v27 }
 0xfe3   :  { %v7292_v54 = vpop.eup %6134 }
 0xfe4   :  { %v7294_v6 = vpop.eup %6136  ;;  %5941 = vrot.lane.b32.xlu0 %v5940_v17, %s6262_s25  ;;  %v5950_v31 = vpack.i.bf16 %v7292_v54, %v7287_v19 }
 0xfe5   :  { %v7299_v60 = vpop.eup %6138 }
 0xfe6   :  { %5951 = vrot.lane.b32.xlu1 %v5950_v31, %s6262_s25  ;;  %v5955_v10 = vpack.i.bf16 %v7299_v60, %v7294_v6 }
 0xfea   :  { %5956 = vrot.lane.b32.xlu1 %v5955_v10, %s6262_s25 }
0x1003   :  { %2798 = vmax.xlane.f32.xlu0 %v2797_v37 }
0x100e   :  { %2801 = vmax.xlane.f32.xlu1 %v2800_v11 }
0x1012   :  { %2804 = vmax.xlane.f32.xlu1 %v2803_v34 }
0x1016   :  { %2807 = vmax.xlane.f32.xlu1 %v2806_v13 }
0x1054   :  { %v5947_v48 = vpop.permute.xlu1 %5946 }
0x1055   :  { %v5949_v36 = vunpack.i.h.bf16 %v5947_v48  ;;  %v5948_v32 = vunpack.i.l.bf16 %v5947_v48 }
0x1056   :  { %v5942_v38 = vpop.permute.xlu0 %5941 }
0x1057   :  { %v5944_v28 = vunpack.i.h.bf16 %v5942_v38  ;;  %v5943_v4 = vunpack.i.l.bf16 %v5942_v38  ;;  %v5784_v30 = vpack.c.bf16 %v5949_v36, %v5948_v32  ;;  %v6227_v36 = vld [vmem:[%s7755_s6 + $0x20] sm:$0xff]  ;;  %v6228_v32 = vld [vmem:[%s7755_s6 + $0x28] sm:$0xff] }
0x1058   :  { %v5952_v41 = vpop.permute.xlu1 %5951 }
0x1059   :  { %v5781_v22 = vpack.c.bf16 %v5944_v28, %v5943_v4  ;;  %v5954_v57 = vunpack.i.h.bf16 %v5952_v41  ;;  %v5953_v23 = vunpack.i.l.bf16 %v5952_v41  ;;  %v6224_v28 = vld [vmem:[%s7755_s6 + $0x8] sm:$0xff]  ;;  %v6225_v4 = vld [vmem:[%s7755_s6 + $0x10] sm:$0xff]  ;;  %v6226_v41 = vld [vmem:[%s7755_s6 + $0x18] sm:$0xff] }
0x105b   :  { %5782 = vmatpush3.bf16.msra.mxu0 %v5781_v22  ;;  %v5787_v56 = vpack.c.bf16 %v5954_v57, %v5953_v23  ;;  %v6229_v22 = vld [vmem:[%s7755_s6 + $0x30] sm:$0xff] }
0x105c   :  { %5783 = vmatprep.subr.bf16.mxu0 %v6261_v50  ;;  %v5957_v62 = vpop.permute.xlu1 %5956 }
0x105d   :  { %v5959_v59 = vunpack.i.h.bf16 %v5957_v62  ;;  %v5958_v53 = vunpack.i.l.bf16 %v5957_v62 }
0x105f   :  { %5785 = vmatpush3.bf16.msra.mxu0 %v5784_v30  ;;  %v5790_v26 = vpack.c.bf16 %v5959_v59, %v5958_v53  ;;  %v6230_v30 = vld [vmem:[%s7755_s6 + $0x38] sm:$0xff] }
0x1060   :  { %5786 = vmatprep.subr.bf16.mxu0 %v6261_v50 }
0x1063   :  { %5788 = vmatpush3.bf16.msra.mxu0 %v5787_v56 }
0x1064   :  { %5789 = vmatprep.subr.bf16.mxu0 %v6261_v50 }
0x1067   :  { %5791 = vmatpush3.bf16.msra.mxu0 %v5790_v26 }
0x106a   :  { %5456 = vmatmul.mubr.msk.f32.vlgmr.msra.gmra.mrb[42].mxu0 %vm1101_vm8, %v6222_v43 }
0x106b   :  { %5460 = vmatprep.mubr.msk.f32.mxu0 %vm1175_vm9, %v6223_v1 }
0x1090   :  { %v2799_v63 = vpop.xlane.xlu0 %2798 }
0x1091   :  { %v2821_v2 = vsub.f32 %v7231_v44, %v2799_v63 }
0x1093   :  { %v2829_v45 = vmul.f32 1.442695, %v2821_v2 }
0x1095   :  { %6140 = vpow2.f32 %v2829_v45 }
0x109b   :  { %v2802_v47 = vpop.xlane.xlu1 %2801 }
0x109c   :  { %v2822_v18 = vsub.f32 %v7229_v29, %v2802_v47  ;;  %v2809_v47 = vsel %vm555_vm6, %v7247_v8, -inf }
0x109e   :  { %v2831_v55 = vmul.f32 1.442695, %v2822_v18  ;;  %v2812_v18 = vsel %vm555_vm6, %v7241_v16, -inf }
0x109f   :  { %v7326_v0 = vpop.eup %6140  ;;  %v2805_v21 = vpop.xlane.xlu1 %2804 }
0x10a0   :  { %6142 = vpow2.f32 %v2831_v55  ;;  %5427 = vmatprep.mubr.msk.f32.mxu1 %vm555_vm6, %v7326_v0  ;;  %v2823_v46 = vsub.f32 %v7237_v52, %v2805_v21 }
0x10a2   :  { %v2833_v17 = vmul.f32 1.442695, %v2823_v46 }
0x10a3   :  { %v2808_v31 = vpop.xlane.xlu1 %2807 }
0x10a4   :  { %6144 = vpow2.f32 %v2833_v17  ;;  %v2824_v10 = vsub.f32 %v7235_v42, %v2808_v31 }
0x10a6   :  { %v2835_v37 = vmul.f32 1.442695, %v2824_v10 }
0x10a8   :  { %6146 = vpow2.f32 %v2835_v37 }
0x10aa   :  { %v7332_v11 = vpop.eup %6142 }
0x10ab   :  { %5428 = vmatmul.mubr.msk.f32.vlgmr.msra.gmra.mrb[56].mxu1 %vm555_vm6, %v7332_v11 }
0x10ae   :  { %v7336_v34 = vpop.eup %6144 }
0x10af   :  { %5430 = vmatprep.mubr.msk.f32.mxu1 %vm555_vm6, %v7336_v34 }
0x10b2   :  { %v7340_v13 = vpop.eup %6146 }
0x10b3   :  { %5431 = vmatmul.mubr.msk.f32.gmra.mrb[58].mxu1 %vm555_vm6, %v7340_v13 }
0x113d   :  { %v3141_v48 = vpop.f32.mrb[42].mxu0 }
0x113e   :  { %v5457_v38 = vpop.f32.mrb[43].mxu0  ;;  %5458 = vmatprep.subr.msk.mxu0 %vm1200_vm10, %v3141_v48 }
0x113f   :  { %5459 = vmatpush3.msk.msra.mxu0 %vm1200_vm10, %v3141_v48 }
0x1140   :  { %5461 = vmatmul.mubr.msk.f32.vlgmr.msra.gmra.mrb[44].mxu0 %vm1175_vm9, %v6224_v28 }
0x1141   :  { %5463 = vmatprep.mubr.msk.f32.mxu0 %vm1175_vm9, %v6225_v4 }
0x1144   :  { %5464 = vmatmul.mubr.msk.f32.gmra.mrb[46].mxu0 %vm1175_vm9, %v6226_v41 }
0x1145   :  { %5466 = vmatprep.mubr.msk.f32.mxu0 %vm1175_vm9, %v6227_v36 }
0x1148   :  { %5467 = vmatmul.mubr.msk.f32.gmra.mrb[48].mxu0 %vm1175_vm9, %v6228_v32  ;;  %v2815_v32 = vsel %vm555_vm6, %v7261_v3, -inf }
0x1149   :  { %5469 = vmatprep.mubr.msk.f32.mxu0 %vm1175_vm9, %v6229_v22 }
0x114c   :  { %5470 = vmatmul.mubr.msk.f32.gmra.mrb[50].mxu0 %vm1175_vm9, %v6230_v30 }
0x117e   :  { %v7374_v57 = vpop.f32.mrb[56].mxu1 }
0x117f   :  { %v7376_v23 = vpop.f32.mrb[57].mxu1 }
0x1186   :  { %v7378_v62 = vpop.f32.mrb[58].mxu1 }
0x1187   :  { %v7380_v56 = vpop.f32.mrb[59].mxu1 }
0x1213   :  { %v5462_v59 = vpop.f32.mrb[44].mxu0 }
0x1214   :  { %3263 = vrot.lane.b32.xlu1 %v5462_v59, %s6265_s26  ;;  %v3214_v53 = vpop.f32.mrb[45].mxu0 }
0x1215   :  { %3261 = vrot.lane.b32.xlu0 %v3214_v53, %s6265_s26 }
0x1217   :  { %v5465_v26 = vpop.f32.mrb[46].mxu0 }
0x1218   :  { %3267 = vrot.lane.b32.xlu1 %v5465_v26, %s6265_s26  ;;  %v3224_v43 = vpop.f32.mrb[47].mxu0 }
0x1219   :  { %3265 = vrot.lane.b32.xlu0 %v3224_v43, %s6265_s26 }
0x121b   :  { %v5468_v1 = vpop.f32.mrb[48].mxu0 }
0x121c   :  { %3271 = vrot.lane.b32.xlu1 %v5468_v1, %s6265_s26  ;;  %v3234_v63 = vpop.f32.mrb[49].mxu0 }
0x121d   :  { %3269 = vrot.lane.b32.xlu0 %v3234_v63, %s6265_s26 }
0x121f   :  { %v5471_v2 = vpop.f32.mrb[50].mxu0 }
0x1220   :  { %3275 = vrot.lane.b32.xlu1 %v5471_v2, %s6265_s26  ;;  %v3244_v45 = vpop.f32.mrb[51].mxu0 }
0x1221   :  { %3273 = vrot.lane.b32.xlu0 %v3244_v45, %s6265_s26 }
0x1240   :  { %2810 = vmax.xlane.f32.xlu0 %v2809_v47 }
0x1244   :  { %2813 = vmax.xlane.f32.xlu1 %v2812_v18 }
0x1286   :  { %v3264_v55 = vpop.permute.xlu1 %3263 }
0x1287   :  { %6148 = vrcp.f32 %v3264_v55  ;;  %v3262_v21 = vpop.permute.xlu0 %3261 }
0x1288   :  { %6150 = vrcp.f32 %v3262_v21 }
0x128a   :  { %v3268_v46 = vpop.permute.xlu1 %3267 }
0x128b   :  { %6152 = vrcp.f32 %v3268_v46  ;;  %v3266_v17 = vpop.permute.xlu0 %3265 }
0x128c   :  { %6154 = vrcp.f32 %v3266_v17 }
0x128e   :  { %v3272_v22 = vpop.permute.xlu1 %3271 }
0x128f   :  { %v3270_v36 = vpop.permute.xlu0 %3269 }
0x1290   :  { %6156 = vrcp.f32 %v3270_v36 }
0x1291   :  { %v6149_v31 = vpop.eup %6148 }
0x1292   :  { %v6151_v10 = vpop.eup %6150  ;;  %v3288_v37 = vmul.f32 %v6149_v31, %v7285_v20  ;;  %v2818_v20 = vsel %vm555_vm6, %v7255_v7, -inf  ;;  %v3276_v30 = vpop.permute.xlu1 %3275 }
0x1293   :  { %v3286_v48 = vmul.f32 %v6151_v10, %v7281_v27  ;;  %v3274_v27 = vpop.permute.xlu0 %3273 }
0x1294   :  { %3307 = vrot.lane.b32.xlu1 %v3288_v37, %s6262_s25  ;;  %6158 = vrcp.f32 %v3274_v27 }
0x1295   :  { %v6153_v38 = vpop.eup %6152  ;;  %3305 = vrot.lane.b32.xlu0 %v3286_v48, %s6262_s25  ;;  %6160 = vrcp.f32 %v3272_v22 }
0x1296   :  { %v3292_v28 = vmul.f32 %v6153_v38, %v7279_v39  ;;  %v6155_v4 = vpop.eup %6154  ;;  %6162 = vrcp.f32 %v3276_v30 }
0x1297   :  { %v3290_v41 = vmul.f32 %v6155_v4, %v7277_v14 }
0x1299   :  { %3311 = vrot.lane.b32.xlu0 %v3292_v28, %s6262_s25 }
0x129a   :  { %v6157_v39 = vpop.eup %6156 }
0x129b   :  { %v3294_v14 = vmul.f32 %v6157_v39, %v7287_v19 }
0x129d   :  { %3309 = vrot.lane.b32.xlu0 %v3290_v41, %s6262_s25 }
0x129e   :  { %v6159_v59 = vpop.eup %6158 }
0x129f   :  { %v3298_v53 = vmul.f32 %v6159_v59, %v7294_v6  ;;  %v6161_v26 = vpop.eup %6160 }
0x12a0   :  { %v3296_v2 = vmul.f32 %v6161_v26, %v7292_v54  ;;  %v6163_v45 = vpop.eup %6162 }
0x12a1   :  { %v3300_v18 = vmul.f32 %v6163_v45, %v7299_v60 }
0x12b8   :  { %2819 = vmax.xlane.f32.xlu1 %v2818_v20 }
0x12bc   :  { %2816 = vmax.xlane.f32.xlu0 %v2815_v32 }
0x12c9   :  { %3567 = vrot.lane.b32.xlu1 %v3294_v14, %s6262_s25 }
0x12cd   :  { %3571 = vrot.lane.b32.xlu1 %v3298_v53, %s6262_s25  ;;  %v2811_v43 = vpop.xlane.xlu0 %2810 }
0x12ce   :  { %v2825_v1 = vsub.f32 %v7247_v8, %v2811_v43 }
0x12d0   :  { %v2837_v63 = vmul.f32 1.442695, %v2825_v1 }
0x12d1   :  { %v2814_v47 = vpop.xlane.xlu1 %2813  ;;  %5966 = vrot.lane.b32.xlu1 %v5965_v15, %s6266_s27 }
0x12d2   :  { %6164 = vpow2.f32 %v2837_v63  ;;  %v2826_v19 = vsub.f32 %v7241_v16, %v2814_v47  ;;  %3569 = vrot.lane.b32.xlu0 %v3296_v2, %s6262_s25 }
0x12d4   :  { %v2839_v6 = vmul.f32 1.442695, %v2826_v19 }
0x12d5   :  { %5976 = vrot.lane.b32.xlu1 %v5975_v35, %s6266_s27 }
0x12d6   :  { %6166 = vpow2.f32 %v2839_v6  ;;  %3573 = vrot.lane.b32.xlu0 %v3300_v18, %s6262_s25 }
0x12da   :  { %5961 = vrot.lane.b32.xlu0 %v5960_v58, %s6266_s27 }
0x12dc   :  { %v7428_v42 = vpop.eup %6164 }
0x12dd   :  { %5433 = vmatprep.mubr.msk.f32.mxu1 %vm555_vm6, %v7428_v42 }
0x12de   :  { %5971 = vrot.lane.b32.xlu0 %v5970_v61, %s6266_s27 }
0x12e0   :  { %v7436_v52 = vpop.eup %6166 }
0x12e1   :  { %5434 = vmatmul.mubr.msk.f32.gmra.mrb[60].mxu1 %vm555_vm6, %v7436_v52 }
0x1306   :  { %v3308_v35 = vpop.permute.xlu1 %3307 }
0x1307   :  { %v3306_v15 = vpop.permute.xlu0 %3305 }
0x1308   :  { %3317 = vxpose.xlu0.b32.start [1/4] (short) (narrow) %v3306_v15, 32 }
0x130b   :  { %v3312_v29 = vpop.permute.xlu0 %3311 }
0x130c   :  { %3318 = vxpose.xlu0.b32.cont [2/4] (short) (narrow) %v3308_v35, 32  ;;  %v4796_v35 = vld [vmem:[%s7760_s11 + $0x20] sm:$0xff] }
0x130f   :  { %v3310_v44 = vpop.permute.xlu0 %3309 }
0x1310   :  { %3319 = vxpose.xlu0.b32.cont [3/4] (short) (narrow) %v3310_v44, 32  ;;  %v4798_v44 = vld [vmem:[%s7760_s11 + $0x30] sm:$0xff] }
0x1314   :  { %3320 = vxpose.xlu0.b32.end [4/4] (short) (narrow) %v3312_v29, 32  ;;  %v4797_v29 = vld [vmem:[%s7760_s11 + $0x28] sm:$0xff] }
0x1345   :  { %v2820_v58 = vpop.xlane.xlu1 %2819 }
0x1346   :  { %v2828_v54 = vsub.f32 %v7255_v7, %v2820_v58  ;;  %v5824_v58 = vpack.c.bf16 %v4797_v29, %v4796_v35 }
0x1348   :  { %v2843_v8 = vmul.f32 1.442695, %v2828_v54  ;;  %v4799_v54 = vld [vmem:[%s7760_s11 + $0x38] sm:$0xff] }
0x1349   :  { %v3568_v60 = vpop.permute.xlu1 %3567  ;;  %v2817_v55 = vpop.xlane.xlu0 %2816 }
0x134a   :  { %v2827_v16 = vsub.f32 %v7261_v3, %v2817_v55  ;;  %3579 = vxpose.xlu1.b32.start [1/4] (short) (narrow) %v3568_v60, 32  ;;  %v5828_v60 = vpack.c.bf16 %v4799_v54, %v4798_v44 }
0x134c   :  { %v2841_v61 = vmul.f32 1.442695, %v2827_v16  ;;  %v6231_v16 = vld [vmem:[%s7756_s7 + $0x8] sm:$0xff] }
0x134d   :  { %v3572_v21 = vpop.permute.xlu1 %3571  ;;  %v3570_v46 = vpop.permute.xlu0 %3569 }
0x134e   :  { %6168 = vpow2.f32 %v2841_v61  ;;  %3580 = vxpose.xlu1.b32.cont [2/4] (short) (narrow) %v3570_v46, 32 }
0x134f   :  { %6170 = vpow2.f32 %v2843_v8 }
0x1350   :  { %6172 = vrcp.f32 %v7376_v23 }
0x1351   :  { %v5967_v17 = vpop.permute.xlu1 %5966  ;;  %v3574_v31 = vpop.permute.xlu0 %3573  ;;  %6174 = vrcp.f32 %v7374_v57 }
0x1352   :  { %3581 = vxpose.xlu1.b32.cont [3/4] (short) (narrow) %v3572_v21, 32  ;;  %v5969_v10 = vunpack.i.h.bf16 %v5967_v17  ;;  %v5968_v37 = vunpack.i.l.bf16 %v5967_v17  ;;  %6176 = vrcp.f32 %v7380_v56  ;;  %v6232_v21 = vld [vmem:[%s7756_s7] sm:$0xff] }
0x1353   :  { %6178 = vrcp.f32 %v7378_v62 }
0x1354   :  { %v5796_v36 = vpack.c.bf16 %v5969_v10, %v5968_v37 }
0x1355   :  { %v5962_v48 = vpop.permute.xlu0 %5961  ;;  %v5977_v28 = vpop.permute.xlu1 %5976 }
0x1356   :  { %v5964_v38 = vunpack.i.h.bf16 %v5962_v48  ;;  %v5963_v7 = vunpack.i.l.bf16 %v5962_v48  ;;  %3582 = vxpose.xlu1.b32.end [4/4] (short) (narrow) %v3574_v31, 32  ;;  %v5979_v27 = vunpack.i.h.bf16 %v5977_v28  ;;  %v5978_v32 = vunpack.i.l.bf16 %v5977_v28  ;;  %v6233_v31 = vld [vmem:[%s7756_s7 + $0x18] sm:$0xff] }
0x1358   :  { %v7442_v4 = vpop.eup %6168  ;;  %v5792_v3 = vpack.c.bf16 %v5964_v38, %v5963_v7  ;;  %v5812_v14 = vpack.c.bf16 %v5979_v27, %v5978_v32  ;;  %v6234_v38 = vld [vmem:[%s7756_s7 + $0x10] sm:$0xff] }
0x1359   :  { %v7444_v41 = vpop.eup %6170  ;;  %5436 = vmatprep.mubr.msk.f32.mxu1 %vm555_vm6, %v7442_v4  ;;  %v5972_v20 = vpop.permute.xlu0 %5971 }
0x135a   :  { %v5974_v22 = vunpack.i.h.bf16 %v5972_v20  ;;  %v5973_v39 = vunpack.i.l.bf16 %v5972_v20  ;;  %5437 = vmatmul.mubr.msk.f32.gmra.mrb[62].mxu1 %vm555_vm6, %v7444_v41  ;;  %5793 = vmatprep.subr.bf16.mxu1 %v5792_v3  ;;  %v6173_v26 = vpop.eup %6172 }
0x135b   :  { %5795 = vmatpush3.bf16.msra.mxu1 %v5792_v3  ;;  %v2975_v1 = vmul.f32 %v6173_v26, %v7326_v0  ;;  %v6175_v56 = vpop.eup %6174 }
0x135c   :  { %v5808_v30 = vpack.c.bf16 %v5974_v22, %v5973_v39  ;;  %5797 = vmatprep.subr.bf16.mxu1 %v5796_v36  ;;  %v6177_v48 = vpop.eup %6176  ;;  %v2977_v62 = vmul.f32 %v6175_v56, %v7332_v11 }
0x135d   :  { %v2990_v2 = vmul.f32 0.35355338, %v2975_v1  ;;  %v6179_v3 = vpop.eup %6178 }
0x135e   :  { %5809 = vmatprep.subr.bf16.mxu0 %v5808_v30  ;;  %v2991_v27 = vmul.f32 0.35355338, %v2977_v62  ;;  %v2981_v32 = vmul.f32 %v6179_v3, %v7340_v13 }
0x135f   :  { %5799 = vmatpush3.bf16.msra.mxu1 %v5796_v36  ;;  %5811 = vmatpush3.bf16.msra.mxu0 %v5808_v30  ;;  %v2979_v36 = vmul.f32 %v6177_v48, %v7336_v34 }
0x1360   :  { %5813 = vmatprep.subr.bf16.mxu0 %v5812_v14  ;;  %v2993_v30 = vmul.f32 0.35355338, %v2981_v32 }
0x1361   :  { %v2992_v22 = vmul.f32 0.35355338, %v2979_v36 }
0x1363   :  { %5815 = vmatpush3.bf16.msra.mxu0 %v5812_v14 }
0x1364   :  { %5825 = vmatprep.subr.bf16.mxu0 %v5824_v58 }
0x1388   :  { %v3333_v59 = vpop.trf.xlu0 }
0x1389   :  { %5480 = vmatprep.mubr.msk.f32.mxu1 %vm555_vm6, %v3333_v59 }
0x138c   :  { %v3334_v53 = vpop.trf.xlu0 }
0x138d   :  { %5481 = vmatmul.mubr.msk.f32.vlgmr.msra.gmra.mrb[64].mxu1 %vm555_vm6, %v3334_v53 }
0x1390   :  { %v3335_v43 = vpop.trf.xlu0 }
0x1391   :  { %5483 = vmatprep.mubr.msk.f32.mxu1 %vm555_vm6, %v3335_v43 }
0x1394   :  { %v3336_v63 = vpop.trf.xlu0 }
0x1395   :  { %5484 = vmatmul.mubr.msk.f32.gmra.mrb[66].mxu1 %vm555_vm6, %v3336_v63 }
0x1396   :  { %5494 = vmatprep.mubr.msk.f32.mxu1 %vm555_vm6, %v2990_v2 }
0x13b4   :  { %v5435_v45 = vpop.f32.mrb[60].mxu1 }
0x13b5   :  { %v2955_v23 = vpop.f32.mrb[61].mxu1 }
0x13b6   :  { %6180 = vrcp.f32 %v2955_v23 }
0x13b7   :  { %6182 = vrcp.f32 %v5435_v45 }
0x13c0   :  { %v6181_v20 = vpop.eup %6180 }
0x13c1   :  { %v2983_v39 = vmul.f32 %v6181_v20, %v7428_v42  ;;  %v6183_v26 = vpop.eup %6182 }
0x13c2   :  { %v2985_v23 = vmul.f32 %v6183_v26, %v7436_v52 }
0x13c3   :  { %v2994_v14 = vmul.f32 0.35355338, %v2983_v39 }
0x13ca   :  { %v3595_v47 = vpop.trf.xlu1 }
0x13cb   :  { %5508 = vmatprep.mubr.msk.f32.mxu0 %vm555_vm6, %v3595_v47 }
0x13ce   :  { %v3596_v19 = vpop.trf.xlu1 }
0x13cf   :  { %5509 = vmatmul.mubr.msk.f32.vlgmr.msra.gmra.mrb[52].mxu0 %vm555_vm6, %v3596_v19 }
0x13d0   :  { %5827 = vmatpush3.bf16.msra.mxu0 %v5824_v58 }
0x13d1   :  { %5829 = vmatprep.subr.bf16.mxu0 %v5828_v60 }
0x13d2   :  { %v3597_v6 = vpop.trf.xlu1 }
0x13d3   :  { %5511 = vmatprep.mubr.msk.f32.mxu0 %vm555_vm6, %v3597_v6  ;;  %v2995_v6 = vmul.f32 0.35355338, %v2985_v23 }
0x13d4   :  { %5831 = vmatpush3.bf16.msra.mxu0 %v5828_v60 }
0x13d6   :  { %v3598_v0 = vpop.trf.xlu1 }
0x13d7   :  { %5512 = vmatmul.mubr.msk.f32.gmra.mrb[54].mxu0 %vm555_vm6, %v3598_v0 }
0x142d   :  { %v5438_v18 = vpop.f32.mrb[62].mxu1 }
0x142e   :  { %v2965_v15 = vpop.f32.mrb[63].mxu1 }
0x142f   :  { %6184 = vrcp.f32 %v2965_v15 }
0x1430   :  { %6186 = vrcp.f32 %v5438_v18 }
0x1439   :  { %v6185_v63 = vpop.eup %6184 }
0x143a   :  { %v6187_v19 = vpop.eup %6186  ;;  %v2987_v45 = vmul.f32 %v6185_v63, %v7442_v4 }
0x143b   :  { %v2989_v0 = vmul.f32 %v6187_v19, %v7444_v41 }
0x143c   :  { %v2996_v18 = vmul.f32 0.35355338, %v2987_v45 }
0x143d   :  { %v2997_v15 = vmul.f32 0.35355338, %v2989_v0 }
0x1460   :  { %v5482_v55 = vpop.f32.mrb[64].mxu1 }
0x1461   :  { %v3463_v8 = vmul.f32 %v6231_v16, %v5482_v55  ;;  %v3443_v61 = vpop.f32.mrb[65].mxu1  ;;  %v4809_v55 = vld [vmem:[%s7761_s12 + $0x1] ss:$0 sm:$0xff] }
0x1462   :  { %v3462_v46 = vmul.f32 %v6232_v21, %v3443_v61 }
0x1464   :  { %v5800_v17 = vpack.c.bf16 %v3463_v8, %v3462_v46 }
0x1466   :  { %5801 = vmatprep.subr.bf16.mxu1 %v5800_v17 }
0x1467   :  { %5803 = vmatpush3.bf16.msra.mxu1 %v5800_v17 }
0x1468   :  { %v5485_v57 = vpop.f32.mrb[66].mxu1 }
0x1469   :  { %v3465_v10 = vmul.f32 %v6233_v31, %v5485_v57  ;;  %v3453_v37 = vpop.f32.mrb[67].mxu1 }
0x146a   :  { %v3464_v7 = vmul.f32 %v6234_v38, %v3453_v37 }
0x146c   :  { %v5804_v28 = vpack.c.bf16 %v3465_v10, %v3464_v7 }
0x146e   :  { %5805 = vmatprep.subr.bf16.mxu1 %v5804_v28 }
0x146f   :  { %5807 = vmatpush3.bf16.msra.mxu1 %v5804_v28 }
0x1472   :  { %5495 = vmatmul.mubr.msk.f32.vlgmr.msra.gmra.mrb[68].mxu1 %vm555_vm6, %v2991_v27 }
0x1473   :  { %5497 = vmatprep.mubr.msk.f32.mxu1 %vm555_vm6, %v2992_v22 }
0x1476   :  { %5498 = vmatmul.mubr.msk.f32.gmra.mrb[70].mxu1 %vm555_vm6, %v2993_v30 }
0x1477   :  { %5522 = vmatprep.mubr.msk.f32.mxu1 %vm555_vm6, %v2994_v14 }
0x14a2   :  { %v5510_v11 = vpop.f32.mrb[52].mxu0 }
0x14a3   :  { %v3725_v34 = vmul.f32 %v6231_v16, %v5510_v11  ;;  %v3705_v59 = vpop.f32.mrb[53].mxu0 }
0x14a4   :  { %v3724_v53 = vmul.f32 %v6232_v21, %v3705_v59 }
0x14a6   :  { %v5816_v13 = vpack.c.bf16 %v3725_v34, %v3724_v53 }
0x14a8   :  { %5817 = vmatprep.subr.bf16.mxu1 %v5816_v13 }
0x14a9   :  { %5819 = vmatpush3.bf16.msra.mxu1 %v5816_v13 }
0x14aa   :  { %v5513_v42 = vpop.f32.mrb[54].mxu0 }
0x14ab   :  { %v3727_v43 = vmul.f32 %v6233_v31, %v5513_v42  ;;  %v3715_v1 = vpop.f32.mrb[55].mxu0 }
0x14ac   :  { %v3726_v2 = vmul.f32 %v6234_v38, %v3715_v1 }
0x14ae   :  { %v5820_v47 = vpack.c.bf16 %v3727_v43, %v3726_v2 }
0x14b0   :  { %5821 = vmatprep.subr.bf16.mxu1 %v5820_v47 }
0x14b1   :  { %5823 = vmatpush3.bf16.msra.mxu1 %v5820_v47 }
0x14b4   :  { %5523 = vmatmul.mubr.msk.f32.vlgmr.msra.gmra.mrb[72].mxu1 %vm555_vm6, %v2995_v6 }
0x14b5   :  { %5525 = vmatprep.mubr.msk.f32.mxu1 %vm555_vm6, %v2996_v18 }
0x14b8   :  { %5526 = vmatmul.mubr.msk.f32.gmra.mrb[74].mxu1 %vm555_vm6, %v2997_v15  ;;  %v4814_v15 = vld [vmem:[%s7764_s15 + $0x20] sm:$0xff] }
0x1545   :  { %v5496_v35 = vpop.f32.mrb[68].mxu1 }
0x1546   :  { %v3544_v29 = vpop.f32.mrb[69].mxu1 }
0x1547   :  { %5536 = vmatprep.mubr.msk.f32.mxu0 %vm555_vm6, %v3544_v29 }
0x1548   :  { %5537 = vmatmul.mubr.msk.f32.vlgmr.msra.gmra.mrb[56].mxu0 %vm555_vm6, %v5496_v35  ;;  %v4815_v35 = vld [vmem:[%s7764_s15 + $0x28] sm:$0xff] }
0x1549   :  { %v5499_v52 = vpop.f32.mrb[70].mxu1  ;;  %v5832_v29 = vpack.c.bf16 %v4815_v35, %v4814_v15 }
0x154a   :  { %v3554_v4 = vpop.f32.mrb[71].mxu1 }
0x154b   :  { %5539 = vmatprep.mubr.msk.f32.mxu0 %vm555_vm6, %v3554_v4  ;;  %5833 = vmatprep.subr.bf16.mxu1 %v5832_v29  ;;  %v4817_v4 = vld [vmem:[%s7764_s15 + $0x38] sm:$0xff] }
0x154c   :  { %5540 = vmatmul.mubr.msk.f32.gmra.mrb[58].mxu0 %vm555_vm6, %v5499_v52  ;;  %5835 = vmatpush3.bf16.msra.mxu1 %v5832_v29  ;;  %v4816_v52 = vld [vmem:[%s7764_s15 + $0x30] sm:$0xff]  ;;  %s6267_s15 = smov [#allocation2]  }
0x1587   :  { %v5524_v41 = vpop.f32.mrb[72].mxu1 }
0x1588   :  { %v3806_v44 = vpop.f32.mrb[73].mxu1 }
0x1589   :  { %5542 = vmatprep.mubr.msk.f32.mxu0 %vm555_vm6, %v3806_v44 }
0x158a   :  { %5543 = vmatmul.mubr.msk.f32.gmra.mrb[60].mxu0 %vm555_vm6, %v5524_v41  ;;  %v5836_v41 = vpack.c.bf16 %v4817_v4, %v4816_v52 }
0x158b   :  { %v5527_v58 = vpop.f32.mrb[74].mxu1 }
0x158c   :  { %v3816_v54 = vpop.f32.mrb[75].mxu1  ;;  %5837 = vmatprep.subr.bf16.mxu1 %v5836_v41 }
0x158d   :  { %5545 = vmatprep.mubr.msk.f32.mxu0 %vm555_vm6, %v3816_v54  ;;  %5839 = vmatpush3.bf16.msra.mxu1 %v5836_v41 }
0x158e   :  { %5546 = vmatmul.mubr.msk.f32.gmra.mrb[62].mxu0 %vm555_vm6, %v5527_v58  ;;  %5872 = vmatprep.subr.bf16.mxu1 %v6261_v50 }
0x161b   :  { %v5538_v60 = vpop.f32.mrb[56].mxu0 }
0x161c   :  { %v3960_v16 = vadd.f32 %v5538_v60, %v7105_v25  ;;  %v3920_v8 = vpop.f32.mrb[57].mxu0 }
0x161d   :  { %v3959_v61 = vadd.f32 %v3920_v8, %v7107_v24 }
0x161e   :  { %v7515_v21 = vadd.f32 %v4809_v55, %v3960_v16 }
0x161f   :  { %v7517_v46 = vadd.f32 %v4809_v55, %v3959_v61  ;;  %v5541_v17 = vpop.f32.mrb[58].mxu0 }
0x1620   :  { %v3962_v57 = vadd.f32 %v5541_v17, %v7115_v33  ;;  %v3930_v56 = vpop.f32.mrb[59].mxu0  ;;  %v3990_v31 = vsel %vm555_vm6, %v7515_v21, 0.0 }
0x1621   :  { %v3961_v10 = vadd.f32 %v3930_v56, %v7117_v9  ;;  %3991 = vadd.xlane.f32.xlu1 %v3990_v31  ;;  %v3987_v25 = vsel %vm555_vm6, %v7517_v46, 0.0 }
0x1622   :  { %v7525_v37 = vadd.f32 %v4809_v55, %v3962_v57  ;;  %3988 = vadd.xlane.f32.xlu0 %v3987_v25 }
0x1623   :  { %v7529_v48 = vadd.f32 %v4809_v55, %v3961_v10 }
0x1624   :  { %v3996_v24 = vsel %vm555_vm6, %v7525_v37, 0.0 }
0x1625   :  { %v3993_v33 = vsel %vm555_vm6, %v7529_v48, 0.0 }
0x1626   :  { %3997 = vadd.xlane.f32.xlu0 %v3996_v24 }
0x162a   :  { %3994 = vadd.xlane.f32.xlu0 %v3993_v33 }
0x165d   :  { %v5544_v38 = vpop.f32.mrb[60].mxu0 }
0x165e   :  { %v3964_v9 = vadd.f32 %v5544_v38, %v7125_v40  ;;  %v3940_v7 = vpop.f32.mrb[61].mxu0 }
0x165f   :  { %v3963_v62 = vadd.f32 %v3940_v7, %v7127_v49 }
0x1660   :  { %v7535_v28 = vadd.f32 %v4809_v55, %v3964_v9 }
0x1661   :  { %v7537_v3 = vadd.f32 %v4809_v55, %v3963_v62  ;;  %v5547_v36 = vpop.f32.mrb[62].mxu0 }
0x1662   :  { %v3966_v20 = vadd.f32 %v5547_v36, %v7135_v5  ;;  %v3950_v27 = vpop.f32.mrb[63].mxu0  ;;  %v4002_v32 = vsel %vm555_vm6, %v7535_v28, 0.0 }
0x1663   :  { %v3965_v22 = vadd.f32 %v3950_v27, %v7137_v51  ;;  %4003 = vadd.xlane.f32.xlu1 %v4002_v32  ;;  %v3999_v40 = vsel %vm555_vm6, %v7537_v3, 0.0 }
0x1664   :  { %v7545_v39 = vadd.f32 %v4809_v55, %v3966_v20  ;;  %4000 = vadd.xlane.f32.xlu0 %v3999_v40 }
0x1665   :  { %v7547_v49 = vadd.f32 %v4809_v55, %v3965_v22 }
0x1666   :  { %v4008_v30 = vsel %vm555_vm6, %v7545_v39, 0.0 }
0x1667   :  { %4009 = vadd.xlane.f32.xlu1 %v4008_v30  ;;  %v4005_v5 = vsel %vm555_vm6, %v7547_v49, 0.0 }
0x1668   :  { %4006 = vadd.xlane.f32.xlu0 %v4005_v5 }
0x16ae   :  { %v3992_v14 = vpop.xlane.xlu1 %3991 }
0x16af   :  { %v4012_v11 = vmul.f32 0.03125, %v3992_v14  ;;  %v3989_v51 = vpop.xlane.xlu0 %3988 }
0x16b0   :  { %v4011_v34 = vmul.f32 0.03125, %v3989_v51 }
0x16b1   :  { %v7554_v59 = vsub.f32 %v7515_v21, %v4012_v11 }
0x16b2   :  { %v7557_v53 = vsub.f32 %v7517_v46, %v4011_v34 }
0x16b3   :  { %v3998_v13 = vpop.xlane.xlu0 %3997  ;;  %v4028_v42 = vmul.f32 %v7554_v59, %v7554_v59 }
0x16b4   :  { %v4014_v26 = vmul.f32 0.03125, %v3998_v13  ;;  %v4027_v43 = vmul.f32 %v7557_v53, %v7557_v53 }
0x16b5   :  { %v4038_v1 = vsel %vm555_vm6, %v4028_v42, 0.0  ;;  %v4812_v42 = vld [vmem:[%s7762_s13 + $0x1] ss:$0 sm:$0xff] }
0x16b6   :  { %v7565_v63 = vsub.f32 %v7525_v37, %v4014_v26  ;;  %4039 = vadd.xlane.f32.xlu1 %v4038_v1  ;;  %v4035_v2 = vsel %vm555_vm6, %v4027_v43, 0.0 }
0x16b7   :  { %v3995_v23 = vpop.xlane.xlu0 %3994  ;;  %4036 = vadd.xlane.f32.xlu0 %v4035_v2  ;;  %v4813_v2 = vld [vmem:[%s7763_s14 + $0x1] ss:$0 sm:$0xff] }
0x16b8   :  { %v4013_v47 = vmul.f32 0.03125, %v3995_v23  ;;  %v4030_v19 = vmul.f32 %v7565_v63, %v7565_v63 }
0x16ba   :  { %v7571_v45 = vsub.f32 %v7529_v48, %v4013_v47  ;;  %v4044_v6 = vsel %vm555_vm6, %v4030_v19, 0.0 }
0x16bb   :  { %4045 = vadd.xlane.f32.xlu1 %v4044_v6 }
0x16bc   :  { %v4029_v0 = vmul.f32 %v7571_v45, %v7571_v45 }
0x16be   :  { %v4041_v18 = vsel %vm555_vm6, %v4029_v0, 0.0 }
0x16bf   :  { %4042 = vadd.xlane.f32.xlu0 %v4041_v18 }
0x16f0   :  { %v4004_v44 = vpop.xlane.xlu1 %4003 }
0x16f1   :  { %v4016_v58 = vmul.f32 0.03125, %v4004_v44  ;;  %v4001_v54 = vpop.xlane.xlu0 %4000 }
0x16f2   :  { %v4015_v60 = vmul.f32 0.03125, %v4001_v54 }
0x16f3   :  { %v7591_v55 = vsub.f32 %v7535_v28, %v4016_v58 }
0x16f4   :  { %v7594_v16 = vsub.f32 %v7537_v3, %v4015_v60  ;;  %v4010_v8 = vpop.xlane.xlu1 %4009 }
0x16f5   :  { %v4018_v61 = vmul.f32 0.03125, %v4010_v8  ;;  %v4007_v17 = vpop.xlane.xlu0 %4006  ;;  %v4032_v57 = vmul.f32 %v7591_v55, %v7591_v55 }
0x16f6   :  { %v4017_v56 = vmul.f32 0.03125, %v4007_v17  ;;  %v4031_v31 = vmul.f32 %v7594_v16, %v7594_v16 }
0x16f7   :  { %v7601_v10 = vsub.f32 %v7545_v39, %v4018_v61  ;;  %v4050_v25 = vsel %vm555_vm6, %v4032_v57, 0.0 }
0x16f8   :  { %v7605_v24 = vsub.f32 %v7547_v49, %v4017_v56  ;;  %4051 = vadd.xlane.f32.xlu1 %v4050_v25  ;;  %v4047_v33 = vsel %vm555_vm6, %v4031_v31, 0.0 }
0x16f9   :  { %4048 = vadd.xlane.f32.xlu0 %v4047_v33  ;;  %v4034_v38 = vmul.f32 %v7601_v10, %v7601_v10 }
0x16fa   :  { %v4033_v9 = vmul.f32 %v7605_v24, %v7605_v24 }
0x16fb   :  { %v4056_v7 = vsel %vm555_vm6, %v4034_v38, 0.0 }
0x16fc   :  { %4057 = vadd.xlane.f32.xlu1 %v4056_v7  ;;  %v4053_v62 = vsel %vm555_vm6, %v4033_v9, 0.0 }
0x16fd   :  { %4054 = vadd.xlane.f32.xlu0 %v4053_v62 }
0x1743   :  { %v4040_v36 = vpop.xlane.xlu1 %4039 }
0x1744   :  { %v4060_v20 = vmul.f32 0.03125, %v4040_v36  ;;  %v4037_v27 = vpop.xlane.xlu0 %4036 }
0x1745   :  { %v4059_v32 = vmul.f32 0.03125, %v4037_v27 }
0x1746   :  { %v4068_v22 = vadd.f32 1e-05, %v4060_v20 }
0x1747   :  { %v4067_v40 = vadd.f32 1e-05, %v4059_v32 }
0x1748   :  { %6188 = vrsqrt.f32 %v4068_v22  ;;  %v4046_v30 = vpop.xlane.xlu1 %4045 }
0x1749   :  { %6190 = vrsqrt.f32 %v4067_v40  ;;  %v4062_v5 = vmul.f32 0.03125, %v4046_v30 }
0x174b   :  { %v4070_v14 = vadd.f32 1e-05, %v4062_v5  ;;  %v4830_v5 = vld [vmem:[%s7766_s17 + $0x90] sm:$0xff] }
0x174c   :  { %v4043_v11 = vpop.xlane.xlu0 %4042 }
0x174d   :  { %6192 = vrsqrt.f32 %v4070_v14  ;;  %v4061_v51 = vmul.f32 0.03125, %v4043_v11  ;;  %v4831_v14 = vld [vmem:[%s7766_s17 + $0x98] sm:$0xff] }
0x174e   :  { %v5844_v11 = vpack.c.bf16 %v4831_v14, %v4830_v5 }
0x174f   :  { %v4069_v34 = vadd.f32 1e-05, %v4061_v51  ;;  %v4832_v51 = vld [vmem:[%s7766_s17 + $0xa0] sm:$0xff] }
0x1751   :  { %6194 = vrsqrt.f32 %v4069_v34  ;;  %v4833_v34 = vld [vmem:[%s7766_s17 + $0xa8] sm:$0xff] }
0x1752   :  { %v6189_v13 = vpop.eup %6188 }
0x1753   :  { %v6191_v26 = vpop.eup %6190  ;;  %v4084_v43 = vmul.f32 %v6189_v13, %v7554_v59  ;;  %v5848_v13 = vpack.c.bf16 %v4833_v34, %v4832_v51 }
0x1754   :  { %v4083_v1 = vmul.f32 %v6191_v26, %v7557_v53  ;;  %v4835_v26 = vld [vmem:[%s7766_s17 + $0xb8] sm:$0xff] }
0x1755   :  { %v4098_v23 = vmul.f32 %v4812_v42, %v4084_v43 }
0x1756   :  { %v4097_v47 = vmul.f32 %v4812_v42, %v4083_v1  ;;  %v4836_v1 = vld [vmem:[%s7766_s17 + $0xc0] sm:$0xff] }
0x1757   :  { %v6193_v19 = vpop.eup %6192  ;;  %v4112_v0 = vadd.f32 %v4813_v2, %v4098_v23 }
0x1758   :  { %v4111_v6 = vadd.f32 %v4813_v2, %v4097_v47  ;;  %v4086_v18 = vmul.f32 %v6193_v19, %v7565_v63  ;;  %v4838_v47 = vld [vmem:[%s7766_s17 + $0xd0] sm:$0xff]  ;;  %v4839_v19 = vld [vmem:[%s7766_s17 + $0xd8] sm:$0xff] }
0x175a   :  { %5556 = vmatprep.mubr.msk.f32.mxu1 %vm555_vm6, %v4111_v6  ;;  %v4100_v35 = vmul.f32 %v4812_v42, %v4086_v18  ;;  %v5860_v6 = vpack.c.bf16 %v4839_v19, %v4838_v47  ;;  %v4841_v18 = vld [vmem:[%s7766_s17 + $0xe8] sm:$0xff] }
0x175b   :  { %v6195_v15 = vpop.eup %6194  ;;  %5557 = vmatmul.mubr.msk.f32.vlgmr.msra.gmra.mrb[76].mxu1 %vm555_vm6, %v4112_v0  ;;  %v4840_v0 = vld [vmem:[%s7766_s17 + $0xe0] sm:$0xff] }
0x175c   :  { %v4085_v59 = vmul.f32 %v6195_v15, %v7571_v45  ;;  %v4114_v52 = vadd.f32 %v4813_v2, %v4100_v35  ;;  %v5864_v15 = vpack.c.bf16 %v4841_v18, %v4840_v0  ;;  %v4843_v35 = vld [vmem:[%s7766_s17 + $0xf8] sm:$0xff] }
0x175e   :  { %v4099_v53 = vmul.f32 %v4812_v42, %v4085_v59  ;;  %v4842_v59 = vld [vmem:[%s7766_s17 + $0xf0] sm:$0xff] }
0x1760   :  { %v4113_v29 = vadd.f32 %v4813_v2, %v4099_v53  ;;  %v5868_v53 = vpack.c.bf16 %v4843_v35, %v4842_v59 }
0x1762   :  { %5559 = vmatprep.mubr.msk.f32.mxu1 %vm555_vm6, %v4113_v29  ;;  %v7689_v29 = vld [vmem:[%s7765_s16 + $0x1] ss:$0 sm:$0xff] }
0x1763   :  { %5560 = vmatmul.mubr.msk.f32.gmra.mrb[78].mxu1 %vm555_vm6, %v4114_v52 }
0x1785   :  { %v4052_v4 = vpop.xlane.xlu1 %4051 }
0x1786   :  { %v4064_v41 = vmul.f32 0.03125, %v4052_v4  ;;  %v4049_v44 = vpop.xlane.xlu0 %4048 }
0x1787   :  { %v4063_v58 = vmul.f32 0.03125, %v4049_v44 }
0x1788   :  { %v4072_v63 = vadd.f32 1e-05, %v4064_v41 }
0x1789   :  { %v4071_v54 = vadd.f32 1e-05, %v4063_v58  ;;  %v4058_v60 = vpop.xlane.xlu1 %4057 }
0x178a   :  { %6196 = vrsqrt.f32 %v4072_v63  ;;  %v4066_v8 = vmul.f32 0.03125, %v4058_v60  ;;  %v4055_v61 = vpop.xlane.xlu0 %4054 }
0x178b   :  { %6198 = vrsqrt.f32 %v4071_v54  ;;  %v4065_v45 = vmul.f32 0.03125, %v4055_v61 }
0x178c   :  { %v4074_v17 = vadd.f32 1e-05, %v4066_v8 }
0x178d   :  { %v4073_v57 = vadd.f32 1e-05, %v4065_v45 }
0x178e   :  { %6200 = vrsqrt.f32 %v4074_v17 }
0x178f   :  { %6202 = vrsqrt.f32 %v4073_v57 }
0x1794   :  { %v6197_v56 = vpop.eup %6196 }
0x1795   :  { %v6199_v31 = vpop.eup %6198  ;;  %v4088_v25 = vmul.f32 %v6197_v56, %v7591_v55 }
0x1796   :  { %v4087_v33 = vmul.f32 %v6199_v31, %v7594_v16  ;;  %v4828_v16 = vld [vmem:[%s7766_s17 + $0x80] sm:$0xff] }
0x1797   :  { %v4102_v38 = vmul.f32 %v4812_v42, %v4088_v25 }
0x1798   :  { %v6201_v9 = vpop.eup %6200  ;;  %v4101_v7 = vmul.f32 %v4812_v42, %v4087_v33 }
0x1799   :  { %v6203_v62 = vpop.eup %6202  ;;  %v4090_v36 = vmul.f32 %v6201_v9, %v7601_v10  ;;  %v4116_v32 = vadd.f32 %v4813_v2, %v4102_v38  ;;  %v4829_v10 = vld [vmem:[%s7766_s17 + $0x88] sm:$0xff] }
0x179a   :  { %v4115_v20 = vadd.f32 %v4813_v2, %v4101_v7  ;;  %v4089_v27 = vmul.f32 %v6203_v62, %v7605_v24  ;;  %v5840_v24 = vpack.c.bf16 %v4829_v10, %v4828_v16 }
0x179b   :  { %v4104_v22 = vmul.f32 %v4812_v42, %v4090_v36 }
0x179c   :  { %5562 = vmatprep.mubr.msk.f32.mxu1 %vm555_vm6, %v4115_v20  ;;  %v4103_v40 = vmul.f32 %v4812_v42, %v4089_v27  ;;  %5841 = vmatprep.subr.bf16.mxu0 %v5840_v24  ;;  %v4834_v42 = vld [vmem:[%s7766_s17 + $0xb0] sm:$0xff] }
0x179d   :  { %5563 = vmatmul.mubr.msk.f32.gmra.mrb[80].mxu1 %vm555_vm6, %v4116_v32  ;;  %v4118_v55 = vadd.f32 %v4813_v2, %v4104_v22  ;;  %5843 = vmatpush3.bf16.msra.mxu0 %v5840_v24  ;;  %v5852_v43 = vpack.c.bf16 %v4835_v26, %v4834_v42 }
0x179e   :  { %v4117_v30 = vadd.f32 %v4813_v2, %v4103_v40  ;;  %5845 = vmatprep.subr.bf16.mxu0 %v5844_v11  ;;  %v4837_v2 = vld [vmem:[%s7766_s17 + $0xc8] sm:$0xff] }
0x179f   :  { %v5856_v23 = vpack.c.bf16 %v4837_v2, %v4836_v1 }
0x17a0   :  { %5565 = vmatprep.mubr.msk.f32.mxu1 %vm555_vm6, %v4117_v30 }
0x17a1   :  { %5566 = vmatmul.mubr.msk.f32.gmra.mrb[82].mxu1 %vm555_vm6, %v4118_v55  ;;  %5847 = vmatpush3.bf16.msra.mxu0 %v5844_v11 }
0x17a2   :  { %5628 = vmatprep.mubr.msk.f32.mxu1 %vm6263_vm7, %v6264_v12  ;;  %5849 = vmatprep.subr.bf16.mxu0 %v5848_v13 }
0x17a5   :  { %5851 = vmatpush3.bf16.msra.mxu0 %v5848_v13 }
0x17a6   :  { %5853 = vmatprep.subr.bf16.mxu0 %v5852_v43 }
0x17a9   :  { %5855 = vmatpush3.bf16.msra.mxu0 %v5852_v43 }
0x17aa   :  { %5857 = vmatprep.subr.bf16.mxu0 %v5856_v23 }
0x17ad   :  { %5859 = vmatpush3.bf16.msra.mxu0 %v5856_v23 }
0x17ae   :  { %5861 = vmatprep.subr.bf16.mxu0 %v5860_v6 }
0x17b1   :  { %5863 = vmatpush3.bf16.msra.mxu0 %v5860_v6 }
0x17b2   :  { %5865 = vmatprep.subr.bf16.mxu0 %v5864_v15 }
0x17b5   :  { %5867 = vmatpush3.bf16.msra.mxu0 %v5864_v15 }
0x17b6   :  { %5869 = vmatprep.subr.bf16.mxu0 %v5868_v53 }
0x17b9   :  { %5871 = vmatpush3.bf16.msra.mxu0 %v5868_v53 }
0x182e   :  { %v5558_v52 = vpop.f32.mrb[76].mxu1 }
0x182f   :  { %v4228_v4 = vadd.f32 %v5558_v52, %v7689_v29  ;;  %v4222_v41 = vpop.f32.mrb[77].mxu1 }
0x1830   :  { %v4223_v44 = vadd.f32 %v7689_v29, %v4222_v41 }
0x1831   :  { %v4262_v58 = vmul.f32 %v4228_v4, %v4228_v4 }
0x1832   :  { %v4261_v63 = vmul.f32 %v4223_v44, %v4223_v44 }
0x1833   :  { %v4270_v54 = vmul.f32 %v4262_v58, %v4228_v4 }
0x1834   :  { %v4269_v60 = vmul.f32 %v4261_v63, %v4223_v44 }
0x1835   :  { %v4278_v8 = vmul.f32 0.044715, %v4270_v54 }
0x1836   :  { %v4277_v61 = vmul.f32 0.044715, %v4269_v60  ;;  %v5561_v45 = vpop.f32.mrb[78].mxu1 }
0x1837   :  { %v4286_v17 = vadd.f32 %v4278_v8, %v4228_v4  ;;  %v4238_v57 = vadd.f32 %v5561_v45, %v7689_v29  ;;  %v4232_v56 = vpop.f32.mrb[79].mxu1 }
0x1838   :  { %v4285_v31 = vadd.f32 %v4277_v61, %v4223_v44  ;;  %v4233_v25 = vadd.f32 %v7689_v29, %v4232_v56 }
0x1839   :  { %v4294_v33 = vmul.f32 0.7978846, %v4286_v17  ;;  %v4264_v38 = vmul.f32 %v4238_v57, %v4238_v57 }
0x183a   :  { %v4293_v9 = vmul.f32 0.7978846, %v4285_v31  ;;  %v4263_v7 = vmul.f32 %v4233_v25, %v4233_v25 }
0x183b   :  { %6204 = vtanh.f32 %v4294_v33  ;;  %v4272_v62 = vmul.f32 %v4264_v38, %v4238_v57 }
0x183c   :  { %v4271_v36 = vmul.f32 %v4263_v7, %v4233_v25  ;;  %6206 = vtanh.f32 %v4293_v9 }
0x183d   :  { %v4280_v20 = vmul.f32 0.044715, %v4272_v62 }
0x183e   :  { %v4279_v27 = vmul.f32 0.044715, %v4271_v36 }
0x183f   :  { %v4288_v32 = vadd.f32 %v4280_v20, %v4238_v57 }
0x1840   :  { %v4287_v22 = vadd.f32 %v4279_v27, %v4233_v25 }
0x1841   :  { %v4296_v40 = vmul.f32 0.7978846, %v4288_v32 }
0x1842   :  { %v4295_v30 = vmul.f32 0.7978846, %v4287_v22 }
0x1843   :  { %6208 = vtanh.f32 %v4296_v40 }
0x1844   :  { %6210 = vtanh.f32 %v4295_v30 }
0x1845   :  { %v6205_v55 = vpop.eup %6204 }
0x1846   :  { %v6207_v16 = vpop.eup %6206  ;;  %v4310_v10 = vadd.f32 1.0, %v6205_v55 }
0x1847   :  { %v4309_v24 = vadd.f32 1.0, %v6207_v16 }
0x1848   :  { %v4318_v5 = vmul.f32 0.5, %v4310_v10 }
0x1849   :  { %v4317_v14 = vmul.f32 0.5, %v4309_v24 }
0x184a   :  { %v4326_v51 = vmul.f32 %v4318_v5, %v4228_v4 }
0x184b   :  { %v4325_v11 = vmul.f32 %v4317_v14, %v4223_v44 }
0x184d   :  { %v6209_v34 = vpop.eup %6208  ;;  %5600 = vmatprep.mubr.f32.mxu0 %v4325_v11 }
0x184e   :  { %v6211_v13 = vpop.eup %6210  ;;  %5601 = vmatmul.mubr.f32.vlgmr.msra.gmra.mrb[64].mxu0 %v4326_v51  ;;  %v4312_v42 = vadd.f32 1.0, %v6209_v34  ;;  %v4845_v51 = vld [vmem:[%s7767_s18 + $0x1] ss:$0 sm:$0xff] }
0x184f   :  { %v4311_v26 = vadd.f32 1.0, %v6211_v13 }
0x1850   :  { %v4320_v43 = vmul.f32 0.5, %v4312_v42 }
0x1851   :  { %v4319_v1 = vmul.f32 0.5, %v4311_v26 }
0x1852   :  { %v4328_v23 = vmul.f32 %v4320_v43, %v4238_v57 }
0x1853   :  { %v4327_v2 = vmul.f32 %v4319_v1, %v4233_v25 }
0x1855   :  { %5603 = vmatprep.mubr.f32.mxu0 %v4327_v2 }
0x1856   :  { %5604 = vmatmul.mubr.f32.gmra.mrb[66].mxu0 %v4328_v23 }
0x1870   :  { %v5564_v47 = vpop.f32.mrb[80].mxu1 }
0x1871   :  { %v4248_v19 = vadd.f32 %v5564_v47, %v7689_v29  ;;  %v4242_v6 = vpop.f32.mrb[81].mxu1 }
0x1872   :  { %v4243_v0 = vadd.f32 %v7689_v29, %v4242_v6 }
0x1873   :  { %v4266_v18 = vmul.f32 %v4248_v19, %v4248_v19 }
0x1874   :  { %v4265_v15 = vmul.f32 %v4243_v0, %v4243_v0  ;;  %v5567_v59 = vpop.f32.mrb[82].mxu1 }
0x1875   :  { %v4274_v35 = vmul.f32 %v4266_v18, %v4248_v19  ;;  %v4258_v53 = vadd.f32 %v5567_v59, %v7689_v29  ;;  %v4252_v52 = vpop.f32.mrb[83].mxu1 }
0x1876   :  { %v4273_v4 = vmul.f32 %v4265_v15, %v4243_v0  ;;  %v4253_v41 = vadd.f32 %v7689_v29, %v4252_v52 }
0x1877   :  { %v4282_v44 = vmul.f32 0.044715, %v4274_v35  ;;  %v4268_v58 = vmul.f32 %v4258_v53, %v4258_v53 }
0x1878   :  { %v4281_v63 = vmul.f32 0.044715, %v4273_v4  ;;  %v4267_v54 = vmul.f32 %v4253_v41, %v4253_v41 }
0x1879   :  { %v4290_v60 = vadd.f32 %v4282_v44, %v4248_v19  ;;  %v4276_v8 = vmul.f32 %v4268_v58, %v4258_v53 }
0x187a   :  { %v4289_v61 = vadd.f32 %v4281_v63, %v4243_v0  ;;  %v4275_v45 = vmul.f32 %v4267_v54, %v4253_v41  ;;  %v4558_v54 = vld [vmem:[%s7768_s19 + $0x10] sm:$0xff] }
0x187b   :  { %v4298_v17 = vmul.f32 0.7978846, %v4290_v60  ;;  %v4284_v57 = vmul.f32 0.044715, %v4276_v8 }
0x187c   :  { %v4297_v56 = vmul.f32 0.7978846, %v4289_v61  ;;  %v4283_v31 = vmul.f32 0.044715, %v4275_v45 }
0x187d   :  { %v4292_v25 = vadd.f32 %v4284_v57, %v4258_v53  ;;  %6212 = vtanh.f32 %v4298_v17 }
0x187e   :  { %v4291_v33 = vadd.f32 %v4283_v31, %v4253_v41  ;;  %6214 = vtanh.f32 %v4297_v56 }
0x187f   :  { %v4300_v38 = vmul.f32 0.7978846, %v4292_v25  ;;  %v4848_v25 = vld [vmem:[%s7769_s20] ss:$0 sm:$0xff] }
0x1880   :  { %v4299_v9 = vmul.f32 0.7978846, %v4291_v33 }
0x1881   :  { %6216 = vtanh.f32 %v4300_v38 }
0x1882   :  { %6218 = vtanh.f32 %v4299_v9 }
0x1887   :  { %v6213_v29 = vpop.eup %6212 }
0x1888   :  { %v6215_v7 = vpop.eup %6214  ;;  %v4314_v62 = vadd.f32 1.0, %v6213_v29 }
0x1889   :  { %v4313_v36 = vadd.f32 1.0, %v6215_v7 }
0x188a   :  { %v4322_v20 = vmul.f32 0.5, %v4314_v62 }
0x188b   :  { %v6217_v27 = vpop.eup %6216  ;;  %v4321_v32 = vmul.f32 0.5, %v4313_v36 }
0x188c   :  { %v6219_v22 = vpop.eup %6218  ;;  %v4316_v40 = vadd.f32 1.0, %v6217_v27  ;;  %v4330_v16 = vmul.f32 %v4322_v20, %v4248_v19 }
0x188d   :  { %v4329_v30 = vmul.f32 %v4321_v32, %v4243_v0  ;;  %v4315_v55 = vadd.f32 1.0, %v6219_v22 }
0x188e   :  { %v4324_v10 = vmul.f32 0.5, %v4316_v40 }
0x188f   :  { %5606 = vmatprep.mubr.f32.mxu0 %v4329_v30  ;;  %v4323_v24 = vmul.f32 0.5, %v4315_v55 }
0x1890   :  { %5607 = vmatmul.mubr.f32.gmra.mrb[68].mxu0 %v4330_v16  ;;  %v4332_v14 = vmul.f32 %v4324_v10, %v4258_v53 }
0x1891   :  { %v4331_v5 = vmul.f32 %v4323_v24, %v4253_v41 }
0x1893   :  { %5609 = vmatprep.mubr.f32.mxu0 %v4331_v5 }
0x1894   :  { %5610 = vmatmul.mubr.f32.gmra.mrb[70].mxu0 %v4332_v14 }
0x1921   :  { %v5602_v11 = vpop.f32.mrb[64].mxu0 }
0x1922   :  { %v4456_v34 = vadd.f32 %v5602_v11, %v7515_v21  ;;  %v4416_v13 = vpop.f32.mrb[65].mxu0 }
0x1923   :  { %v4455_v42 = vadd.f32 %v4416_v13, %v7517_v46 }
0x1924   :  { %v4472_v26 = vadd.f32 %v4845_v51, %v4456_v34 }
0x1925   :  { %v4471_v43 = vadd.f32 %v4845_v51, %v4455_v42 }
0x1927   :  { %v5873_v1 = vpack.c.bf16 %v4472_v26, %v4471_v43 }
0x1929   :  { %v5605_v2 = vpop.f32.mrb[66].mxu0  ;;  %5874 = vmatpush3.bf16.msra.mxu1 %v5873_v1 }
0x192a   :  { %v4458_v23 = vadd.f32 %v5605_v2, %v7525_v37  ;;  %v4426_v47 = vpop.f32.mrb[67].mxu0  ;;  %5875 = vmatprep.subr.bf16.mxu1 %v6261_v50 }
0x192b   :  { %v4457_v19 = vadd.f32 %v4426_v47, %v7529_v48 }
0x192c   :  { %v4474_v6 = vadd.f32 %v4845_v51, %v4458_v23 }
0x192d   :  { %v4473_v0 = vadd.f32 %v4845_v51, %v4457_v19 }
0x192f   :  { %v5876_v18 = vpack.c.bf16 %v4474_v6, %v4473_v0 }
0x1931   :  { %5877 = vmatpush3.bf16.msra.mxu1 %v5876_v18 }
0x1932   :  { %5878 = vmatprep.subr.bf16.mxu1 %v6261_v50 }
0x1963   :  { %v5608_v21 = vpop.f32.mrb[68].mxu0 }
0x1964   :  { %v4460_v46 = vadd.f32 %v5608_v21, %v7535_v28  ;;  %v4436_v15 = vpop.f32.mrb[69].mxu0  ;;  %v6235_v28 = vld [vmem:[%s7788_s1] sm:$0x3] }
0x1965   :  { %v4459_v59 = vadd.f32 %v4436_v15, %v7537_v3  ;;  %v4556_v3 = vld [vmem:[%s7768_s19] sm:$0xff] }
0x1966   :  { %v4476_v35 = vadd.f32 %v4845_v51, %v4460_v46 }
0x1967   :  { %v4475_v53 = vadd.f32 %v4845_v51, %v4459_v59  ;;  %v5611_v37 = vpop.f32.mrb[70].mxu0 }
0x1968   :  { %v4462_v52 = vadd.f32 %v5611_v37, %v7545_v39  ;;  %v4446_v4 = vpop.f32.mrb[71].mxu0  ;;  %v4557_v39 = vld [vmem:[%s7768_s19 + $0x8] sm:$0xff] }
0x1969   :  { %v5879_v41 = vpack.c.bf16 %v4476_v35, %v4475_v53  ;;  %v4461_v48 = vadd.f32 %v4446_v4, %v7547_v49  ;;  %v5885_v49 = vpack.c.bf16 %v4557_v39, %v4556_v3 }
0x196a   :  { %v4478_v44 = vadd.f32 %v4845_v51, %v4462_v52 }
0x196b   :  { %v4477_v58 = vadd.f32 %v4845_v51, %v4461_v48  ;;  %5880 = vmatpush3.bf16.msra.mxu1 %v5879_v41 }
0x196c   :  { %5881 = vmatprep.subr.bf16.mxu1 %v6261_v50 }
0x196d   :  { %v5882_v63 = vpack.c.bf16 %v4478_v44, %v4477_v58 }
0x196f   :  { %5883 = vmatpush3.bf16.msra.mxu1 %v5882_v63 }
0x1970   :  { %5884 = vmatprep.subr.bf16.mxu1 %v6261_v50 }
0x1972   :  { %5629 = vmatmul.mubr.msk.f32.vlgmr.msra.gmra.mrb[84].mxu1 %vm1101_vm8, %v6235_v28 }
0x1973   :  { %5639 = vmatprep.mubr.msk.f32.mxu1 %vm6263_vm7, %v6264_v12  ;;  %5886 = vmatpush3.bf16.msra.mxu1 %v5885_v49  ;;  %v4559_v12 = vld [vmem:[%s7768_s19 + $0x18] sm:$0xff]  ;;  %s4648_s19 = sshll.u32 %s6267_s15, 4  ;;  %s4649_s19 = int_to_ptr.vmem [resolvable:$true] %s4648_s19 }
0x1974   :  { %5887 = vmatprep.subr.bf16.mxu1 %v6261_v50  ;;  %v5888_v60 = vpack.c.bf16 %v4559_v12, %v4558_v54  ;;  %s6236_s22 = scalar_lea.vmem %s4649_s19, 32  ;;  %p6241_p1 = scmp.lt.s32.totalorder %s4649_s19, %s4649_s19 }
0x1975   :  { %p6237_p0 = scmp.ne.s32.totalorder %s4649_s19, %s6236_s22  ;;  %p6242_p2 = scmp.lt.s32.totalorder %s6236_s22, %s6236_s22 }
0x1977   :  { %5889 = vmatpush3.bf16.msra.mxu1 %v5888_v60  ;;  %p6243_p3 = por %p6242_p2, %p6241_p1 }
0x1979   :  { %p6244_p4 = pnand %p6243_p3, %p6237_p0 }
0x1a45   :  { %v4545_v8 = vpop.f32.mrb[84].mxu1 }
0x1a46   :  { %v4549_v61 = vmul.f32 0.03125, %v4545_v8  ;;  %v5630_v45 = vpop.f32.mrb[85].mxu1 }
0x1a48   :  { %v4551_v17 = vmin.f32 %v4549_v61, 0.0  ;;  %vm4550_vm11 = vcmp.gt.f32.partialorder %v4549_v61, 0.0 }
0x1a4a   :  { %v4552_v57 = vmul.f32 1.442695, %v4551_v17 }
0x1a4c   :  { %6220 = vpow2.f32 %v4552_v57 }
0x1a56   :  { %v6221_v56 = vpop.eup %6220 }
0x1a57   :  { %v4847_v31 = vadd.f32 -1.0, %v6221_v56 }
0x1a59   :  { %v4555_v50 = vsel %vm4550_vm11, %v4549_v61, %v4847_v31 }
0x1a5a   :  { %5640 = vmatmul.mubr.msk.f32.vlgmr.msra.gmra.mrb[86].mxu1 %vm555_vm6, %v4555_v50 }
0x1b2d   :  { %v4636_v33 = vpop.f32.mrb[86].mxu1 }
0x1b2e   :  { %v4637_v38 = vadd.f32 %v4848_v25, %v4636_v33  ;;  %v5641_v9 = vpop.f32.mrb[87].mxu1 }
0x1b30   :  { %4641 = vst.msk [vmem:[#allocation2] sm:$0x3] %vm4640_vm12, %v4637_v38 }
0x1b31   :  { %6247 = shalt.err (!%p6244_p4)
}
0x1b32   :  { %s6248_s13 = scalar_lea.hbm %s7770_s21, 32 }
0x1b33   :  { %p6249_p5 = scmp.ne.s32.totalorder %s7770_s21, %s6248_s13  ;;  %p6252_p6 = scmp.lt.u32.totalorder %s6248_s13, %s7770_s21 }
0x1b35   :  { %p6254_p7 = pnand %p6252_p6, %p6249_p5 }
0x1b37   :  { %6257 = shalt.err (!%p6254_p7)
}
0x1b38   :  { %4651 = dma.vmem_to_hbm [thread:$0]  %s4649_s19, 32, %s7770_s21, [#allocation3]  }
0x1b39   :  { %6258 = dma.done.wait [#allocation3], 32  }
0x1b3a   :  { %6259 = vsyncadd [#allocation3], 4294967264 }
0x1b3b   :  { %4655 = vsyncpa [#allocation3], 1 }

</bundles_post_ra>
